<compile_context>
chip_gen: v7x
topology: tpu7x:2x2x1
jax: 0.10.0
libtpu: 0.0.40
codegen_flags: <defaults>
</compile_context>

<pallas_src>
import numpy as np
import jax
import jax.numpy as jnp
from jax import lax
from jax.experimental import pallas as pl
from jax.experimental.pallas import tpu as pltpu

_MSSSIM_WEIGHTS = (0.0448, 0.2856, 0.3001, 0.2363, 0.1333)


def _gaussian_1d(window_size: int, sigma: float) -> np.ndarray:
    # Same as the PyTorch `gaussian()` helper (deterministic, no checkpoint).
    xs = np.arange(window_size, dtype=np.float64)
    g = np.exp(-((xs - window_size // 2) ** 2) / (2.0 * sigma ** 2))
    return (g / g.sum()).astype(np.float32)


def _level_meta(H: int, W: int, levels: int):
    """Per level: (h, w, window_size, h_out, w_out) matching F.conv2d(padding=ws//2)."""
    meta = []
    h, w = H, W
    for _ in range(levels):
        wsz = min(h, w, 11)
        pad = wsz // 2
        hout = h + 2 * pad - wsz + 1
        wout = w + 2 * pad - wsz + 1
        meta.append((h, w, wsz, hout, wout))
        h //= 2
        w //= 2
    return meta


def _build_matrices(meta, levels):
    """Per-level rectangular matrices.

    Gaussian conv with zero padding == GH_l @ x @ GW_l with
      GH_l: (hout, h),  GW_l: (w, wout).
    2x2 avg-pool (kernel=2, stride=2) == PH_l @ x @ PW_l with
      PH_l: (h//2, h),  PW_l: (w, w//2).
    """
    GH, GW, PH, PW = [], [], [], []
    for l, (h, w, wsz, hout, wout) in enumerate(meta):
        sigma = 1.5 * wsz / 11.0
        g = _gaussian_1d(wsz, sigma)
        pad = wsz // 2
        gh = np.zeros((hout, h), np.float32)
        gw = np.zeros((w, wout), np.float32)
        for o in range(hout):
            for k in range(wsz):
                i = o + k - pad
                if 0 <= i < h:
                    gh[o, i] = g[k]
        for o in range(wout):
            for k in range(wsz):
                i = o + k - pad
                if 0 <= i < w:
                    gw[i, o] = g[k]
        GH.append(gh)
        GW.append(gw)
        if l < levels - 1:
            ph = np.zeros((h // 2, h), np.float32)
            pw = np.zeros((w, w // 2), np.float32)
            for j in range(h // 2):
                ph[j, 2 * j] = 0.5
                ph[j, 2 * j + 1] = 0.5
            for j in range(w // 2):
                pw[2 * j, j] = 0.5
                pw[2 * j + 1, j] = 0.5
            PH.append(ph)
            PW.append(pw)
    return GH, GW, PH, PW


def _make_msssim_kernel(levels, meta, c1, c2):
    c1 = float(c1)
    c2 = float(c2)
    npool = levels - 1
    out_sizes = [(hout, wout) for (_, _, _, hout, wout) in meta]

    def kernel(*refs):
        x1_ref, x2_ref = refs[0], refs[1]
        gh_refs = refs[2:2 + levels]
        gw_refs = refs[2 + levels:2 + 2 * levels]
        ph_refs = refs[2 + 2 * levels:2 + 2 * levels + npool]
        pw_refs = refs[2 + 2 * levels + npool:2 + 2 * levels + 2 * npool]
        ssim_ref, mcs_ref = refs[-2], refs[-1]

        # One (n, c) plane per grid step; H -> sublanes, W -> lanes.
        x1 = x1_ref[0]                      # (H, W)
        x2 = x2_ref[0]
        s = x1 + x2                         # mu1 + mu2 carrier (pooling is linear)
        d = x1 - x2                         # mu1 - mu2 carrier

        for l in range(levels):
            hout, wout = out_sizes[l]
            gh = gh_refs[l][...]            # (hout, h)
            gw = gw_refs[l][...]            # (w, wout)

            def conv(z, gh=gh, gw=gw):
                # Depthwise Gaussian conv (zero padding folded into gh/gw) as
                # two MXU matmuls: W (lane) pass then H (sublane) pass.
                t = jnp.dot(z, gw, preferred_element_type=jnp.float32)
                return jnp.dot(gh, t, preferred_element_type=jnp.float32)

            S = conv(s)                     # mu1 + mu2
            D = conv(d)                     # mu1 - mu2
            A = conv(s * s)                 # conv((x1+x2)^2)
            Bq = conv(d * d)                # conv((x1-x2)^2)

            S2 = S * S
            D2 = D * D
            mu1_mu2 = 0.25 * (S2 - D2)
            mu_sq_sum = 0.5 * (S2 + D2)                     # mu1^2 + mu2^2
            sigma12 = 0.25 * (A - Bq) - mu1_mu2
            sigma_sq_sum = 0.5 * (A + Bq) - mu_sq_sum       # sigma1^2 + sigma2^2

            v1 = 2.0 * sigma12 + c2
            v2 = sigma_sq_sum + c2
            ssim_map = ((2.0 * mu1_mu2 + c1) * v1) / ((mu_sq_sum + c1) * v2)
            mcs_map = v1 / v2

            # Exact per-level shapes -> every element is valid, plain mean.
            inv_n = 1.0 / float(hout * wout)
            ssim_ref[0:1, 0:1, l:l + 1] = jnp.reshape(jnp.sum(ssim_map) * inv_n, (1, 1, 1))
            mcs_ref[0:1, 0:1, l:l + 1] = jnp.reshape(jnp.sum(mcs_map) * inv_n, (1, 1, 1))

            if l < levels - 1:
                # F.avg_pool2d(kernel=2, stride=2) applied to the linear s/d
                # carriers (pool(x1)+pool(x2) == pool(x1+x2)), two matmuls each.
                ph = ph_refs[l][...]        # (h//2, h)
                pw = pw_refs[l][...]        # (w, w//2)

                def pool(z, ph=ph, pw=pw):
                    t = jnp.dot(z, pw, preferred_element_type=jnp.float32)
                    return jnp.dot(ph, t, preferred_element_type=jnp.float32)

                s = pool(s)
                d = pool(d)

    return kernel


def _vmem_limit_bytes():
    try:
        cap = int(pltpu.get_tpu_info().vmem_capacity_bytes)
    except Exception:
        return 32 * 1024 * 1024          # conservative default scoped limit
    # ~3/4 of physical: ~48 MiB on v7x (64 MiB), ~96 MiB on v5e/v6e (128 MiB),
    # leaving headroom for Mosaic internal scratch and the double buffers.
    return min((cap * 3) // 4, 100 * 1024 * 1024)


def _cost_estimate(meta, NC, const_bytes, levels):
    flops = 0
    for l, (h, w, _wsz, hout, wout) in enumerate(meta):
        conv_flops = 2 * h * w * wout + 2 * hout * h * wout   # W pass + H pass
        flops += 4 * conv_flops                                # S, D, A, B convs
        flops += 30 * hout * wout                              # elementwise SSIM math
        if l < levels - 1:
            pool_flops = 2 * h * w * (w // 2) + 2 * (h // 2) * h * (w // 2)
            flops += 2 * pool_flops                            # pool s and d
    flops *= NC
    H, W = meta[0][0], meta[0][1]
    bytes_accessed = 2 * NC * H * W * 4 + const_bytes + 2 * NC * levels * 4
    return pl.CostEstimate(flops=int(flops), transcendentals=0,
                           bytes_accessed=int(bytes_accessed))


def ms_ssim(img1, img2, levels=5, max_val=255.0, size_average=True):
    """Equivalent of MS_SSIM.forward(img1, img2, levels) (size_average=True path)."""
    del size_average  # reference module only supports the size_average=True path
    img1 = jnp.asarray(img1, jnp.float32)
    img2 = jnp.asarray(img2, jnp.float32)
    N, C, H, W = img1.shape
    NC = N * C

    c1 = (0.01 * max_val) ** 2
    c2 = (0.03 * max_val) ** 2

    meta = _level_meta(H, W, levels)
    GH, GW, PH, PW = _build_matrices(meta, levels)
    consts = GH + GW + PH + PW
    const_arrays = [jnp.asarray(m) for m in consts]
    const_bytes = sum(int(m.size) * 4 for m in consts)

    x1 = img1.reshape(NC, H, W)
    x2 = img2.reshape(NC, H, W)

    kernel = _make_msssim_kernel(levels, meta, c1, c2)
    out_shape = (
        jax.ShapeDtypeStruct((NC, 1, levels), jnp.float32),
        jax.ShapeDtypeStruct((NC, 1, levels), jnp.float32),
    )
    out_specs = (
        pl.BlockSpec((1, 1, levels), lambda i: (i, 0, 0)),
        pl.BlockSpec((1, 1, levels), lambda i: (i, 0, 0)),
    )
    cparams = pltpu.CompilerParams(
        dimension_semantics=("parallel",),     # megacore sharding on v7x
        vmem_limit_bytes=_vmem_limit_bytes(),
    )
    cost = _cost_estimate(meta, NC, const_bytes, levels)

    def run(single_buffer_consts):
        def const_spec(m):
            if single_buffer_consts:
                # Constant block index across the grid -> a single VMEM buffer
                # is enough; halves the constant-matrix footprint.
                return pl.BlockSpec(m.shape, lambda i: (0, 0),
                                    pipeline_mode=pl.Buffered(buffer_count=1))
            return pl.BlockSpec(m.shape, lambda i: (0, 0))

        in_specs = [
            pl.BlockSpec((1, H, W), lambda i: (i, 0, 0)),   # img1 plane
            pl.BlockSpec((1, H, W), lambda i: (i, 0, 0)),   # img2 plane
        ] + [const_spec(m) for m in consts]

        return pl.pallas_call(
            kernel,
            grid=(NC,),
            in_specs=in_specs,
            out_specs=out_specs,
            out_shape=out_shape,
            compiler_params=cparams,
            cost_estimate=cost,
        )(x1, x2, *const_arrays)

    try:
        ssim_partials, mcs_partials = run(True)
    except Exception:
        # Fallback for jax versions without pipeline_mode / Buffered(1) support:
        # default double-buffering of the constant blocks (correct, more VMEM).
        ssim_partials, mcs_partials = run(False)

    # Per-level means over (N, C, Hout, Wout) == mean over NC of per-plane means
    # (every plane shares the same hout*wout at a given level).
    msssim = jnp.mean(ssim_partials[:, 0, :], axis=0)  # (levels,)
    mcs = jnp.mean(mcs_partials[:, 0, :], axis=0)      # (levels,)

    weight = jnp.asarray(_MSSSIM_WEIGHTS, jnp.float32)[:levels]
    value = jnp.prod(mcs[: levels - 1] ** weight[: levels - 1]) * (
        msssim[levels - 1] ** weight[levels - 1]
    )
    return value


def _ms_ssim_reference(img1, img2, levels=5, max_val=255.0):
    """Independent pure-JAX reference: grouped conv2d + avg_pool2d, mirroring the
    PyTorch module op-for-op (used only for the self-check in __main__)."""
    c1 = (0.01 * max_val) ** 2
    c2 = (0.03 * max_val) ** 2
    x1 = jnp.asarray(img1, jnp.float32)
    x2 = jnp.asarray(img2, jnp.float32)
    msssim, mcs = [], []
    for l in range(levels):
        N, C, H, W = x1.shape
        wsz = min(H, W, 11)
        sigma = 1.5 * wsz / 11.0
        g = _gaussian_1d(wsz, sigma)
        w2d = np.outer(g, g).astype(np.float32)[None, None]
        kern = jnp.asarray(np.tile(w2d, (C, 1, 1, 1)))
        pad = wsz // 2

        def conv(z, kern=kern, pad=pad, C=C):
            return lax.conv_general_dilated(
                z, kern, window_strides=(1, 1),
                padding=((pad, pad), (pad, pad)),
                dimension_numbers=("NCHW", "OIHW", "NCHW"),
                feature_group_count=C)

        mu1, mu2 = conv(x1), conv(x2)
        mu1_sq, mu2_sq, mu1_mu2 = mu1 * mu1, mu2 * mu2, mu1 * mu2
        s1 = conv(x1 * x1) - mu1_sq
        s2 = conv(x2 * x2) - mu2_sq
        s12 = conv(x1 * x2) - mu1_mu2
        v1 = 2.0 * s12 + c2
        v2 = s1 + s2 + c2
        ssim_map = ((2.0 * mu1_mu2 + c1) * v1) / ((mu1_sq + mu2_sq + c1) * v2)
        mcs_map = v1 / v2
        msssim.append(jnp.mean(ssim_map))
        mcs.append(jnp.mean(mcs_map))
        if l < levels - 1:
            x1 = x1.reshape(N, C, H // 2, 2, W // 2, 2).mean(axis=(3, 5))
            x2 = x2.reshape(N, C, H // 2, 2, W // 2, 2).mean(axis=(3, 5))
    weight = jnp.asarray(_MSSSIM_WEIGHTS, jnp.float32)[:levels]
    msssim = jnp.stack(msssim)
    mcs = jnp.stack(mcs)
    return jnp.prod(mcs[: levels - 1] ** weight[: levels - 1]) * (
        msssim[levels - 1] ** weight[levels - 1]
    )


if __name__ == "__main__":
    key = jax.random.PRNGKey(0)
    k1, k2 = jax.random.split(key)
    # 32x32 spatial so that all 5 MS-SSIM levels (and their 2x2 poolings) are valid.
    # img2 is a noisy copy of img1 (realistic MS-SSIM usage; keeps mcs > 0 so the
    # fractional-power product is well defined, as in the PyTorch reference).
    img1 = jax.random.uniform(k1, (2, 3, 32, 32), jnp.float32, minval=0.0, maxval=255.0)
    img2 = jnp.clip(img1 + 8.0 * jax.random.normal(k2, img1.shape, jnp.float32), 0.0, 255.0)

    out = ms_ssim(img1, img2, levels=5, max_val=255.0)
    jax.block_until_ready(out)

    ref = _ms_ssim_reference(img1, img2, levels=5, max_val=255.0)
    np.testing.assert_allclose(np.asarray(out), np.asarray(ref), rtol=2e-3, atol=2e-4)

    print("KERNEL_OK")
</pallas_src>

<mosaic_0001>
module attributes {stable_mosaic.version = 11 : i64} {
  func.func @kernel(%arg0: i32, %arg1: memref<1x32x32xf32, #tpu.memory_space<vmem>>, %arg2: memref<1x32x32xf32, #tpu.memory_space<vmem>>, %arg3: memref<32x32xf32, #tpu.memory_space<vmem>>, %arg4: memref<16x16xf32, #tpu.memory_space<vmem>>, %arg5: memref<9x8xf32, #tpu.memory_space<vmem>>, %arg6: memref<5x4xf32, #tpu.memory_space<vmem>>, %arg7: memref<3x2xf32, #tpu.memory_space<vmem>>, %arg8: memref<32x32xf32, #tpu.memory_space<vmem>>, %arg9: memref<16x16xf32, #tpu.memory_space<vmem>>, %arg10: memref<8x9xf32, #tpu.memory_space<vmem>>, %arg11: memref<4x5xf32, #tpu.memory_space<vmem>>, %arg12: memref<2x3xf32, #tpu.memory_space<vmem>>, %arg13: memref<16x32xf32, #tpu.memory_space<vmem>>, %arg14: memref<8x16xf32, #tpu.memory_space<vmem>>, %arg15: memref<4x8xf32, #tpu.memory_space<vmem>>, %arg16: memref<2x4xf32, #tpu.memory_space<vmem>>, %arg17: memref<32x16xf32, #tpu.memory_space<vmem>>, %arg18: memref<16x8xf32, #tpu.memory_space<vmem>>, %arg19: memref<8x4xf32, #tpu.memory_space<vmem>>, %arg20: memref<4x2xf32, #tpu.memory_space<vmem>>, %arg21: memref<1x1x5xf32, #tpu.memory_space<vmem>>, %arg22: memref<1x1x5xf32, #tpu.memory_space<vmem>>) attributes {dimension_semantics = [#tpu.dimension_semantics<parallel>], iteration_bounds = array<i64: 6>, scalar_prefetch = 0 : i64, scratch_operands = 0 : i64, tpu.core_type = #tpu.core_type<tc>, window_params = [{transform_indices = @transform_0, window_bounds = array<i64: 1, 32, 32>}, {transform_indices = @transform_1, window_bounds = array<i64: 1, 32, 32>}, {pipeline_mode = #tpu.pipeline_mode<synchronous>, transform_indices = @transform_2, window_bounds = array<i64: 32, 32>}, {pipeline_mode = #tpu.pipeline_mode<synchronous>, transform_indices = @transform_3, window_bounds = array<i64: 16, 16>}, {pipeline_mode = #tpu.pipeline_mode<synchronous>, transform_indices = @transform_4, window_bounds = array<i64: 9, 8>}, {pipeline_mode = #tpu.pipeline_mode<synchronous>, transform_indices = @transform_5, window_bounds = array<i64: 5, 4>}, {pipeline_mode = #tpu.pipeline_mode<synchronous>, transform_indices = @transform_6, window_bounds = array<i64: 3, 2>}, {pipeline_mode = #tpu.pipeline_mode<synchronous>, transform_indices = @transform_7, window_bounds = array<i64: 32, 32>}, {pipeline_mode = #tpu.pipeline_mode<synchronous>, transform_indices = @transform_8, window_bounds = array<i64: 16, 16>}, {pipeline_mode = #tpu.pipeline_mode<synchronous>, transform_indices = @transform_9, window_bounds = array<i64: 8, 9>}, {pipeline_mode = #tpu.pipeline_mode<synchronous>, transform_indices = @transform_10, window_bounds = array<i64: 4, 5>}, {pipeline_mode = #tpu.pipeline_mode<synchronous>, transform_indices = @transform_11, window_bounds = array<i64: 2, 3>}, {pipeline_mode = #tpu.pipeline_mode<synchronous>, transform_indices = @transform_12, window_bounds = array<i64: 16, 32>}, {pipeline_mode = #tpu.pipeline_mode<synchronous>, transform_indices = @transform_13, window_bounds = array<i64: 8, 16>}, {pipeline_mode = #tpu.pipeline_mode<synchronous>, transform_indices = @transform_14, window_bounds = array<i64: 4, 8>}, {pipeline_mode = #tpu.pipeline_mode<synchronous>, transform_indices = @transform_15, window_bounds = array<i64: 2, 4>}, {pipeline_mode = #tpu.pipeline_mode<synchronous>, transform_indices = @transform_16, window_bounds = array<i64: 32, 16>}, {pipeline_mode = #tpu.pipeline_mode<synchronous>, transform_indices = @transform_17, window_bounds = array<i64: 16, 8>}, {pipeline_mode = #tpu.pipeline_mode<synchronous>, transform_indices = @transform_18, window_bounds = array<i64: 8, 4>}, {pipeline_mode = #tpu.pipeline_mode<synchronous>, transform_indices = @transform_19, window_bounds = array<i64: 4, 2>}, {transform_indices = @transform_20, window_bounds = array<i64: 1, 1, 5>}, {transform_indices = @transform_21, window_bounds = array<i64: 1, 1, 5>}]} {
    %c0 = arith.constant 0 : index
    %c0_0 = arith.constant 0 : index
    %c0_1 = arith.constant 0 : index
    %0 = vector.load %arg1[%c0, %c0_0, %c0_1] : memref<1x32x32xf32, #tpu.memory_space<vmem>>, vector<1x32x32xf32>
    %1 = vector.shape_cast %0 : vector<1x32x32xf32> to vector<32x32xf32>
    %c0_2 = arith.constant 0 : index
    %c0_3 = arith.constant 0 : index
    %c0_4 = arith.constant 0 : index
    %2 = vector.load %arg2[%c0_2, %c0_3, %c0_4] : memref<1x32x32xf32, #tpu.memory_space<vmem>>, vector<1x32x32xf32>
    %3 = vector.shape_cast %2 : vector<1x32x32xf32> to vector<32x32xf32>
    %4 = arith.addf %1, %3 : vector<32x32xf32>
    %5 = arith.subf %1, %3 : vector<32x32xf32>
    %c0_5 = arith.constant 0 : index
    %c0_6 = arith.constant 0 : index
    %6 = vector.load %arg3[%c0_5, %c0_6] : memref<32x32xf32, #tpu.memory_space<vmem>>, vector<32x32xf32>
    %c0_7 = arith.constant 0 : index
    %c0_8 = arith.constant 0 : index
    %7 = vector.load %arg8[%c0_7, %c0_8] : memref<32x32xf32, #tpu.memory_space<vmem>>, vector<32x32xf32>
    %cst = arith.constant dense<0.000000e+00> : vector<32x32xf32>
    %8 = tpu.matmul %4, %7, %cst {dimension_numbers = #tpu.dot_dimension_numbers<[1], [0], [0], [1], [0, 0, 1, 1], [], []>} : vector<32x32xf32>, vector<32x32xf32>, vector<32x32xf32> -> vector<32x32xf32>
    %cst_9 = arith.constant dense<0.000000e+00> : vector<32x32xf32>
    %9 = tpu.matmul %6, %8, %cst_9 {dimension_numbers = #tpu.dot_dimension_numbers<[1], [0], [0], [1], [0, 0, 1, 1], [], []>} : vector<32x32xf32>, vector<32x32xf32>, vector<32x32xf32> -> vector<32x32xf32>
    %cst_10 = arith.constant dense<0.000000e+00> : vector<32x32xf32>
    %10 = tpu.matmul %5, %7, %cst_10 {dimension_numbers = #tpu.dot_dimension_numbers<[1], [0], [0], [1], [0, 0, 1, 1], [], []>} : vector<32x32xf32>, vector<32x32xf32>, vector<32x32xf32> -> vector<32x32xf32>
    %cst_11 = arith.constant dense<0.000000e+00> : vector<32x32xf32>
    %11 = tpu.matmul %6, %10, %cst_11 {dimension_numbers = #tpu.dot_dimension_numbers<[1], [0], [0], [1], [0, 0, 1, 1], [], []>} : vector<32x32xf32>, vector<32x32xf32>, vector<32x32xf32> -> vector<32x32xf32>
    %12 = arith.mulf %4, %4 : vector<32x32xf32>
    %cst_12 = arith.constant dense<0.000000e+00> : vector<32x32xf32>
    %13 = tpu.matmul %12, %7, %cst_12 {dimension_numbers = #tpu.dot_dimension_numbers<[1], [0], [0], [1], [0, 0, 1, 1], [], []>} : vector<32x32xf32>, vector<32x32xf32>, vector<32x32xf32> -> vector<32x32xf32>
    %cst_13 = arith.constant dense<0.000000e+00> : vector<32x32xf32>
    %14 = tpu.matmul %6, %13, %cst_13 {dimension_numbers = #tpu.dot_dimension_numbers<[1], [0], [0], [1], [0, 0, 1, 1], [], []>} : vector<32x32xf32>, vector<32x32xf32>, vector<32x32xf32> -> vector<32x32xf32>
    %15 = arith.mulf %5, %5 : vector<32x32xf32>
    %cst_14 = arith.constant dense<0.000000e+00> : vector<32x32xf32>
    %16 = tpu.matmul %15, %7, %cst_14 {dimension_numbers = #tpu.dot_dimension_numbers<[1], [0], [0], [1], [0, 0, 1, 1], [], []>} : vector<32x32xf32>, vector<32x32xf32>, vector<32x32xf32> -> vector<32x32xf32>
    %cst_15 = arith.constant dense<0.000000e+00> : vector<32x32xf32>
    %17 = tpu.matmul %6, %16, %cst_15 {dimension_numbers = #tpu.dot_dimension_numbers<[1], [0], [0], [1], [0, 0, 1, 1], [], []>} : vector<32x32xf32>, vector<32x32xf32>, vector<32x32xf32> -> vector<32x32xf32>
    %18 = arith.mulf %9, %9 : vector<32x32xf32>
    %19 = arith.mulf %11, %11 : vector<32x32xf32>
    %20 = arith.subf %18, %19 : vector<32x32xf32>
    %cst_16 = arith.constant 2.500000e-01 : f32
    %21 = vector.broadcast %cst_16 : f32 to vector<32x32xf32>
    %22 = arith.mulf %21, %20 : vector<32x32xf32>
    %23 = arith.addf %18, %19 : vector<32x32xf32>
    %cst_17 = arith.constant 5.000000e-01 : f32
    %24 = vector.broadcast %cst_17 : f32 to vector<32x32xf32>
    %25 = arith.mulf %24, %23 : vector<32x32xf32>
    %26 = arith.subf %14, %17 : vector<32x32xf32>
    %cst_18 = arith.constant 2.500000e-01 : f32
    %27 = vector.broadcast %cst_18 : f32 to vector<32x32xf32>
    %28 = arith.mulf %27, %26 : vector<32x32xf32>
    %29 = arith.subf %28, %22 : vector<32x32xf32>
    %30 = arith.addf %14, %17 : vector<32x32xf32>
    %cst_19 = arith.constant 5.000000e-01 : f32
    %31 = vector.broadcast %cst_19 : f32 to vector<32x32xf32>
    %32 = arith.mulf %31, %30 : vector<32x32xf32>
    %33 = arith.subf %32, %25 : vector<32x32xf32>
    %cst_20 = arith.constant 2.000000e+00 : f32
    %34 = vector.broadcast %cst_20 : f32 to vector<32x32xf32>
    %35 = arith.mulf %34, %29 : vector<32x32xf32>
    %cst_21 = arith.constant 5.852250e+01 : f32
    %36 = vector.broadcast %cst_21 : f32 to vector<32x32xf32>
    %37 = arith.addf %35, %36 : vector<32x32xf32>
    %cst_22 = arith.constant 5.852250e+01 : f32
    %38 = vector.broadcast %cst_22 : f32 to vector<32x32xf32>
    %39 = arith.addf %33, %38 : vector<32x32xf32>
    %cst_23 = arith.constant 2.000000e+00 : f32
    %40 = vector.broadcast %cst_23 : f32 to vector<32x32xf32>
    %41 = arith.mulf %40, %22 : vector<32x32xf32>
    %cst_24 = arith.constant 6.502500e+00 : f32
    %42 = vector.broadcast %cst_24 : f32 to vector<32x32xf32>
    %43 = arith.addf %41, %42 : vector<32x32xf32>
    %44 = arith.mulf %43, %37 : vector<32x32xf32>
    %cst_25 = arith.constant 6.502500e+00 : f32
    %45 = vector.broadcast %cst_25 : f32 to vector<32x32xf32>
    %46 = arith.addf %25, %45 : vector<32x32xf32>
    %47 = arith.mulf %46, %39 : vector<32x32xf32>
    %48 = arith.divf %44, %47 : vector<32x32xf32>
    %49 = arith.divf %37, %39 : vector<32x32xf32>
    %50 = vector.shape_cast %48 : vector<32x32xf32> to vector<1x32x32xf32>
    %cst_26 = arith.constant dense<0.000000e+00> : vector<1xf32>
    %51 = vector.multi_reduction <add>, %50, %cst_26 [1, 2] : vector<1x32x32xf32> to vector<1xf32>
    %52 = vector.shape_cast %51 : vector<1xf32> to vector<1x1x1xf32>
    %53 = vector.extract %52[0, 0, 0] : f32 from vector<1x1x1xf32>
    %cst_27 = arith.constant 9.765625E-4 : f32
    %54 = arith.mulf %53, %cst_27 : f32
    %55 = vector.broadcast %54 : f32 to vector<1x1x1xf32>
    %c0_28 = arith.constant 0 : index
    %c0_29 = arith.constant 0 : index
    %c0_30 = arith.constant 0 : index
    %56 = vector.load %arg21[%c0_28, %c0_29, %c0_30] : memref<1x1x5xf32, #tpu.memory_space<vmem>>, vector<1x1x1xf32>
    tpu.vector_store %arg21[%c0_28, %c0_29, %c0_30], %55 {strides = array<i32>} : memref<1x1x5xf32, #tpu.memory_space<vmem>>, vector<1x1x1xf32>,
    %57 = vector.shape_cast %49 : vector<32x32xf32> to vector<1x32x32xf32>
    %cst_31 = arith.constant dense<0.000000e+00> : vector<1xf32>
    %58 = vector.multi_reduction <add>, %57, %cst_31 [1, 2] : vector<1x32x32xf32> to vector<1xf32>
    %59 = vector.shape_cast %58 : vector<1xf32> to vector<1x1x1xf32>
    %60 = vector.extract %59[0, 0, 0] : f32 from vector<1x1x1xf32>
    %cst_32 = arith.constant 9.765625E-4 : f32
    %61 = arith.mulf %60, %cst_32 : f32
    %62 = vector.broadcast %61 : f32 to vector<1x1x1xf32>
    %c0_33 = arith.constant 0 : index
    %c0_34 = arith.constant 0 : index
    %c0_35 = arith.constant 0 : index
    %63 = vector.load %arg22[%c0_33, %c0_34, %c0_35] : memref<1x1x5xf32, #tpu.memory_space<vmem>>, vector<1x1x1xf32>
    tpu.vector_store %arg22[%c0_33, %c0_34, %c0_35], %62 {strides = array<i32>} : memref<1x1x5xf32, #tpu.memory_space<vmem>>, vector<1x1x1xf32>,
    %c0_36 = arith.constant 0 : index
    %c0_37 = arith.constant 0 : index
    %64 = vector.load %arg13[%c0_36, %c0_37] : memref<16x32xf32, #tpu.memory_space<vmem>>, vector<16x32xf32>
    %c0_38 = arith.constant 0 : index
    %c0_39 = arith.constant 0 : index
    %65 = vector.load %arg17[%c0_38, %c0_39] : memref<32x16xf32, #tpu.memory_space<vmem>>, vector<32x16xf32>
    %cst_40 = arith.constant dense<0.000000e+00> : vector<32x16xf32>
    %66 = tpu.matmul %4, %65, %cst_40 {dimension_numbers = #tpu.dot_dimension_numbers<[1], [0], [0], [1], [0, 0, 1, 1], [], []>} : vector<32x32xf32>, vector<32x16xf32>, vector<32x16xf32> -> vector<32x16xf32>
    %cst_41 = arith.constant dense<0.000000e+00> : vector<16x16xf32>
    %67 = tpu.matmul %64, %66, %cst_41 {dimension_numbers = #tpu.dot_dimension_numbers<[1], [0], [0], [1], [0, 0, 1, 1], [], []>} : vector<16x32xf32>, vector<32x16xf32>, vector<16x16xf32> -> vector<16x16xf32>
    %cst_42 = arith.constant dense<0.000000e+00> : vector<32x16xf32>
    %68 = tpu.matmul %5, %65, %cst_42 {dimension_numbers = #tpu.dot_dimension_numbers<[1], [0], [0], [1], [0, 0, 1, 1], [], []>} : vector<32x32xf32>, vector<32x16xf32>, vector<32x16xf32> -> vector<32x16xf32>
    %cst_43 = arith.constant dense<0.000000e+00> : vector<16x16xf32>
    %69 = tpu.matmul %64, %68, %cst_43 {dimension_numbers = #tpu.dot_dimension_numbers<[1], [0], [0], [1], [0, 0, 1, 1], [], []>} : vector<16x32xf32>, vector<32x16xf32>, vector<16x16xf32> -> vector<16x16xf32>
    %c0_44 = arith.constant 0 : index
    %c0_45 = arith.constant 0 : index
    %70 = vector.load %arg4[%c0_44, %c0_45] : memref<16x16xf32, #tpu.memory_space<vmem>>, vector<16x16xf32>
    %c0_46 = arith.constant 0 : index
    %c0_47 = arith.constant 0 : index
    %71 = vector.load %arg9[%c0_46, %c0_47] : memref<16x16xf32, #tpu.memory_space<vmem>>, vector<16x16xf32>
    %cst_48 = arith.constant dense<0.000000e+00> : vector<16x16xf32>
    %72 = tpu.matmul %67, %71, %cst_48 {dimension_numbers = #tpu.dot_dimension_numbers<[1], [0], [0], [1], [0, 0, 1, 1], [], []>} : vector<16x16xf32>, vector<16x16xf32>, vector<16x16xf32> -> vector<16x16xf32>
    %cst_49 = arith.constant dense<0.000000e+00> : vector<16x16xf32>
    %73 = tpu.matmul %70, %72, %cst_49 {dimension_numbers = #tpu.dot_dimension_numbers<[1], [0], [0], [1], [0, 0, 1, 1], [], []>} : vector<16x16xf32>, vector<16x16xf32>, vector<16x16xf32> -> vector<16x16xf32>
    %cst_50 = arith.constant dense<0.000000e+00> : vector<16x16xf32>
    %74 = tpu.matmul %69, %71, %cst_50 {dimension_numbers = #tpu.dot_dimension_numbers<[1], [0], [0], [1], [0, 0, 1, 1], [], []>} : vector<16x16xf32>, vector<16x16xf32>, vector<16x16xf32> -> vector<16x16xf32>
    %cst_51 = arith.constant dense<0.000000e+00> : vector<16x16xf32>
    %75 = tpu.matmul %70, %74, %cst_51 {dimension_numbers = #tpu.dot_dimension_numbers<[1], [0], [0], [1], [0, 0, 1, 1], [], []>} : vector<16x16xf32>, vector<16x16xf32>, vector<16x16xf32> -> vector<16x16xf32>
    %76 = arith.mulf %67, %67 : vector<16x16xf32>
    %cst_52 = arith.constant dense<0.000000e+00> : vector<16x16xf32>
    %77 = tpu.matmul %76, %71, %cst_52 {dimension_numbers = #tpu.dot_dimension_numbers<[1], [0], [0], [1], [0, 0, 1, 1], [], []>} : vector<16x16xf32>, vector<16x16xf32>, vector<16x16xf32> -> vector<16x16xf32>
    %cst_53 = arith.constant dense<0.000000e+00> : vector<16x16xf32>
    %78 = tpu.matmul %70, %77, %cst_53 {dimension_numbers = #tpu.dot_dimension_numbers<[1], [0], [0], [1], [0, 0, 1, 1], [], []>} : vector<16x16xf32>, vector<16x16xf32>, vector<16x16xf32> -> vector<16x16xf32>
    %79 = arith.mulf %69, %69 : vector<16x16xf32>
    %cst_54 = arith.constant dense<0.000000e+00> : vector<16x16xf32>
    %80 = tpu.matmul %79, %71, %cst_54 {dimension_numbers = #tpu.dot_dimension_numbers<[1], [0], [0], [1], [0, 0, 1, 1], [], []>} : vector<16x16xf32>, vector<16x16xf32>, vector<16x16xf32> -> vector<16x16xf32>
    %cst_55 = arith.constant dense<0.000000e+00> : vector<16x16xf32>
    %81 = tpu.matmul %70, %80, %cst_55 {dimension_numbers = #tpu.dot_dimension_numbers<[1], [0], [0], [1], [0, 0, 1, 1], [], []>} : vector<16x16xf32>, vector<16x16xf32>, vector<16x16xf32> -> vector<16x16xf32>
    %82 = arith.mulf %73, %73 : vector<16x16xf32>
    %83 = arith.mulf %75, %75 : vector<16x16xf32>
    %84 = arith.subf %82, %83 : vector<16x16xf32>
    %cst_56 = arith.constant 2.500000e-01 : f32
    %85 = vector.broadcast %cst_56 : f32 to vector<16x16xf32>
    %86 = arith.mulf %85, %84 : vector<16x16xf32>
    %87 = arith.addf %82, %83 : vector<16x16xf32>
    %cst_57 = arith.constant 5.000000e-01 : f32
    %88 = vector.broadcast %cst_57 : f32 to vector<16x16xf32>
    %89 = arith.mulf %88, %87 : vector<16x16xf32>
    %90 = arith.subf %78, %81 : vector<16x16xf32>
    %cst_58 = arith.constant 2.500000e-01 : f32
    %91 = vector.broadcast %cst_58 : f32 to vector<16x16xf32>
    %92 = arith.mulf %91, %90 : vector<16x16xf32>
    %93 = arith.subf %92, %86 : vector<16x16xf32>
    %94 = arith.addf %78, %81 : vector<16x16xf32>
    %cst_59 = arith.constant 5.000000e-01 : f32
    %95 = vector.broadcast %cst_59 : f32 to vector<16x16xf32>
    %96 = arith.mulf %95, %94 : vector<16x16xf32>
    %97 = arith.subf %96, %89 : vector<16x16xf32>
    %cst_60 = arith.constant 2.000000e+00 : f32
    %98 = vector.broadcast %cst_60 : f32 to vector<16x16xf32>
    %99 = arith.mulf %98, %93 : vector<16x16xf32>
    %cst_61 = arith.constant 5.852250e+01 : f32
    %100 = vector.broadcast %cst_61 : f32 to vector<16x16xf32>
    %101 = arith.addf %99, %100 : vector<16x16xf32>
    %cst_62 = arith.constant 5.852250e+01 : f32
    %102 = vector.broadcast %cst_62 : f32 to vector<16x16xf32>
    %103 = arith.addf %97, %102 : vector<16x16xf32>
    %cst_63 = arith.constant 2.000000e+00 : f32
    %104 = vector.broadcast %cst_63 : f32 to vector<16x16xf32>
    %105 = arith.mulf %104, %86 : vector<16x16xf32>
    %cst_64 = arith.constant 6.502500e+00 : f32
    %106 = vector.broadcast %cst_64 : f32 to vector<16x16xf32>
    %107 = arith.addf %105, %106 : vector<16x16xf32>
    %108 = arith.mulf %107, %101 : vector<16x16xf32>
    %cst_65 = arith.constant 6.502500e+00 : f32
    %109 = vector.broadcast %cst_65 : f32 to vector<16x16xf32>
    %110 = arith.addf %89, %109 : vector<16x16xf32>
    %111 = arith.mulf %110, %103 : vector<16x16xf32>
    %112 = arith.divf %108, %111 : vector<16x16xf32>
    %113 = arith.divf %101, %103 : vector<16x16xf32>
    %114 = vector.shape_cast %112 : vector<16x16xf32> to vector<1x16x16xf32>
    %cst_66 = arith.constant dense<0.000000e+00> : vector<1xf32>
    %115 = vector.multi_reduction <add>, %114, %cst_66 [1, 2] : vector<1x16x16xf32> to vector<1xf32>
    %116 = vector.shape_cast %115 : vector<1xf32> to vector<1x1x1xf32>
    %117 = vector.extract %116[0, 0, 0] : f32 from vector<1x1x1xf32>
    %cst_67 = arith.constant 3.906250e-03 : f32
    %118 = arith.mulf %117, %cst_67 : f32
    %119 = vector.broadcast %118 : f32 to vector<1x1x1xf32>
    %c0_68 = arith.constant 0 : index
    %c0_69 = arith.constant 0 : index
    %c1 = arith.constant 1 : index
    %120 = vector.load %arg21[%c0_68, %c0_69, %c1] : memref<1x1x5xf32, #tpu.memory_space<vmem>>, vector<1x1x1xf32>
    tpu.vector_store %arg21[%c0_68, %c0_69, %c1], %119 {strides = array<i32>} : memref<1x1x5xf32, #tpu.memory_space<vmem>>, vector<1x1x1xf32>,
    %121 = vector.shape_cast %113 : vector<16x16xf32> to vector<1x16x16xf32>
    %cst_70 = arith.constant dense<0.000000e+00> : vector<1xf32>
    %122 = vector.multi_reduction <add>, %121, %cst_70 [1, 2] : vector<1x16x16xf32> to vector<1xf32>
    %123 = vector.shape_cast %122 : vector<1xf32> to vector<1x1x1xf32>
    %124 = vector.extract %123[0, 0, 0] : f32 from vector<1x1x1xf32>
    %cst_71 = arith.constant 3.906250e-03 : f32
    %125 = arith.mulf %124, %cst_71 : f32
    %126 = vector.broadcast %125 : f32 to vector<1x1x1xf32>
    %c0_72 = arith.constant 0 : index
    %c0_73 = arith.constant 0 : index
    %c1_74 = arith.constant 1 : index
    %127 = vector.load %arg22[%c0_72, %c0_73, %c1_74] : memref<1x1x5xf32, #tpu.memory_space<vmem>>, vector<1x1x1xf32>
    tpu.vector_store %arg22[%c0_72, %c0_73, %c1_74], %126 {strides = array<i32>} : memref<1x1x5xf32, #tpu.memory_space<vmem>>, vector<1x1x1xf32>,
    %c0_75 = arith.constant 0 : index
    %c0_76 = arith.constant 0 : index
    %128 = vector.load %arg14[%c0_75, %c0_76] : memref<8x16xf32, #tpu.memory_space<vmem>>, vector<8x16xf32>
    %c0_77 = arith.constant 0 : index
    %c0_78 = arith.constant 0 : index
    %129 = vector.load %arg18[%c0_77, %c0_78] : memref<16x8xf32, #tpu.memory_space<vmem>>, vector<16x8xf32>
    %cst_79 = arith.constant dense<0.000000e+00> : vector<16x8xf32>
    %130 = tpu.matmul %67, %129, %cst_79 {dimension_numbers = #tpu.dot_dimension_numbers<[1], [0], [0], [1], [0, 0, 1, 1], [], []>} : vector<16x16xf32>, vector<16x8xf32>, vector<16x8xf32> -> vector<16x8xf32>
    %cst_80 = arith.constant dense<0.000000e+00> : vector<8x8xf32>
    %131 = tpu.matmul %128, %130, %cst_80 {dimension_numbers = #tpu.dot_dimension_numbers<[1], [0], [0], [1], [0, 0, 1, 1], [], []>} : vector<8x16xf32>, vector<16x8xf32>, vector<8x8xf32> -> vector<8x8xf32>
    %cst_81 = arith.constant dense<0.000000e+00> : vector<16x8xf32>
    %132 = tpu.matmul %69, %129, %cst_81 {dimension_numbers = #tpu.dot_dimension_numbers<[1], [0], [0], [1], [0, 0, 1, 1], [], []>} : vector<16x16xf32>, vector<16x8xf32>, vector<16x8xf32> -> vector<16x8xf32>
    %cst_82 = arith.constant dense<0.000000e+00> : vector<8x8xf32>
    %133 = tpu.matmul %128, %132, %cst_82 {dimension_numbers = #tpu.dot_dimension_numbers<[1], [0], [0], [1], [0, 0, 1, 1], [], []>} : vector<8x16xf32>, vector<16x8xf32>, vector<8x8xf32> -> vector<8x8xf32>
    %c0_83 = arith.constant 0 : index
    %c0_84 = arith.constant 0 : index
    %134 = vector.load %arg5[%c0_83, %c0_84] : memref<9x8xf32, #tpu.memory_space<vmem>>, vector<9x8xf32>
    %c0_85 = arith.constant 0 : index
    %c0_86 = arith.constant 0 : index
    %135 = vector.load %arg10[%c0_85, %c0_86] : memref<8x9xf32, #tpu.memory_space<vmem>>, vector<8x9xf32>
    %cst_87 = arith.constant dense<0.000000e+00> : vector<8x9xf32>
    %136 = tpu.matmul %131, %135, %cst_87 {dimension_numbers = #tpu.dot_dimension_numbers<[1], [0], [0], [1], [0, 0, 1, 1], [], []>} : vector<8x8xf32>, vector<8x9xf32>, vector<8x9xf32> -> vector<8x9xf32>
    %cst_88 = arith.constant dense<0.000000e+00> : vector<9x9xf32>
    %137 = tpu.matmul %134, %136, %cst_88 {dimension_numbers = #tpu.dot_dimension_numbers<[1], [0], [0], [1], [0, 0, 1, 1], [], []>} : vector<9x8xf32>, vector<8x9xf32>, vector<9x9xf32> -> vector<9x9xf32>
    %cst_89 = arith.constant dense<0.000000e+00> : vector<8x9xf32>
    %138 = tpu.matmul %133, %135, %cst_89 {dimension_numbers = #tpu.dot_dimension_numbers<[1], [0], [0], [1], [0, 0, 1, 1], [], []>} : vector<8x8xf32>, vector<8x9xf32>, vector<8x9xf32> -> vector<8x9xf32>
    %cst_90 = arith.constant dense<0.000000e+00> : vector<9x9xf32>
    %139 = tpu.matmul %134, %138, %cst_90 {dimension_numbers = #tpu.dot_dimension_numbers<[1], [0], [0], [1], [0, 0, 1, 1], [], []>} : vector<9x8xf32>, vector<8x9xf32>, vector<9x9xf32> -> vector<9x9xf32>
    %140 = arith.mulf %131, %131 : vector<8x8xf32>
    %cst_91 = arith.constant dense<0.000000e+00> : vector<8x9xf32>
    %141 = tpu.matmul %140, %135, %cst_91 {dimension_numbers = #tpu.dot_dimension_numbers<[1], [0], [0], [1], [0, 0, 1, 1], [], []>} : vector<8x8xf32>, vector<8x9xf32>, vector<8x9xf32> -> vector<8x9xf32>
    %cst_92 = arith.constant dense<0.000000e+00> : vector<9x9xf32>
    %142 = tpu.matmul %134, %141, %cst_92 {dimension_numbers = #tpu.dot_dimension_numbers<[1], [0], [0], [1], [0, 0, 1, 1], [], []>} : vector<9x8xf32>, vector<8x9xf32>, vector<9x9xf32> -> vector<9x9xf32>
    %143 = arith.mulf %133, %133 : vector<8x8xf32>
    %cst_93 = arith.constant dense<0.000000e+00> : vector<8x9xf32>
    %144 = tpu.matmul %143, %135, %cst_93 {dimension_numbers = #tpu.dot_dimension_numbers<[1], [0], [0], [1], [0, 0, 1, 1], [], []>} : vector<8x8xf32>, vector<8x9xf32>, vector<8x9xf32> -> vector<8x9xf32>
    %cst_94 = arith.constant dense<0.000000e+00> : vector<9x9xf32>
    %145 = tpu.matmul %134, %144, %cst_94 {dimension_numbers = #tpu.dot_dimension_numbers<[1], [0], [0], [1], [0, 0, 1, 1], [], []>} : vector<9x8xf32>, vector<8x9xf32>, vector<9x9xf32> -> vector<9x9xf32>
    %146 = arith.mulf %137, %137 : vector<9x9xf32>
    %147 = arith.mulf %139, %139 : vector<9x9xf32>
    %148 = arith.subf %146, %147 : vector<9x9xf32>
    %cst_95 = arith.constant 2.500000e-01 : f32
    %149 = vector.broadcast %cst_95 : f32 to vector<9x9xf32>
    %150 = arith.mulf %149, %148 : vector<9x9xf32>
    %151 = arith.addf %146, %147 : vector<9x9xf32>
    %cst_96 = arith.constant 5.000000e-01 : f32
    %152 = vector.broadcast %cst_96 : f32 to vector<9x9xf32>
    %153 = arith.mulf %152, %151 : vector<9x9xf32>
    %154 = arith.subf %142, %145 : vector<9x9xf32>
    %cst_97 = arith.constant 2.500000e-01 : f32
    %155 = vector.broadcast %cst_97 : f32 to vector<9x9xf32>
    %156 = arith.mulf %155, %154 : vector<9x9xf32>
    %157 = arith.subf %156, %150 : vector<9x9xf32>
    %158 = arith.addf %142, %145 : vector<9x9xf32>
    %cst_98 = arith.constant 5.000000e-01 : f32
    %159 = vector.broadcast %cst_98 : f32 to vector<9x9xf32>
    %160 = arith.mulf %159, %158 : vector<9x9xf32>
    %161 = arith.subf %160, %153 : vector<9x9xf32>
    %cst_99 = arith.constant 2.000000e+00 : f32
    %162 = vector.broadcast %cst_99 : f32 to vector<9x9xf32>
    %163 = arith.mulf %162, %157 : vector<9x9xf32>
    %cst_100 = arith.constant 5.852250e+01 : f32
    %164 = vector.broadcast %cst_100 : f32 to vector<9x9xf32>
    %165 = arith.addf %163, %164 : vector<9x9xf32>
    %cst_101 = arith.constant 5.852250e+01 : f32
    %166 = vector.broadcast %cst_101 : f32 to vector<9x9xf32>
    %167 = arith.addf %161, %166 : vector<9x9xf32>
    %cst_102 = arith.constant 2.000000e+00 : f32
    %168 = vector.broadcast %cst_102 : f32 to vector<9x9xf32>
    %169 = arith.mulf %168, %150 : vector<9x9xf32>
    %cst_103 = arith.constant 6.502500e+00 : f32
    %170 = vector.broadcast %cst_103 : f32 to vector<9x9xf32>
    %171 = arith.addf %169, %170 : vector<9x9xf32>
    %172 = arith.mulf %171, %165 : vector<9x9xf32>
    %cst_104 = arith.constant 6.502500e+00 : f32
    %173 = vector.broadcast %cst_104 : f32 to vector<9x9xf32>
    %174 = arith.addf %153, %173 : vector<9x9xf32>
    %175 = arith.mulf %174, %167 : vector<9x9xf32>
    %176 = arith.divf %172, %175 : vector<9x9xf32>
    %177 = arith.divf %165, %167 : vector<9x9xf32>
    %178 = vector.shape_cast %176 : vector<9x9xf32> to vector<1x9x9xf32>
    %cst_105 = arith.constant dense<0.000000e+00> : vector<1xf32>
    %179 = vector.multi_reduction <add>, %178, %cst_105 [1, 2] : vector<1x9x9xf32> to vector<1xf32>
    %180 = vector.shape_cast %179 : vector<1xf32> to vector<1x1x1xf32>
    %181 = vector.extract %180[0, 0, 0] : f32 from vector<1x1x1xf32>
    %cst_106 = arith.constant 0.0123456791 : f32
    %182 = arith.mulf %181, %cst_106 : f32
    %183 = vector.broadcast %182 : f32 to vector<1x1x1xf32>
    %c0_107 = arith.constant 0 : index
    %c0_108 = arith.constant 0 : index
    %c2 = arith.constant 2 : index
    %184 = vector.load %arg21[%c0_107, %c0_108, %c2] : memref<1x1x5xf32, #tpu.memory_space<vmem>>, vector<1x1x1xf32>
    tpu.vector_store %arg21[%c0_107, %c0_108, %c2], %183 {strides = array<i32>} : memref<1x1x5xf32, #tpu.memory_space<vmem>>, vector<1x1x1xf32>,
    %185 = vector.shape_cast %177 : vector<9x9xf32> to vector<1x9x9xf32>
    %cst_109 = arith.constant dense<0.000000e+00> : vector<1xf32>
    %186 = vector.multi_reduction <add>, %185, %cst_109 [1, 2] : vector<1x9x9xf32> to vector<1xf32>
    %187 = vector.shape_cast %186 : vector<1xf32> to vector<1x1x1xf32>
    %188 = vector.extract %187[0, 0, 0] : f32 from vector<1x1x1xf32>
    %cst_110 = arith.constant 0.0123456791 : f32
    %189 = arith.mulf %188, %cst_110 : f32
    %190 = vector.broadcast %189 : f32 to vector<1x1x1xf32>
    %c0_111 = arith.constant 0 : index
    %c0_112 = arith.constant 0 : index
    %c2_113 = arith.constant 2 : index
    %191 = vector.load %arg22[%c0_111, %c0_112, %c2_113] : memref<1x1x5xf32, #tpu.memory_space<vmem>>, vector<1x1x1xf32>
    tpu.vector_store %arg22[%c0_111, %c0_112, %c2_113], %190 {strides = array<i32>} : memref<1x1x5xf32, #tpu.memory_space<vmem>>, vector<1x1x1xf32>,
    %c0_114 = arith.constant 0 : index
    %c0_115 = arith.constant 0 : index
    %192 = vector.load %arg15[%c0_114, %c0_115] : memref<4x8xf32, #tpu.memory_space<vmem>>, vector<4x8xf32>
    %c0_116 = arith.constant 0 : index
    %c0_117 = arith.constant 0 : index
    %193 = vector.load %arg19[%c0_116, %c0_117] : memref<8x4xf32, #tpu.memory_space<vmem>>, vector<8x4xf32>
    %cst_118 = arith.constant dense<0.000000e+00> : vector<8x4xf32>
    %194 = tpu.matmul %131, %193, %cst_118 {dimension_numbers = #tpu.dot_dimension_numbers<[1], [0], [0], [1], [0, 0, 1, 1], [], []>} : vector<8x8xf32>, vector<8x4xf32>, vector<8x4xf32> -> vector<8x4xf32>
    %cst_119 = arith.constant dense<0.000000e+00> : vector<4x4xf32>
    %195 = tpu.matmul %192, %194, %cst_119 {dimension_numbers = #tpu.dot_dimension_numbers<[1], [0], [0], [1], [0, 0, 1, 1], [], []>} : vector<4x8xf32>, vector<8x4xf32>, vector<4x4xf32> -> vector<4x4xf32>
    %cst_120 = arith.constant dense<0.000000e+00> : vector<8x4xf32>
    %196 = tpu.matmul %133, %193, %cst_120 {dimension_numbers = #tpu.dot_dimension_numbers<[1], [0], [0], [1], [0, 0, 1, 1], [], []>} : vector<8x8xf32>, vector<8x4xf32>, vector<8x4xf32> -> vector<8x4xf32>
    %cst_121 = arith.constant dense<0.000000e+00> : vector<4x4xf32>
    %197 = tpu.matmul %192, %196, %cst_121 {dimension_numbers = #tpu.dot_dimension_numbers<[1], [0], [0], [1], [0, 0, 1, 1], [], []>} : vector<4x8xf32>, vector<8x4xf32>, vector<4x4xf32> -> vector<4x4xf32>
    %c0_122 = arith.constant 0 : index
    %c0_123 = arith.constant 0 : index
    %198 = vector.load %arg6[%c0_122, %c0_123] : memref<5x4xf32, #tpu.memory_space<vmem>>, vector<5x4xf32>
    %c0_124 = arith.constant 0 : index
    %c0_125 = arith.constant 0 : index
    %199 = vector.load %arg11[%c0_124, %c0_125] : memref<4x5xf32, #tpu.memory_space<vmem>>, vector<4x5xf32>
    %cst_126 = arith.constant dense<0.000000e+00> : vector<4x5xf32>
    %200 = tpu.matmul %195, %199, %cst_126 {dimension_numbers = #tpu.dot_dimension_numbers<[1], [0], [0], [1], [0, 0, 1, 1], [], []>} : vector<4x4xf32>, vector<4x5xf32>, vector<4x5xf32> -> vector<4x5xf32>
    %cst_127 = arith.constant dense<0.000000e+00> : vector<5x5xf32>
    %201 = tpu.matmul %198, %200, %cst_127 {dimension_numbers = #tpu.dot_dimension_numbers<[1], [0], [0], [1], [0, 0, 1, 1], [], []>} : vector<5x4xf32>, vector<4x5xf32>, vector<5x5xf32> -> vector<5x5xf32>
    %cst_128 = arith.constant dense<0.000000e+00> : vector<4x5xf32>
    %202 = tpu.matmul %197, %199, %cst_128 {dimension_numbers = #tpu.dot_dimension_numbers<[1], [0], [0], [1], [0, 0, 1, 1], [], []>} : vector<4x4xf32>, vector<4x5xf32>, vector<4x5xf32> -> vector<4x5xf32>
    %cst_129 = arith.constant dense<0.000000e+00> : vector<5x5xf32>
    %203 = tpu.matmul %198, %202, %cst_129 {dimension_numbers = #tpu.dot_dimension_numbers<[1], [0], [0], [1], [0, 0, 1, 1], [], []>} : vector<5x4xf32>, vector<4x5xf32>, vector<5x5xf32> -> vector<5x5xf32>
    %204 = arith.mulf %195, %195 : vector<4x4xf32>
    %cst_130 = arith.constant dense<0.000000e+00> : vector<4x5xf32>
    %205 = tpu.matmul %204, %199, %cst_130 {dimension_numbers = #tpu.dot_dimension_numbers<[1], [0], [0], [1], [0, 0, 1, 1], [], []>} : vector<4x4xf32>, vector<4x5xf32>, vector<4x5xf32> -> vector<4x5xf32>
    %cst_131 = arith.constant dense<0.000000e+00> : vector<5x5xf32>
    %206 = tpu.matmul %198, %205, %cst_131 {dimension_numbers = #tpu.dot_dimension_numbers<[1], [0], [0], [1], [0, 0, 1, 1], [], []>} : vector<5x4xf32>, vector<4x5xf32>, vector<5x5xf32> -> vector<5x5xf32>
    %207 = arith.mulf %197, %197 : vector<4x4xf32>
    %cst_132 = arith.constant dense<0.000000e+00> : vector<4x5xf32>
    %208 = tpu.matmul %207, %199, %cst_132 {dimension_numbers = #tpu.dot_dimension_numbers<[1], [0], [0], [1], [0, 0, 1, 1], [], []>} : vector<4x4xf32>, vector<4x5xf32>, vector<4x5xf32> -> vector<4x5xf32>
    %cst_133 = arith.constant dense<0.000000e+00> : vector<5x5xf32>
    %209 = tpu.matmul %198, %208, %cst_133 {dimension_numbers = #tpu.dot_dimension_numbers<[1], [0], [0], [1], [0, 0, 1, 1], [], []>} : vector<5x4xf32>, vector<4x5xf32>, vector<5x5xf32> -> vector<5x5xf32>
    %210 = arith.mulf %201, %201 : vector<5x5xf32>
    %211 = arith.mulf %203, %203 : vector<5x5xf32>
    %212 = arith.subf %210, %211 : vector<5x5xf32>
    %cst_134 = arith.constant 2.500000e-01 : f32
    %213 = vector.broadcast %cst_134 : f32 to vector<5x5xf32>
    %214 = arith.mulf %213, %212 : vector<5x5xf32>
    %215 = arith.addf %210, %211 : vector<5x5xf32>
    %cst_135 = arith.constant 5.000000e-01 : f32
    %216 = vector.broadcast %cst_135 : f32 to vector<5x5xf32>
    %217 = arith.mulf %216, %215 : vector<5x5xf32>
    %218 = arith.subf %206, %209 : vector<5x5xf32>
    %cst_136 = arith.constant 2.500000e-01 : f32
    %219 = vector.broadcast %cst_136 : f32 to vector<5x5xf32>
    %220 = arith.mulf %219, %218 : vector<5x5xf32>
    %221 = arith.subf %220, %214 : vector<5x5xf32>
    %222 = arith.addf %206, %209 : vector<5x5xf32>
    %cst_137 = arith.constant 5.000000e-01 : f32
    %223 = vector.broadcast %cst_137 : f32 to vector<5x5xf32>
    %224 = arith.mulf %223, %222 : vector<5x5xf32>
    %225 = arith.subf %224, %217 : vector<5x5xf32>
    %cst_138 = arith.constant 2.000000e+00 : f32
    %226 = vector.broadcast %cst_138 : f32 to vector<5x5xf32>
    %227 = arith.mulf %226, %221 : vector<5x5xf32>
    %cst_139 = arith.constant 5.852250e+01 : f32
    %228 = vector.broadcast %cst_139 : f32 to vector<5x5xf32>
    %229 = arith.addf %227, %228 : vector<5x5xf32>
    %cst_140 = arith.constant 5.852250e+01 : f32
    %230 = vector.broadcast %cst_140 : f32 to vector<5x5xf32>
    %231 = arith.addf %225, %230 : vector<5x5xf32>
    %cst_141 = arith.constant 2.000000e+00 : f32
    %232 = vector.broadcast %cst_141 : f32 to vector<5x5xf32>
    %233 = arith.mulf %232, %214 : vector<5x5xf32>
    %cst_142 = arith.constant 6.502500e+00 : f32
    %234 = vector.broadcast %cst_142 : f32 to vector<5x5xf32>
    %235 = arith.addf %233, %234 : vector<5x5xf32>
    %236 = arith.mulf %235, %229 : vector<5x5xf32>
    %cst_143 = arith.constant 6.502500e+00 : f32
    %237 = vector.broadcast %cst_143 : f32 to vector<5x5xf32>
    %238 = arith.addf %217, %237 : vector<5x5xf32>
    %239 = arith.mulf %238, %231 : vector<5x5xf32>
    %240 = arith.divf %236, %239 : vector<5x5xf32>
    %241 = arith.divf %229, %231 : vector<5x5xf32>
    %242 = vector.shape_cast %240 : vector<5x5xf32> to vector<1x5x5xf32>
    %cst_144 = arith.constant dense<0.000000e+00> : vector<1xf32>
    %243 = vector.multi_reduction <add>, %242, %cst_144 [1, 2] : vector<1x5x5xf32> to vector<1xf32>
    %244 = vector.shape_cast %243 : vector<1xf32> to vector<1x1x1xf32>
    %245 = vector.extract %244[0, 0, 0] : f32 from vector<1x1x1xf32>
    %cst_145 = arith.constant 4.000000e-02 : f32
    %246 = arith.mulf %245, %cst_145 : f32
    %247 = vector.broadcast %246 : f32 to vector<1x1x1xf32>
    %c0_146 = arith.constant 0 : index
    %c0_147 = arith.constant 0 : index
    %c3 = arith.constant 3 : index
    %248 = vector.load %arg21[%c0_146, %c0_147, %c3] : memref<1x1x5xf32, #tpu.memory_space<vmem>>, vector<1x1x1xf32>
    tpu.vector_store %arg21[%c0_146, %c0_147, %c3], %247 {strides = array<i32>} : memref<1x1x5xf32, #tpu.memory_space<vmem>>, vector<1x1x1xf32>,
    %249 = vector.shape_cast %241 : vector<5x5xf32> to vector<1x5x5xf32>
    %cst_148 = arith.constant dense<0.000000e+00> : vector<1xf32>
    %250 = vector.multi_reduction <add>, %249, %cst_148 [1, 2] : vector<1x5x5xf32> to vector<1xf32>
    %251 = vector.shape_cast %250 : vector<1xf32> to vector<1x1x1xf32>
    %252 = vector.extract %251[0, 0, 0] : f32 from vector<1x1x1xf32>
    %cst_149 = arith.constant 4.000000e-02 : f32
    %253 = arith.mulf %252, %cst_149 : f32
    %254 = vector.broadcast %253 : f32 to vector<1x1x1xf32>
    %c0_150 = arith.constant 0 : index
    %c0_151 = arith.constant 0 : index
    %c3_152 = arith.constant 3 : index
    %255 = vector.load %arg22[%c0_150, %c0_151, %c3_152] : memref<1x1x5xf32, #tpu.memory_space<vmem>>, vector<1x1x1xf32>
    tpu.vector_store %arg22[%c0_150, %c0_151, %c3_152], %254 {strides = array<i32>} : memref<1x1x5xf32, #tpu.memory_space<vmem>>, vector<1x1x1xf32>,
    %c0_153 = arith.constant 0 : index
    %c0_154 = arith.constant 0 : index
    %256 = vector.load %arg16[%c0_153, %c0_154] : memref<2x4xf32, #tpu.memory_space<vmem>>, vector<2x4xf32>
    %c0_155 = arith.constant 0 : index
    %c0_156 = arith.constant 0 : index
    %257 = vector.load %arg20[%c0_155, %c0_156] : memref<4x2xf32, #tpu.memory_space<vmem>>, vector<4x2xf32>
    %cst_157 = arith.constant dense<0.000000e+00> : vector<4x2xf32>
    %258 = tpu.matmul %195, %257, %cst_157 {dimension_numbers = #tpu.dot_dimension_numbers<[1], [0], [0], [1], [0, 0, 1, 1], [], []>} : vector<4x4xf32>, vector<4x2xf32>, vector<4x2xf32> -> vector<4x2xf32>
    %cst_158 = arith.constant dense<0.000000e+00> : vector<2x2xf32>
    %259 = tpu.matmul %256, %258, %cst_158 {dimension_numbers = #tpu.dot_dimension_numbers<[1], [0], [0], [1], [0, 0, 1, 1], [], []>} : vector<2x4xf32>, vector<4x2xf32>, vector<2x2xf32> -> vector<2x2xf32>
    %cst_159 = arith.constant dense<0.000000e+00> : vector<4x2xf32>
    %260 = tpu.matmul %197, %257, %cst_159 {dimension_numbers = #tpu.dot_dimension_numbers<[1], [0], [0], [1], [0, 0, 1, 1], [], []>} : vector<4x4xf32>, vector<4x2xf32>, vector<4x2xf32> -> vector<4x2xf32>
    %cst_160 = arith.constant dense<0.000000e+00> : vector<2x2xf32>
    %261 = tpu.matmul %256, %260, %cst_160 {dimension_numbers = #tpu.dot_dimension_numbers<[1], [0], [0], [1], [0, 0, 1, 1], [], []>} : vector<2x4xf32>, vector<4x2xf32>, vector<2x2xf32> -> vector<2x2xf32>
    %c0_161 = arith.constant 0 : index
    %c0_162 = arith.constant 0 : index
    %262 = vector.load %arg7[%c0_161, %c0_162] : memref<3x2xf32, #tpu.memory_space<vmem>>, vector<3x2xf32>
    %c0_163 = arith.constant 0 : index
    %c0_164 = arith.constant 0 : index
    %263 = vector.load %arg12[%c0_163, %c0_164] : memref<2x3xf32, #tpu.memory_space<vmem>>, vector<2x3xf32>
    %cst_165 = arith.constant dense<0.000000e+00> : vector<2x3xf32>
    %264 = tpu.matmul %259, %263, %cst_165 {dimension_numbers = #tpu.dot_dimension_numbers<[1], [0], [0], [1], [0, 0, 1, 1], [], []>} : vector<2x2xf32>, vector<2x3xf32>, vector<2x3xf32> -> vector<2x3xf32>
    %cst_166 = arith.constant dense<0.000000e+00> : vector<3x3xf32>
    %265 = tpu.matmul %262, %264, %cst_166 {dimension_numbers = #tpu.dot_dimension_numbers<[1], [0], [0], [1], [0, 0, 1, 1], [], []>} : vector<3x2xf32>, vector<2x3xf32>, vector<3x3xf32> -> vector<3x3xf32>
    %cst_167 = arith.constant dense<0.000000e+00> : vector<2x3xf32>
    %266 = tpu.matmul %261, %263, %cst_167 {dimension_numbers = #tpu.dot_dimension_numbers<[1], [0], [0], [1], [0, 0, 1, 1], [], []>} : vector<2x2xf32>, vector<2x3xf32>, vector<2x3xf32> -> vector<2x3xf32>
    %cst_168 = arith.constant dense<0.000000e+00> : vector<3x3xf32>
    %267 = tpu.matmul %262, %266, %cst_168 {dimension_numbers = #tpu.dot_dimension_numbers<[1], [0], [0], [1], [0, 0, 1, 1], [], []>} : vector<3x2xf32>, vector<2x3xf32>, vector<3x3xf32> -> vector<3x3xf32>
    %268 = arith.mulf %259, %259 : vector<2x2xf32>
    %cst_169 = arith.constant dense<0.000000e+00> : vector<2x3xf32>
    %269 = tpu.matmul %268, %263, %cst_169 {dimension_numbers = #tpu.dot_dimension_numbers<[1], [0], [0], [1], [0, 0, 1, 1], [], []>} : vector<2x2xf32>, vector<2x3xf32>, vector<2x3xf32> -> vector<2x3xf32>
    %cst_170 = arith.constant dense<0.000000e+00> : vector<3x3xf32>
    %270 = tpu.matmul %262, %269, %cst_170 {dimension_numbers = #tpu.dot_dimension_numbers<[1], [0], [0], [1], [0, 0, 1, 1], [], []>} : vector<3x2xf32>, vector<2x3xf32>, vector<3x3xf32> -> vector<3x3xf32>
    %271 = arith.mulf %261, %261 : vector<2x2xf32>
    %cst_171 = arith.constant dense<0.000000e+00> : vector<2x3xf32>
    %272 = tpu.matmul %271, %263, %cst_171 {dimension_numbers = #tpu.dot_dimension_numbers<[1], [0], [0], [1], [0, 0, 1, 1], [], []>} : vector<2x2xf32>, vector<2x3xf32>, vector<2x3xf32> -> vector<2x3xf32>
    %cst_172 = arith.constant dense<0.000000e+00> : vector<3x3xf32>
    %273 = tpu.matmul %262, %272, %cst_172 {dimension_numbers = #tpu.dot_dimension_numbers<[1], [0], [0], [1], [0, 0, 1, 1], [], []>} : vector<3x2xf32>, vector<2x3xf32>, vector<3x3xf32> -> vector<3x3xf32>
    %274 = arith.mulf %265, %265 : vector<3x3xf32>
    %275 = arith.mulf %267, %267 : vector<3x3xf32>
    %276 = arith.subf %274, %275 : vector<3x3xf32>
    %cst_173 = arith.constant 2.500000e-01 : f32
    %277 = vector.broadcast %cst_173 : f32 to vector<3x3xf32>
    %278 = arith.mulf %277, %276 : vector<3x3xf32>
    %279 = arith.addf %274, %275 : vector<3x3xf32>
    %cst_174 = arith.constant 5.000000e-01 : f32
    %280 = vector.broadcast %cst_174 : f32 to vector<3x3xf32>
    %281 = arith.mulf %280, %279 : vector<3x3xf32>
    %282 = arith.subf %270, %273 : vector<3x3xf32>
    %cst_175 = arith.constant 2.500000e-01 : f32
    %283 = vector.broadcast %cst_175 : f32 to vector<3x3xf32>
    %284 = arith.mulf %283, %282 : vector<3x3xf32>
    %285 = arith.subf %284, %278 : vector<3x3xf32>
    %286 = arith.addf %270, %273 : vector<3x3xf32>
    %cst_176 = arith.constant 5.000000e-01 : f32
    %287 = vector.broadcast %cst_176 : f32 to vector<3x3xf32>
    %288 = arith.mulf %287, %286 : vector<3x3xf32>
    %289 = arith.subf %288, %281 : vector<3x3xf32>
    %cst_177 = arith.constant 2.000000e+00 : f32
    %290 = vector.broadcast %cst_177 : f32 to vector<3x3xf32>
    %291 = arith.mulf %290, %285 : vector<3x3xf32>
    %cst_178 = arith.constant 5.852250e+01 : f32
    %292 = vector.broadcast %cst_178 : f32 to vector<3x3xf32>
    %293 = arith.addf %291, %292 : vector<3x3xf32>
    %cst_179 = arith.constant 5.852250e+01 : f32
    %294 = vector.broadcast %cst_179 : f32 to vector<3x3xf32>
    %295 = arith.addf %289, %294 : vector<3x3xf32>
    %cst_180 = arith.constant 2.000000e+00 : f32
    %296 = vector.broadcast %cst_180 : f32 to vector<3x3xf32>
    %297 = arith.mulf %296, %278 : vector<3x3xf32>
    %cst_181 = arith.constant 6.502500e+00 : f32
    %298 = vector.broadcast %cst_181 : f32 to vector<3x3xf32>
    %299 = arith.addf %297, %298 : vector<3x3xf32>
    %300 = arith.mulf %299, %293 : vector<3x3xf32>
    %cst_182 = arith.constant 6.502500e+00 : f32
    %301 = vector.broadcast %cst_182 : f32 to vector<3x3xf32>
    %302 = arith.addf %281, %301 : vector<3x3xf32>
    %303 = arith.mulf %302, %295 : vector<3x3xf32>
    %304 = arith.divf %300, %303 : vector<3x3xf32>
    %305 = arith.divf %293, %295 : vector<3x3xf32>
    %306 = vector.shape_cast %304 : vector<3x3xf32> to vector<1x3x3xf32>
    %cst_183 = arith.constant dense<0.000000e+00> : vector<1xf32>
    %307 = vector.multi_reduction <add>, %306, %cst_183 [1, 2] : vector<1x3x3xf32> to vector<1xf32>
    %308 = vector.shape_cast %307 : vector<1xf32> to vector<1x1x1xf32>
    %309 = vector.extract %308[0, 0, 0] : f32 from vector<1x1x1xf32>
    %cst_184 = arith.constant 0.111111112 : f32
    %310 = arith.mulf %309, %cst_184 : f32
    %311 = vector.broadcast %310 : f32 to vector<1x1x1xf32>
    %c0_185 = arith.constant 0 : index
    %c0_186 = arith.constant 0 : index
    %c4 = arith.constant 4 : index
    %312 = vector.load %arg21[%c0_185, %c0_186, %c4] : memref<1x1x5xf32, #tpu.memory_space<vmem>>, vector<1x1x1xf32>
    tpu.vector_store %arg21[%c0_185, %c0_186, %c4], %311 {strides = array<i32>} : memref<1x1x5xf32, #tpu.memory_space<vmem>>, vector<1x1x1xf32>,
    %313 = vector.shape_cast %305 : vector<3x3xf32> to vector<1x3x3xf32>
    %cst_187 = arith.constant dense<0.000000e+00> : vector<1xf32>
    %314 = vector.multi_reduction <add>, %313, %cst_187 [1, 2] : vector<1x3x3xf32> to vector<1xf32>
    %315 = vector.shape_cast %314 : vector<1xf32> to vector<1x1x1xf32>
    %316 = vector.extract %315[0, 0, 0] : f32 from vector<1x1x1xf32>
    %cst_188 = arith.constant 0.111111112 : f32
    %317 = arith.mulf %316, %cst_188 : f32
    %318 = vector.broadcast %317 : f32 to vector<1x1x1xf32>
    %c0_189 = arith.constant 0 : index
    %c0_190 = arith.constant 0 : index
    %c4_191 = arith.constant 4 : index
    %319 = vector.load %arg22[%c0_189, %c0_190, %c4_191] : memref<1x1x5xf32, #tpu.memory_space<vmem>>, vector<1x1x1xf32>
    tpu.vector_store %arg22[%c0_189, %c0_190, %c4_191], %318 {strides = array<i32>} : memref<1x1x5xf32, #tpu.memory_space<vmem>>, vector<1x1x1xf32>,
    return
  }
  func.func @transform_0(%arg0: i32) -> (i32, i32, i32) {
    %c0_i32 = arith.constant 0 : i32
    %c0_i32_0 = arith.constant 0 : i32
    %c0_i32_1 = arith.constant 0 : i32
    return %arg0, %c0_i32, %c0_i32_0 : i32, i32, i32
  }
  func.func @transform_1(%arg0: i32) -> (i32, i32, i32) {
    %c0_i32 = arith.constant 0 : i32
    %c0_i32_0 = arith.constant 0 : i32
    %c0_i32_1 = arith.constant 0 : i32
    return %arg0, %c0_i32, %c0_i32_0 : i32, i32, i32
  }
  func.func @transform_2(%arg0: i32) -> (i32, i32) {
    %c0_i32 = arith.constant 0 : i32
    %c0_i32_0 = arith.constant 0 : i32
    %c0_i32_1 = arith.constant 0 : i32
    return %c0_i32, %c0_i32_0 : i32, i32
  }
  func.func @transform_3(%arg0: i32) -> (i32, i32) {
    %c0_i32 = arith.constant 0 : i32
    %c0_i32_0 = arith.constant 0 : i32
    %c0_i32_1 = arith.constant 0 : i32
    return %c0_i32, %c0_i32_0 : i32, i32
  }
  func.func @transform_4(%arg0: i32) -> (i32, i32) {
    %c0_i32 = arith.constant 0 : i32
    %c0_i32_0 = arith.constant 0 : i32
    %c0_i32_1 = arith.constant 0 : i32
    return %c0_i32, %c0_i32_0 : i32, i32
  }
  func.func @transform_5(%arg0: i32) -> (i32, i32) {
    %c0_i32 = arith.constant 0 : i32
    %c0_i32_0 = arith.constant 0 : i32
    %c0_i32_1 = arith.constant 0 : i32
    return %c0_i32, %c0_i32_0 : i32, i32
  }
  func.func @transform_6(%arg0: i32) -> (i32, i32) {
    %c0_i32 = arith.constant 0 : i32
    %c0_i32_0 = arith.constant 0 : i32
    %c0_i32_1 = arith.constant 0 : i32
    return %c0_i32, %c0_i32_0 : i32, i32
  }
  func.func @transform_7(%arg0: i32) -> (i32, i32) {
    %c0_i32 = arith.constant 0 : i32
    %c0_i32_0 = arith.constant 0 : i32
    %c0_i32_1 = arith.constant 0 : i32
    return %c0_i32, %c0_i32_0 : i32, i32
  }
  func.func @transform_8(%arg0: i32) -> (i32, i32) {
    %c0_i32 = arith.constant 0 : i32
    %c0_i32_0 = arith.constant 0 : i32
    %c0_i32_1 = arith.constant 0 : i32
    return %c0_i32, %c0_i32_0 : i32, i32
  }
  func.func @transform_9(%arg0: i32) -> (i32, i32) {
    %c0_i32 = arith.constant 0 : i32
    %c0_i32_0 = arith.constant 0 : i32
    %c0_i32_1 = arith.constant 0 : i32
    return %c0_i32, %c0_i32_0 : i32, i32
  }
  func.func @transform_10(%arg0: i32) -> (i32, i32) {
    %c0_i32 = arith.constant 0 : i32
    %c0_i32_0 = arith.constant 0 : i32
    %c0_i32_1 = arith.constant 0 : i32
    return %c0_i32, %c0_i32_0 : i32, i32
  }
  func.func @transform_11(%arg0: i32) -> (i32, i32) {
    %c0_i32 = arith.constant 0 : i32
    %c0_i32_0 = arith.constant 0 : i32
    %c0_i32_1 = arith.constant 0 : i32
    return %c0_i32, %c0_i32_0 : i32, i32
  }
  func.func @transform_12(%arg0: i32) -> (i32, i32) {
    %c0_i32 = arith.constant 0 : i32
    %c0_i32_0 = arith.constant 0 : i32
    %c0_i32_1 = arith.constant 0 : i32
    return %c0_i32, %c0_i32_0 : i32, i32
  }
  func.func @transform_13(%arg0: i32) -> (i32, i32) {
    %c0_i32 = arith.constant 0 : i32
    %c0_i32_0 = arith.constant 0 : i32
    %c0_i32_1 = arith.constant 0 : i32
    return %c0_i32, %c0_i32_0 : i32, i32
  }
  func.func @transform_14(%arg0: i32) -> (i32, i32) {
    %c0_i32 = arith.constant 0 : i32
    %c0_i32_0 = arith.constant 0 : i32
    %c0_i32_1 = arith.constant 0 : i32
    return %c0_i32, %c0_i32_0 : i32, i32
  }
  func.func @transform_15(%arg0: i32) -> (i32, i32) {
    %c0_i32 = arith.constant 0 : i32
    %c0_i32_0 = arith.constant 0 : i32
    %c0_i32_1 = arith.constant 0 : i32
    return %c0_i32, %c0_i32_0 : i32, i32
  }
  func.func @transform_16(%arg0: i32) -> (i32, i32) {
    %c0_i32 = arith.constant 0 : i32
    %c0_i32_0 = arith.constant 0 : i32
    %c0_i32_1 = arith.constant 0 : i32
    return %c0_i32, %c0_i32_0 : i32, i32
  }
  func.func @transform_17(%arg0: i32) -> (i32, i32) {
    %c0_i32 = arith.constant 0 : i32
    %c0_i32_0 = arith.constant 0 : i32
    %c0_i32_1 = arith.constant 0 : i32
    return %c0_i32, %c0_i32_0 : i32, i32
  }
  func.func @transform_18(%arg0: i32) -> (i32, i32) {
    %c0_i32 = arith.constant 0 : i32
    %c0_i32_0 = arith.constant 0 : i32
    %c0_i32_1 = arith.constant 0 : i32
    return %c0_i32, %c0_i32_0 : i32, i32
  }
  func.func @transform_19(%arg0: i32) -> (i32, i32) {
    %c0_i32 = arith.constant 0 : i32
    %c0_i32_0 = arith.constant 0 : i32
    %c0_i32_1 = arith.constant 0 : i32
    return %c0_i32, %c0_i32_0 : i32, i32
  }
  func.func @transform_20(%arg0: i32) -> (i32, i32, i32) {
    %c0_i32 = arith.constant 0 : i32
    %c0_i32_0 = arith.constant 0 : i32
    %c0_i32_1 = arith.constant 0 : i32
    return %arg0, %c0_i32, %c0_i32_0 : i32, i32, i32
  }
  func.func @transform_21(%arg0: i32) -> (i32, i32, i32) {
    %c0_i32 = arith.constant 0 : i32
    %c0_i32_0 = arith.constant 0 : i32
    %c0_i32_1 = arith.constant 0 : i32
    return %arg0, %c0_i32, %c0_i32_0 : i32, i32, i32
  }
}

module attributes {stable_mosaic.version = 11 : i64} {
  func.func @kernel(%arg0: i32, %arg1: memref<1x32x32xf32, #tpu.memory_space<vmem>>, %arg2: memref<1x32x32xf32, #tpu.memory_space<vmem>>, %arg3: memref<32x32xf32, #tpu.memory_space<vmem>>, %arg4: memref<16x16xf32, #tpu.memory_space<vmem>>, %arg5: memref<9x8xf32, #tpu.memory_space<vmem>>, %arg6: memref<5x4xf32, #tpu.memory_space<vmem>>, %arg7: memref<3x2xf32, #tpu.memory_space<vmem>>, %arg8: memref<32x32xf32, #tpu.memory_space<vmem>>, %arg9: memref<16x16xf32, #tpu.memory_space<vmem>>, %arg10: memref<8x9xf32, #tpu.memory_space<vmem>>, %arg11: memref<4x5xf32, #tpu.memory_space<vmem>>, %arg12: memref<2x3xf32, #tpu.memory_space<vmem>>, %arg13: memref<16x32xf32, #tpu.memory_space<vmem>>, %arg14: memref<8x16xf32, #tpu.memory_space<vmem>>, %arg15: memref<4x8xf32, #tpu.memory_space<vmem>>, %arg16: memref<2x4xf32, #tpu.memory_space<vmem>>, %arg17: memref<32x16xf32, #tpu.memory_space<vmem>>, %arg18: memref<16x8xf32, #tpu.memory_space<vmem>>, %arg19: memref<8x4xf32, #tpu.memory_space<vmem>>, %arg20: memref<4x2xf32, #tpu.memory_space<vmem>>, %arg21: memref<1x1x5xf32, #tpu.memory_space<vmem>>, %arg22: memref<1x1x5xf32, #tpu.memory_space<vmem>>) attributes {dimension_semantics = [#tpu.dimension_semantics<parallel>], iteration_bounds = array<i64: 6>, scalar_prefetch = 0 : i64, scratch_operands = 0 : i64, tpu.core_type = #tpu.core_type<tc>, window_params = [{transform_indices = @transform_0, window_bounds = array<i64: 1, 32, 32>}, {transform_indices = @transform_1, window_bounds = array<i64: 1, 32, 32>}, {pipeline_mode = #tpu.pipeline_mode<synchronous>, transform_indices = @transform_2, window_bounds = array<i64: 32, 32>}, {pipeline_mode = #tpu.pipeline_mode<synchronous>, transform_indices = @transform_3, window_bounds = array<i64: 16, 16>}, {pipeline_mode = #tpu.pipeline_mode<synchronous>, transform_indices = @transform_4, window_bounds = array<i64: 9, 8>}, {pipeline_mode = #tpu.pipeline_mode<synchronous>, transform_indices = @transform_5, window_bounds = array<i64: 5, 4>}, {pipeline_mode = #tpu.pipeline_mode<synchronous>, transform_indices = @transform_6, window_bounds = array<i64: 3, 2>}, {pipeline_mode = #tpu.pipeline_mode<synchronous>, transform_indices = @transform_7, window_bounds = array<i64: 32, 32>}, {pipeline_mode = #tpu.pipeline_mode<synchronous>, transform_indices = @transform_8, window_bounds = array<i64: 16, 16>}, {pipeline_mode = #tpu.pipeline_mode<synchronous>, transform_indices = @transform_9, window_bounds = array<i64: 8, 9>}, {pipeline_mode = #tpu.pipeline_mode<synchronous>, transform_indices = @transform_10, window_bounds = array<i64: 4, 5>}, {pipeline_mode = #tpu.pipeline_mode<synchronous>, transform_indices = @transform_11, window_bounds = array<i64: 2, 3>}, {pipeline_mode = #tpu.pipeline_mode<synchronous>, transform_indices = @transform_12, window_bounds = array<i64: 16, 32>}, {pipeline_mode = #tpu.pipeline_mode<synchronous>, transform_indices = @transform_13, window_bounds = array<i64: 8, 16>}, {pipeline_mode = #tpu.pipeline_mode<synchronous>, transform_indices = @transform_14, window_bounds = array<i64: 4, 8>}, {pipeline_mode = #tpu.pipeline_mode<synchronous>, transform_indices = @transform_15, window_bounds = array<i64: 2, 4>}, {pipeline_mode = #tpu.pipeline_mode<synchronous>, transform_indices = @transform_16, window_bounds = array<i64: 32, 16>}, {pipeline_mode = #tpu.pipeline_mode<synchronous>, transform_indices = @transform_17, window_bounds = array<i64: 16, 8>}, {pipeline_mode = #tpu.pipeline_mode<synchronous>, transform_indices = @transform_18, window_bounds = array<i64: 8, 4>}, {pipeline_mode = #tpu.pipeline_mode<synchronous>, transform_indices = @transform_19, window_bounds = array<i64: 4, 2>}, {transform_indices = @transform_20, window_bounds = array<i64: 1, 1, 5>}, {transform_indices = @transform_21, window_bounds = array<i64: 1, 1, 5>}]} {
    %c0 = arith.constant 0 : index
    %c0_0 = arith.constant 0 : index
    %c0_1 = arith.constant 0 : index
    %0 = vector.load %arg1[%c0, %c0_0, %c0_1] : memref<1x32x32xf32, #tpu.memory_space<vmem>>, vector<1x32x32xf32>
    %1 = vector.shape_cast %0 : vector<1x32x32xf32> to vector<32x32xf32>
    %c0_2 = arith.constant 0 : index
    %c0_3 = arith.constant 0 : index
    %c0_4 = arith.constant 0 : index
    %2 = vector.load %arg2[%c0_2, %c0_3, %c0_4] : memref<1x32x32xf32, #tpu.memory_space<vmem>>, vector<1x32x32xf32>
    %3 = vector.shape_cast %2 : vector<1x32x32xf32> to vector<32x32xf32>
    %4 = arith.addf %1, %3 : vector<32x32xf32>
    %5 = arith.subf %1, %3 : vector<32x32xf32>
    %c0_5 = arith.constant 0 : index
    %c0_6 = arith.constant 0 : index
    %6 = vector.load %arg3[%c0_5, %c0_6] : memref<32x32xf32, #tpu.memory_space<vmem>>, vector<32x32xf32>
    %c0_7 = arith.constant 0 : index
    %c0_8 = arith.constant 0 : index
    %7 = vector.load %arg8[%c0_7, %c0_8] : memref<32x32xf32, #tpu.memory_space<vmem>>, vector<32x32xf32>
    %cst = arith.constant dense<0.000000e+00> : vector<32x32xf32>
    %8 = tpu.matmul %4, %7, %cst {dimension_numbers = #tpu.dot_dimension_numbers<[1], [0], [0], [1], [0, 0, 1, 1], [], []>} : vector<32x32xf32>, vector<32x32xf32>, vector<32x32xf32> -> vector<32x32xf32>
    %cst_9 = arith.constant dense<0.000000e+00> : vector<32x32xf32>
    %9 = tpu.matmul %6, %8, %cst_9 {dimension_numbers = #tpu.dot_dimension_numbers<[1], [0], [0], [1], [0, 0, 1, 1], [], []>} : vector<32x32xf32>, vector<32x32xf32>, vector<32x32xf32> -> vector<32x32xf32>
    %cst_10 = arith.constant dense<0.000000e+00> : vector<32x32xf32>
    %10 = tpu.matmul %5, %7, %cst_10 {dimension_numbers = #tpu.dot_dimension_numbers<[1], [0], [0], [1], [0, 0, 1, 1], [], []>} : vector<32x32xf32>, vector<32x32xf32>, vector<32x32xf32> -> vector<32x32xf32>
    %cst_11 = arith.constant dense<0.000000e+00> : vector<32x32xf32>
    %11 = tpu.matmul %6, %10, %cst_11 {dimension_numbers = #tpu.dot_dimension_numbers<[1], [0], [0], [1], [0, 0, 1, 1], [], []>} : vector<32x32xf32>, vector<32x32xf32>, vector<32x32xf32> -> vector<32x32xf32>
    %12 = arith.mulf %4, %4 : vector<32x32xf32>
    %cst_12 = arith.constant dense<0.000000e+00> : vector<32x32xf32>
    %13 = tpu.matmul %12, %7, %cst_12 {dimension_numbers = #tpu.dot_dimension_numbers<[1], [0], [0], [1], [0, 0, 1, 1], [], []>} : vector<32x32xf32>, vector<32x32xf32>, vector<32x32xf32> -> vector<32x32xf32>
    %cst_13 = arith.constant dense<0.000000e+00> : vector<32x32xf32>
    %14 = tpu.matmul %6, %13, %cst_13 {dimension_numbers = #tpu.dot_dimension_numbers<[1], [0], [0], [1], [0, 0, 1, 1], [], []>} : vector<32x32xf32>, vector<32x32xf32>, vector<32x32xf32> -> vector<32x32xf32>
    %15 = arith.mulf %5, %5 : vector<32x32xf32>
    %cst_14 = arith.constant dense<0.000000e+00> : vector<32x32xf32>
    %16 = tpu.matmul %15, %7, %cst_14 {dimension_numbers = #tpu.dot_dimension_numbers<[1], [0], [0], [1], [0, 0, 1, 1], [], []>} : vector<32x32xf32>, vector<32x32xf32>, vector<32x32xf32> -> vector<32x32xf32>
    %cst_15 = arith.constant dense<0.000000e+00> : vector<32x32xf32>
    %17 = tpu.matmul %6, %16, %cst_15 {dimension_numbers = #tpu.dot_dimension_numbers<[1], [0], [0], [1], [0, 0, 1, 1], [], []>} : vector<32x32xf32>, vector<32x32xf32>, vector<32x32xf32> -> vector<32x32xf32>
    %18 = arith.mulf %9, %9 : vector<32x32xf32>
    %19 = arith.mulf %11, %11 : vector<32x32xf32>
    %20 = arith.subf %18, %19 : vector<32x32xf32>
    %cst_16 = arith.constant 2.500000e-01 : f32
    %21 = vector.broadcast %cst_16 : f32 to vector<32x32xf32>
    %22 = arith.mulf %21, %20 : vector<32x32xf32>
    %23 = arith.addf %18, %19 : vector<32x32xf32>
    %cst_17 = arith.constant 5.000000e-01 : f32
    %24 = vector.broadcast %cst_17 : f32 to vector<32x32xf32>
    %25 = arith.mulf %24, %23 : vector<32x32xf32>
    %26 = arith.subf %14, %17 : vector<32x32xf32>
    %cst_18 = arith.constant 2.500000e-01 : f32
    %27 = vector.broadcast %cst_18 : f32 to vector<32x32xf32>
    %28 = arith.mulf %27, %26 : vector<32x32xf32>
    %29 = arith.subf %28, %22 : vector<32x32xf32>
    %30 = arith.addf %14, %17 : vector<32x32xf32>
    %cst_19 = arith.constant 5.000000e-01 : f32
    %31 = vector.broadcast %cst_19 : f32 to vector<32x32xf32>
    %32 = arith.mulf %31, %30 : vector<32x32xf32>
    %33 = arith.subf %32, %25 : vector<32x32xf32>
    %cst_20 = arith.constant 2.000000e+00 : f32
    %34 = vector.broadcast %cst_20 : f32 to vector<32x32xf32>
    %35 = arith.mulf %34, %29 : vector<32x32xf32>
    %cst_21 = arith.constant 5.852250e+01 : f32
    %36 = vector.broadcast %cst_21 : f32 to vector<32x32xf32>
    %37 = arith.addf %35, %36 : vector<32x32xf32>
    %cst_22 = arith.constant 5.852250e+01 : f32
    %38 = vector.broadcast %cst_22 : f32 to vector<32x32xf32>
    %39 = arith.addf %33, %38 : vector<32x32xf32>
    %cst_23 = arith.constant 2.000000e+00 : f32
    %40 = vector.broadcast %cst_23 : f32 to vector<32x32xf32>
    %41 = arith.mulf %40, %22 : vector<32x32xf32>
    %cst_24 = arith.constant 6.502500e+00 : f32
    %42 = vector.broadcast %cst_24 : f32 to vector<32x32xf32>
    %43 = arith.addf %41, %42 : vector<32x32xf32>
    %44 = arith.mulf %43, %37 : vector<32x32xf32>
    %cst_25 = arith.constant 6.502500e+00 : f32
    %45 = vector.broadcast %cst_25 : f32 to vector<32x32xf32>
    %46 = arith.addf %25, %45 : vector<32x32xf32>
    %47 = arith.mulf %46, %39 : vector<32x32xf32>
    %48 = arith.divf %44, %47 : vector<32x32xf32>
    %49 = arith.divf %37, %39 : vector<32x32xf32>
    %50 = vector.shape_cast %48 : vector<32x32xf32> to vector<1x32x32xf32>
    %cst_26 = arith.constant dense<0.000000e+00> : vector<1xf32>
    %51 = vector.multi_reduction <add>, %50, %cst_26 [1, 2] : vector<1x32x32xf32> to vector<1xf32>
    %52 = vector.shape_cast %51 : vector<1xf32> to vector<1x1x1xf32>
    %53 = vector.extract %52[0, 0, 0] : f32 from vector<1x1x1xf32>
    %cst_27 = arith.constant 9.765625E-4 : f32
    %54 = arith.mulf %53, %cst_27 : f32
    %55 = vector.broadcast %54 : f32 to vector<1x1x1xf32>
    %c0_28 = arith.constant 0 : index
    %c0_29 = arith.constant 0 : index
    %c0_30 = arith.constant 0 : index
    %56 = vector.load %arg21[%c0_28, %c0_29, %c0_30] : memref<1x1x5xf32, #tpu.memory_space<vmem>>, vector<1x1x1xf32>
    tpu.vector_store %arg21[%c0_28, %c0_29, %c0_30], %55 {strides = array<i32>} : memref<1x1x5xf32, #tpu.memory_space<vmem>>, vector<1x1x1xf32>,
    %57 = vector.shape_cast %49 : vector<32x32xf32> to vector<1x32x32xf32>
    %cst_31 = arith.constant dense<0.000000e+00> : vector<1xf32>
    %58 = vector.multi_reduction <add>, %57, %cst_31 [1, 2] : vector<1x32x32xf32> to vector<1xf32>
    %59 = vector.shape_cast %58 : vector<1xf32> to vector<1x1x1xf32>
    %60 = vector.extract %59[0, 0, 0] : f32 from vector<1x1x1xf32>
    %cst_32 = arith.constant 9.765625E-4 : f32
    %61 = arith.mulf %60, %cst_32 : f32
    %62 = vector.broadcast %61 : f32 to vector<1x1x1xf32>
    %c0_33 = arith.constant 0 : index
    %c0_34 = arith.constant 0 : index
    %c0_35 = arith.constant 0 : index
    %63 = vector.load %arg22[%c0_33, %c0_34, %c0_35] : memref<1x1x5xf32, #tpu.memory_space<vmem>>, vector<1x1x1xf32>
    tpu.vector_store %arg22[%c0_33, %c0_34, %c0_35], %62 {strides = array<i32>} : memref<1x1x5xf32, #tpu.memory_space<vmem>>, vector<1x1x1xf32>,
    %c0_36 = arith.constant 0 : index
    %c0_37 = arith.constant 0 : index
    %64 = vector.load %arg13[%c0_36, %c0_37] : memref<16x32xf32, #tpu.memory_space<vmem>>, vector<16x32xf32>
    %c0_38 = arith.constant 0 : index
    %c0_39 = arith.constant 0 : index
    %65 = vector.load %arg17[%c0_38, %c0_39] : memref<32x16xf32, #tpu.memory_space<vmem>>, vector<32x16xf32>
    %cst_40 = arith.constant dense<0.000000e+00> : vector<32x16xf32>
    %66 = tpu.matmul %4, %65, %cst_40 {dimension_numbers = #tpu.dot_dimension_numbers<[1], [0], [0], [1], [0, 0, 1, 1], [], []>} : vector<32x32xf32>, vector<32x16xf32>, vector<32x16xf32> -> vector<32x16xf32>
    %cst_41 = arith.constant dense<0.000000e+00> : vector<16x16xf32>
    %67 = tpu.matmul %64, %66, %cst_41 {dimension_numbers = #tpu.dot_dimension_numbers<[1], [0], [0], [1], [0, 0, 1, 1], [], []>} : vector<16x32xf32>, vector<32x16xf32>, vector<16x16xf32> -> vector<16x16xf32>
    %cst_42 = arith.constant dense<0.000000e+00> : vector<32x16xf32>
    %68 = tpu.matmul %5, %65, %cst_42 {dimension_numbers = #tpu.dot_dimension_numbers<[1], [0], [0], [1], [0, 0, 1, 1], [], []>} : vector<32x32xf32>, vector<32x16xf32>, vector<32x16xf32> -> vector<32x16xf32>
    %cst_43 = arith.constant dense<0.000000e+00> : vector<16x16xf32>
    %69 = tpu.matmul %64, %68, %cst_43 {dimension_numbers = #tpu.dot_dimension_numbers<[1], [0], [0], [1], [0, 0, 1, 1], [], []>} : vector<16x32xf32>, vector<32x16xf32>, vector<16x16xf32> -> vector<16x16xf32>
    %c0_44 = arith.constant 0 : index
    %c0_45 = arith.constant 0 : index
    %70 = vector.load %arg4[%c0_44, %c0_45] : memref<16x16xf32, #tpu.memory_space<vmem>>, vector<16x16xf32>
    %c0_46 = arith.constant 0 : index
    %c0_47 = arith.constant 0 : index
    %71 = vector.load %arg9[%c0_46, %c0_47] : memref<16x16xf32, #tpu.memory_space<vmem>>, vector<16x16xf32>
    %cst_48 = arith.constant dense<0.000000e+00> : vector<16x16xf32>
    %72 = tpu.matmul %67, %71, %cst_48 {dimension_numbers = #tpu.dot_dimension_numbers<[1], [0], [0], [1], [0, 0, 1, 1], [], []>} : vector<16x16xf32>, vector<16x16xf32>, vector<16x16xf32> -> vector<16x16xf32>
    %cst_49 = arith.constant dense<0.000000e+00> : vector<16x16xf32>
    %73 = tpu.matmul %70, %72, %cst_49 {dimension_numbers = #tpu.dot_dimension_numbers<[1], [0], [0], [1], [0, 0, 1, 1], [], []>} : vector<16x16xf32>, vector<16x16xf32>, vector<16x16xf32> -> vector<16x16xf32>
    %cst_50 = arith.constant dense<0.000000e+00> : vector<16x16xf32>
    %74 = tpu.matmul %69, %71, %cst_50 {dimension_numbers = #tpu.dot_dimension_numbers<[1], [0], [0], [1], [0, 0, 1, 1], [], []>} : vector<16x16xf32>, vector<16x16xf32>, vector<16x16xf32> -> vector<16x16xf32>
    %cst_51 = arith.constant dense<0.000000e+00> : vector<16x16xf32>
    %75 = tpu.matmul %70, %74, %cst_51 {dimension_numbers = #tpu.dot_dimension_numbers<[1], [0], [0], [1], [0, 0, 1, 1], [], []>} : vector<16x16xf32>, vector<16x16xf32>, vector<16x16xf32> -> vector<16x16xf32>
    %76 = arith.mulf %67, %67 : vector<16x16xf32>
    %cst_52 = arith.constant dense<0.000000e+00> : vector<16x16xf32>
    %77 = tpu.matmul %76, %71, %cst_52 {dimension_numbers = #tpu.dot_dimension_numbers<[1], [0], [0], [1], [0, 0, 1, 1], [], []>} : vector<16x16xf32>, vector<16x16xf32>, vector<16x16xf32> -> vector<16x16xf32>
    %cst_53 = arith.constant dense<0.000000e+00> : vector<16x16xf32>
    %78 = tpu.matmul %70, %77, %cst_53 {dimension_numbers = #tpu.dot_dimension_numbers<[1], [0], [0], [1], [0, 0, 1, 1], [], []>} : vector<16x16xf32>, vector<16x16xf32>, vector<16x16xf32> -> vector<16x16xf32>
    %79 = arith.mulf %69, %69 : vector<16x16xf32>
    %cst_54 = arith.constant dense<0.000000e+00> : vector<16x16xf32>
    %80 = tpu.matmul %79, %71, %cst_54 {dimension_numbers = #tpu.dot_dimension_numbers<[1], [0], [0], [1], [0, 0, 1, 1], [], []>} : vector<16x16xf32>, vector<16x16xf32>, vector<16x16xf32> -> vector<16x16xf32>
    %cst_55 = arith.constant dense<0.000000e+00> : vector<16x16xf32>
    %81 = tpu.matmul %70, %80, %cst_55 {dimension_numbers = #tpu.dot_dimension_numbers<[1], [0], [0], [1], [0, 0, 1, 1], [], []>} : vector<16x16xf32>, vector<16x16xf32>, vector<16x16xf32> -> vector<16x16xf32>
    %82 = arith.mulf %73, %73 : vector<16x16xf32>
    %83 = arith.mulf %75, %75 : vector<16x16xf32>
    %84 = arith.subf %82, %83 : vector<16x16xf32>
    %cst_56 = arith.constant 2.500000e-01 : f32
    %85 = vector.broadcast %cst_56 : f32 to vector<16x16xf32>
    %86 = arith.mulf %85, %84 : vector<16x16xf32>
    %87 = arith.addf %82, %83 : vector<16x16xf32>
    %cst_57 = arith.constant 5.000000e-01 : f32
    %88 = vector.broadcast %cst_57 : f32 to vector<16x16xf32>
    %89 = arith.mulf %88, %87 : vector<16x16xf32>
    %90 = arith.subf %78, %81 : vector<16x16xf32>
    %cst_58 = arith.constant 2.500000e-01 : f32
    %91 = vector.broadcast %cst_58 : f32 to vector<16x16xf32>
    %92 = arith.mulf %91, %90 : vector<16x16xf32>
    %93 = arith.subf %92, %86 : vector<16x16xf32>
    %94 = arith.addf %78, %81 : vector<16x16xf32>
    %cst_59 = arith.constant 5.000000e-01 : f32
    %95 = vector.broadcast %cst_59 : f32 to vector<16x16xf32>
    %96 = arith.mulf %95, %94 : vector<16x16xf32>
    %97 = arith.subf %96, %89 : vector<16x16xf32>
    %cst_60 = arith.constant 2.000000e+00 : f32
    %98 = vector.broadcast %cst_60 : f32 to vector<16x16xf32>
    %99 = arith.mulf %98, %93 : vector<16x16xf32>
    %cst_61 = arith.constant 5.852250e+01 : f32
    %100 = vector.broadcast %cst_61 : f32 to vector<16x16xf32>
    %101 = arith.addf %99, %100 : vector<16x16xf32>
    %cst_62 = arith.constant 5.852250e+01 : f32
    %102 = vector.broadcast %cst_62 : f32 to vector<16x16xf32>
    %103 = arith.addf %97, %102 : vector<16x16xf32>
    %cst_63 = arith.constant 2.000000e+00 : f32
    %104 = vector.broadcast %cst_63 : f32 to vector<16x16xf32>
    %105 = arith.mulf %104, %86 : vector<16x16xf32>
    %cst_64 = arith.constant 6.502500e+00 : f32
    %106 = vector.broadcast %cst_64 : f32 to vector<16x16xf32>
    %107 = arith.addf %105, %106 : vector<16x16xf32>
    %108 = arith.mulf %107, %101 : vector<16x16xf32>
    %cst_65 = arith.constant 6.502500e+00 : f32
    %109 = vector.broadcast %cst_65 : f32 to vector<16x16xf32>
    %110 = arith.addf %89, %109 : vector<16x16xf32>
    %111 = arith.mulf %110, %103 : vector<16x16xf32>
    %112 = arith.divf %108, %111 : vector<16x16xf32>
    %113 = arith.divf %101, %103 : vector<16x16xf32>
    %114 = vector.shape_cast %112 : vector<16x16xf32> to vector<1x16x16xf32>
    %cst_66 = arith.constant dense<0.000000e+00> : vector<1xf32>
    %115 = vector.multi_reduction <add>, %114, %cst_66 [1, 2] : vector<1x16x16xf32> to vector<1xf32>
    %116 = vector.shape_cast %115 : vector<1xf32> to vector<1x1x1xf32>
    %117 = vector.extract %116[0, 0, 0] : f32 from vector<1x1x1xf32>
    %cst_67 = arith.constant 3.906250e-03 : f32
    %118 = arith.mulf %117, %cst_67 : f32
    %119 = vector.broadcast %118 : f32 to vector<1x1x1xf32>
    %c0_68 = arith.constant 0 : index
    %c0_69 = arith.constant 0 : index
    %c1 = arith.constant 1 : index
    %120 = vector.load %arg21[%c0_68, %c0_69, %c1] : memref<1x1x5xf32, #tpu.memory_space<vmem>>, vector<1x1x1xf32>
    tpu.vector_store %arg21[%c0_68, %c0_69, %c1], %119 {strides = array<i32>} : memref<1x1x5xf32, #tpu.memory_space<vmem>>, vector<1x1x1xf32>,
    %121 = vector.shape_cast %113 : vector<16x16xf32> to vector<1x16x16xf32>
    %cst_70 = arith.constant dense<0.000000e+00> : vector<1xf32>
    %122 = vector.multi_reduction <add>, %121, %cst_70 [1, 2] : vector<1x16x16xf32> to vector<1xf32>
    %123 = vector.shape_cast %122 : vector<1xf32> to vector<1x1x1xf32>
    %124 = vector.extract %123[0, 0, 0] : f32 from vector<1x1x1xf32>
    %cst_71 = arith.constant 3.906250e-03 : f32
    %125 = arith.mulf %124, %cst_71 : f32
    %126 = vector.broadcast %125 : f32 to vector<1x1x1xf32>
    %c0_72 = arith.constant 0 : index
    %c0_73 = arith.constant 0 : index
    %c1_74 = arith.constant 1 : index
    %127 = vector.load %arg22[%c0_72, %c0_73, %c1_74] : memref<1x1x5xf32, #tpu.memory_space<vmem>>, vector<1x1x1xf32>
    tpu.vector_store %arg22[%c0_72, %c0_73, %c1_74], %126 {strides = array<i32>} : memref<1x1x5xf32, #tpu.memory_space<vmem>>, vector<1x1x1xf32>,
    %c0_75 = arith.constant 0 : index
    %c0_76 = arith.constant 0 : index
    %128 = vector.load %arg14[%c0_75, %c0_76] : memref<8x16xf32, #tpu.memory_space<vmem>>, vector<8x16xf32>
    %c0_77 = arith.constant 0 : index
    %c0_78 = arith.constant 0 : index
    %129 = vector.load %arg18[%c0_77, %c0_78] : memref<16x8xf32, #tpu.memory_space<vmem>>, vector<16x8xf32>
    %cst_79 = arith.constant dense<0.000000e+00> : vector<16x8xf32>
    %130 = tpu.matmul %67, %129, %cst_79 {dimension_numbers = #tpu.dot_dimension_numbers<[1], [0], [0], [1], [0, 0, 1, 1], [], []>} : vector<16x16xf32>, vector<16x8xf32>, vector<16x8xf32> -> vector<16x8xf32>
    %cst_80 = arith.constant dense<0.000000e+00> : vector<8x8xf32>
    %131 = tpu.matmul %128, %130, %cst_80 {dimension_numbers = #tpu.dot_dimension_numbers<[1], [0], [0], [1], [0, 0, 1, 1], [], []>} : vector<8x16xf32>, vector<16x8xf32>, vector<8x8xf32> -> vector<8x8xf32>
    %cst_81 = arith.constant dense<0.000000e+00> : vector<16x8xf32>
    %132 = tpu.matmul %69, %129, %cst_81 {dimension_numbers = #tpu.dot_dimension_numbers<[1], [0], [0], [1], [0, 0, 1, 1], [], []>} : vector<16x16xf32>, vector<16x8xf32>, vector<16x8xf32> -> vector<16x8xf32>
    %cst_82 = arith.constant dense<0.000000e+00> : vector<8x8xf32>
    %133 = tpu.matmul %128, %132, %cst_82 {dimension_numbers = #tpu.dot_dimension_numbers<[1], [0], [0], [1], [0, 0, 1, 1], [], []>} : vector<8x16xf32>, vector<16x8xf32>, vector<8x8xf32> -> vector<8x8xf32>
    %c0_83 = arith.constant 0 : index
    %c0_84 = arith.constant 0 : index
    %134 = vector.load %arg5[%c0_83, %c0_84] : memref<9x8xf32, #tpu.memory_space<vmem>>, vector<9x8xf32>
    %c0_85 = arith.constant 0 : index
    %c0_86 = arith.constant 0 : index
    %135 = vector.load %arg10[%c0_85, %c0_86] : memref<8x9xf32, #tpu.memory_space<vmem>>, vector<8x9xf32>
    %cst_87 = arith.constant dense<0.000000e+00> : vector<8x9xf32>
    %136 = tpu.matmul %131, %135, %cst_87 {dimension_numbers = #tpu.dot_dimension_numbers<[1], [0], [0], [1], [0, 0, 1, 1], [], []>} : vector<8x8xf32>, vector<8x9xf32>, vector<8x9xf32> -> vector<8x9xf32>
    %cst_88 = arith.constant dense<0.000000e+00> : vector<9x9xf32>
    %137 = tpu.matmul %134, %136, %cst_88 {dimension_numbers = #tpu.dot_dimension_numbers<[1], [0], [0], [1], [0, 0, 1, 1], [], []>} : vector<9x8xf32>, vector<8x9xf32>, vector<9x9xf32> -> vector<9x9xf32>
    %cst_89 = arith.constant dense<0.000000e+00> : vector<8x9xf32>
    %138 = tpu.matmul %133, %135, %cst_89 {dimension_numbers = #tpu.dot_dimension_numbers<[1], [0], [0], [1], [0, 0, 1, 1], [], []>} : vector<8x8xf32>, vector<8x9xf32>, vector<8x9xf32> -> vector<8x9xf32>
    %cst_90 = arith.constant dense<0.000000e+00> : vector<9x9xf32>
    %139 = tpu.matmul %134, %138, %cst_90 {dimension_numbers = #tpu.dot_dimension_numbers<[1], [0], [0], [1], [0, 0, 1, 1], [], []>} : vector<9x8xf32>, vector<8x9xf32>, vector<9x9xf32> -> vector<9x9xf32>
    %140 = arith.mulf %131, %131 : vector<8x8xf32>
    %cst_91 = arith.constant dense<0.000000e+00> : vector<8x9xf32>
    %141 = tpu.matmul %140, %135, %cst_91 {dimension_numbers = #tpu.dot_dimension_numbers<[1], [0], [0], [1], [0, 0, 1, 1], [], []>} : vector<8x8xf32>, vector<8x9xf32>, vector<8x9xf32> -> vector<8x9xf32>
    %cst_92 = arith.constant dense<0.000000e+00> : vector<9x9xf32>
    %142 = tpu.matmul %134, %141, %cst_92 {dimension_numbers = #tpu.dot_dimension_numbers<[1], [0], [0], [1], [0, 0, 1, 1], [], []>} : vector<9x8xf32>, vector<8x9xf32>, vector<9x9xf32> -> vector<9x9xf32>
    %143 = arith.mulf %133, %133 : vector<8x8xf32>
    %cst_93 = arith.constant dense<0.000000e+00> : vector<8x9xf32>
    %144 = tpu.matmul %143, %135, %cst_93 {dimension_numbers = #tpu.dot_dimension_numbers<[1], [0], [0], [1], [0, 0, 1, 1], [], []>} : vector<8x8xf32>, vector<8x9xf32>, vector<8x9xf32> -> vector<8x9xf32>
    %cst_94 = arith.constant dense<0.000000e+00> : vector<9x9xf32>
    %145 = tpu.matmul %134, %144, %cst_94 {dimension_numbers = #tpu.dot_dimension_numbers<[1], [0], [0], [1], [0, 0, 1, 1], [], []>} : vector<9x8xf32>, vector<8x9xf32>, vector<9x9xf32> -> vector<9x9xf32>
    %146 = arith.mulf %137, %137 : vector<9x9xf32>
    %147 = arith.mulf %139, %139 : vector<9x9xf32>
    %148 = arith.subf %146, %147 : vector<9x9xf32>
    %cst_95 = arith.constant 2.500000e-01 : f32
    %149 = vector.broadcast %cst_95 : f32 to vector<9x9xf32>
    %150 = arith.mulf %149, %148 : vector<9x9xf32>
    %151 = arith.addf %146, %147 : vector<9x9xf32>
    %cst_96 = arith.constant 5.000000e-01 : f32
    %152 = vector.broadcast %cst_96 : f32 to vector<9x9xf32>
    %153 = arith.mulf %152, %151 : vector<9x9xf32>
    %154 = arith.subf %142, %145 : vector<9x9xf32>
    %cst_97 = arith.constant 2.500000e-01 : f32
    %155 = vector.broadcast %cst_97 : f32 to vector<9x9xf32>
    %156 = arith.mulf %155, %154 : vector<9x9xf32>
    %157 = arith.subf %156, %150 : vector<9x9xf32>
    %158 = arith.addf %142, %145 : vector<9x9xf32>
    %cst_98 = arith.constant 5.000000e-01 : f32
    %159 = vector.broadcast %cst_98 : f32 to vector<9x9xf32>
    %160 = arith.mulf %159, %158 : vector<9x9xf32>
    %161 = arith.subf %160, %153 : vector<9x9xf32>
    %cst_99 = arith.constant 2.000000e+00 : f32
    %162 = vector.broadcast %cst_99 : f32 to vector<9x9xf32>
    %163 = arith.mulf %162, %157 : vector<9x9xf32>
    %cst_100 = arith.constant 5.852250e+01 : f32
    %164 = vector.broadcast %cst_100 : f32 to vector<9x9xf32>
    %165 = arith.addf %163, %164 : vector<9x9xf32>
    %cst_101 = arith.constant 5.852250e+01 : f32
    %166 = vector.broadcast %cst_101 : f32 to vector<9x9xf32>
    %167 = arith.addf %161, %166 : vector<9x9xf32>
    %cst_102 = arith.constant 2.000000e+00 : f32
    %168 = vector.broadcast %cst_102 : f32 to vector<9x9xf32>
    %169 = arith.mulf %168, %150 : vector<9x9xf32>
    %cst_103 = arith.constant 6.502500e+00 : f32
    %170 = vector.broadcast %cst_103 : f32 to vector<9x9xf32>
    %171 = arith.addf %169, %170 : vector<9x9xf32>
    %172 = arith.mulf %171, %165 : vector<9x9xf32>
    %cst_104 = arith.constant 6.502500e+00 : f32
    %173 = vector.broadcast %cst_104 : f32 to vector<9x9xf32>
    %174 = arith.addf %153, %173 : vector<9x9xf32>
    %175 = arith.mulf %174, %167 : vector<9x9xf32>
    %176 = arith.divf %172, %175 : vector<9x9xf32>
    %177 = arith.divf %165, %167 : vector<9x9xf32>
    %178 = vector.shape_cast %176 : vector<9x9xf32> to vector<1x9x9xf32>
    %cst_105 = arith.constant dense<0.000000e+00> : vector<1xf32>
    %179 = vector.multi_reduction <add>, %178, %cst_105 [1, 2] : vector<1x9x9xf32> to vector<1xf32>
    %180 = vector.shape_cast %179 : vector<1xf32> to vector<1x1x1xf32>
    %181 = vector.extract %180[0, 0, 0] : f32 from vector<1x1x1xf32>
    %cst_106 = arith.constant 0.0123456791 : f32
    %182 = arith.mulf %181, %cst_106 : f32
    %183 = vector.broadcast %182 : f32 to vector<1x1x1xf32>
    %c0_107 = arith.constant 0 : index
    %c0_108 = arith.constant 0 : index
    %c2 = arith.constant 2 : index
    %184 = vector.load %arg21[%c0_107, %c0_108, %c2] : memref<1x1x5xf32, #tpu.memory_space<vmem>>, vector<1x1x1xf32>
    tpu.vector_store %arg21[%c0_107, %c0_108, %c2], %183 {strides = array<i32>} : memref<1x1x5xf32, #tpu.memory_space<vmem>>, vector<1x1x1xf32>,
    %185 = vector.shape_cast %177 : vector<9x9xf32> to vector<1x9x9xf32>
    %cst_109 = arith.constant dense<0.000000e+00> : vector<1xf32>
    %186 = vector.multi_reduction <add>, %185, %cst_109 [1, 2] : vector<1x9x9xf32> to vector<1xf32>
    %187 = vector.shape_cast %186 : vector<1xf32> to vector<1x1x1xf32>
    %188 = vector.extract %187[0, 0, 0] : f32 from vector<1x1x1xf32>
    %cst_110 = arith.constant 0.0123456791 : f32
    %189 = arith.mulf %188, %cst_110 : f32
    %190 = vector.broadcast %189 : f32 to vector<1x1x1xf32>
    %c0_111 = arith.constant 0 : index
    %c0_112 = arith.constant 0 : index
    %c2_113 = arith.constant 2 : index
    %191 = vector.load %arg22[%c0_111, %c0_112, %c2_113] : memref<1x1x5xf32, #tpu.memory_space<vmem>>, vector<1x1x1xf32>
    tpu.vector_store %arg22[%c0_111, %c0_112, %c2_113], %190 {strides = array<i32>} : memref<1x1x5xf32, #tpu.memory_space<vmem>>, vector<1x1x1xf32>,
    %c0_114 = arith.constant 0 : index
    %c0_115 = arith.constant 0 : index
    %192 = vector.load %arg15[%c0_114, %c0_115] : memref<4x8xf32, #tpu.memory_space<vmem>>, vector<4x8xf32>
    %c0_116 = arith.constant 0 : index
    %c0_117 = arith.constant 0 : index
    %193 = vector.load %arg19[%c0_116, %c0_117] : memref<8x4xf32, #tpu.memory_space<vmem>>, vector<8x4xf32>
    %cst_118 = arith.constant dense<0.000000e+00> : vector<8x4xf32>
    %194 = tpu.matmul %131, %193, %cst_118 {dimension_numbers = #tpu.dot_dimension_numbers<[1], [0], [0], [1], [0, 0, 1, 1], [], []>} : vector<8x8xf32>, vector<8x4xf32>, vector<8x4xf32> -> vector<8x4xf32>
    %cst_119 = arith.constant dense<0.000000e+00> : vector<4x4xf32>
    %195 = tpu.matmul %192, %194, %cst_119 {dimension_numbers = #tpu.dot_dimension_numbers<[1], [0], [0], [1], [0, 0, 1, 1], [], []>} : vector<4x8xf32>, vector<8x4xf32>, vector<4x4xf32> -> vector<4x4xf32>
    %cst_120 = arith.constant dense<0.000000e+00> : vector<8x4xf32>
    %196 = tpu.matmul %133, %193, %cst_120 {dimension_numbers = #tpu.dot_dimension_numbers<[1], [0], [0], [1], [0, 0, 1, 1], [], []>} : vector<8x8xf32>, vector<8x4xf32>, vector<8x4xf32> -> vector<8x4xf32>
    %cst_121 = arith.constant dense<0.000000e+00> : vector<4x4xf32>
    %197 = tpu.matmul %192, %196, %cst_121 {dimension_numbers = #tpu.dot_dimension_numbers<[1], [0], [0], [1], [0, 0, 1, 1], [], []>} : vector<4x8xf32>, vector<8x4xf32>, vector<4x4xf32> -> vector<4x4xf32>
    %c0_122 = arith.constant 0 : index
    %c0_123 = arith.constant 0 : index
    %198 = vector.load %arg6[%c0_122, %c0_123] : memref<5x4xf32, #tpu.memory_space<vmem>>, vector<5x4xf32>
    %c0_124 = arith.constant 0 : index
    %c0_125 = arith.constant 0 : index
    %199 = vector.load %arg11[%c0_124, %c0_125] : memref<4x5xf32, #tpu.memory_space<vmem>>, vector<4x5xf32>
    %cst_126 = arith.constant dense<0.000000e+00> : vector<4x5xf32>
    %200 = tpu.matmul %195, %199, %cst_126 {dimension_numbers = #tpu.dot_dimension_numbers<[1], [0], [0], [1], [0, 0, 1, 1], [], []>} : vector<4x4xf32>, vector<4x5xf32>, vector<4x5xf32> -> vector<4x5xf32>
    %cst_127 = arith.constant dense<0.000000e+00> : vector<5x5xf32>
    %201 = tpu.matmul %198, %200, %cst_127 {dimension_numbers = #tpu.dot_dimension_numbers<[1], [0], [0], [1], [0, 0, 1, 1], [], []>} : vector<5x4xf32>, vector<4x5xf32>, vector<5x5xf32> -> vector<5x5xf32>
    %cst_128 = arith.constant dense<0.000000e+00> : vector<4x5xf32>
    %202 = tpu.matmul %197, %199, %cst_128 {dimension_numbers = #tpu.dot_dimension_numbers<[1], [0], [0], [1], [0, 0, 1, 1], [], []>} : vector<4x4xf32>, vector<4x5xf32>, vector<4x5xf32> -> vector<4x5xf32>
    %cst_129 = arith.constant dense<0.000000e+00> : vector<5x5xf32>
    %203 = tpu.matmul %198, %202, %cst_129 {dimension_numbers = #tpu.dot_dimension_numbers<[1], [0], [0], [1], [0, 0, 1, 1], [], []>} : vector<5x4xf32>, vector<4x5xf32>, vector<5x5xf32> -> vector<5x5xf32>
    %204 = arith.mulf %195, %195 : vector<4x4xf32>
    %cst_130 = arith.constant dense<0.000000e+00> : vector<4x5xf32>
    %205 = tpu.matmul %204, %199, %cst_130 {dimension_numbers = #tpu.dot_dimension_numbers<[1], [0], [0], [1], [0, 0, 1, 1], [], []>} : vector<4x4xf32>, vector<4x5xf32>, vector<4x5xf32> -> vector<4x5xf32>
    %cst_131 = arith.constant dense<0.000000e+00> : vector<5x5xf32>
    %206 = tpu.matmul %198, %205, %cst_131 {dimension_numbers = #tpu.dot_dimension_numbers<[1], [0], [0], [1], [0, 0, 1, 1], [], []>} : vector<5x4xf32>, vector<4x5xf32>, vector<5x5xf32> -> vector<5x5xf32>
    %207 = arith.mulf %197, %197 : vector<4x4xf32>
    %cst_132 = arith.constant dense<0.000000e+00> : vector<4x5xf32>
    %208 = tpu.matmul %207, %199, %cst_132 {dimension_numbers = #tpu.dot_dimension_numbers<[1], [0], [0], [1], [0, 0, 1, 1], [], []>} : vector<4x4xf32>, vector<4x5xf32>, vector<4x5xf32> -> vector<4x5xf32>
    %cst_133 = arith.constant dense<0.000000e+00> : vector<5x5xf32>
    %209 = tpu.matmul %198, %208, %cst_133 {dimension_numbers = #tpu.dot_dimension_numbers<[1], [0], [0], [1], [0, 0, 1, 1], [], []>} : vector<5x4xf32>, vector<4x5xf32>, vector<5x5xf32> -> vector<5x5xf32>
    %210 = arith.mulf %201, %201 : vector<5x5xf32>
    %211 = arith.mulf %203, %203 : vector<5x5xf32>
    %212 = arith.subf %210, %211 : vector<5x5xf32>
    %cst_134 = arith.constant 2.500000e-01 : f32
    %213 = vector.broadcast %cst_134 : f32 to vector<5x5xf32>
    %214 = arith.mulf %213, %212 : vector<5x5xf32>
    %215 = arith.addf %210, %211 : vector<5x5xf32>
    %cst_135 = arith.constant 5.000000e-01 : f32
    %216 = vector.broadcast %cst_135 : f32 to vector<5x5xf32>
    %217 = arith.mulf %216, %215 : vector<5x5xf32>
    %218 = arith.subf %206, %209 : vector<5x5xf32>
    %cst_136 = arith.constant 2.500000e-01 : f32
    %219 = vector.broadcast %cst_136 : f32 to vector<5x5xf32>
    %220 = arith.mulf %219, %218 : vector<5x5xf32>
    %221 = arith.subf %220, %214 : vector<5x5xf32>
    %222 = arith.addf %206, %209 : vector<5x5xf32>
    %cst_137 = arith.constant 5.000000e-01 : f32
    %223 = vector.broadcast %cst_137 : f32 to vector<5x5xf32>
    %224 = arith.mulf %223, %222 : vector<5x5xf32>
    %225 = arith.subf %224, %217 : vector<5x5xf32>
    %cst_138 = arith.constant 2.000000e+00 : f32
    %226 = vector.broadcast %cst_138 : f32 to vector<5x5xf32>
    %227 = arith.mulf %226, %221 : vector<5x5xf32>
    %cst_139 = arith.constant 5.852250e+01 : f32
    %228 = vector.broadcast %cst_139 : f32 to vector<5x5xf32>
    %229 = arith.addf %227, %228 : vector<5x5xf32>
    %cst_140 = arith.constant 5.852250e+01 : f32
    %230 = vector.broadcast %cst_140 : f32 to vector<5x5xf32>
    %231 = arith.addf %225, %230 : vector<5x5xf32>
    %cst_141 = arith.constant 2.000000e+00 : f32
    %232 = vector.broadcast %cst_141 : f32 to vector<5x5xf32>
    %233 = arith.mulf %232, %214 : vector<5x5xf32>
    %cst_142 = arith.constant 6.502500e+00 : f32
    %234 = vector.broadcast %cst_142 : f32 to vector<5x5xf32>
    %235 = arith.addf %233, %234 : vector<5x5xf32>
    %236 = arith.mulf %235, %229 : vector<5x5xf32>
    %cst_143 = arith.constant 6.502500e+00 : f32
    %237 = vector.broadcast %cst_143 : f32 to vector<5x5xf32>
    %238 = arith.addf %217, %237 : vector<5x5xf32>
    %239 = arith.mulf %238, %231 : vector<5x5xf32>
    %240 = arith.divf %236, %239 : vector<5x5xf32>
    %241 = arith.divf %229, %231 : vector<5x5xf32>
    %242 = vector.shape_cast %240 : vector<5x5xf32> to vector<1x5x5xf32>
    %cst_144 = arith.constant dense<0.000000e+00> : vector<1xf32>
    %243 = vector.multi_reduction <add>, %242, %cst_144 [1, 2] : vector<1x5x5xf32> to vector<1xf32>
    %244 = vector.shape_cast %243 : vector<1xf32> to vector<1x1x1xf32>
    %245 = vector.extract %244[0, 0, 0] : f32 from vector<1x1x1xf32>
    %cst_145 = arith.constant 4.000000e-02 : f32
    %246 = arith.mulf %245, %cst_145 : f32
    %247 = vector.broadcast %246 : f32 to vector<1x1x1xf32>
    %c0_146 = arith.constant 0 : index
    %c0_147 = arith.constant 0 : index
    %c3 = arith.constant 3 : index
    %248 = vector.load %arg21[%c0_146, %c0_147, %c3] : memref<1x1x5xf32, #tpu.memory_space<vmem>>, vector<1x1x1xf32>
    tpu.vector_store %arg21[%c0_146, %c0_147, %c3], %247 {strides = array<i32>} : memref<1x1x5xf32, #tpu.memory_space<vmem>>, vector<1x1x1xf32>,
    %249 = vector.shape_cast %241 : vector<5x5xf32> to vector<1x5x5xf32>
    %cst_148 = arith.constant dense<0.000000e+00> : vector<1xf32>
    %250 = vector.multi_reduction <add>, %249, %cst_148 [1, 2] : vector<1x5x5xf32> to vector<1xf32>
    %251 = vector.shape_cast %250 : vector<1xf32> to vector<1x1x1xf32>
    %252 = vector.extract %251[0, 0, 0] : f32 from vector<1x1x1xf32>
    %cst_149 = arith.constant 4.000000e-02 : f32
    %253 = arith.mulf %252, %cst_149 : f32
    %254 = vector.broadcast %253 : f32 to vector<1x1x1xf32>
    %c0_150 = arith.constant 0 : index
    %c0_151 = arith.constant 0 : index
    %c3_152 = arith.constant 3 : index
    %255 = vector.load %arg22[%c0_150, %c0_151, %c3_152] : memref<1x1x5xf32, #tpu.memory_space<vmem>>, vector<1x1x1xf32>
    tpu.vector_store %arg22[%c0_150, %c0_151, %c3_152], %254 {strides = array<i32>} : memref<1x1x5xf32, #tpu.memory_space<vmem>>, vector<1x1x1xf32>,
    %c0_153 = arith.constant 0 : index
    %c0_154 = arith.constant 0 : index
    %256 = vector.load %arg16[%c0_153, %c0_154] : memref<2x4xf32, #tpu.memory_space<vmem>>, vector<2x4xf32>
    %c0_155 = arith.constant 0 : index
    %c0_156 = arith.constant 0 : index
    %257 = vector.load %arg20[%c0_155, %c0_156] : memref<4x2xf32, #tpu.memory_space<vmem>>, vector<4x2xf32>
    %cst_157 = arith.constant dense<0.000000e+00> : vector<4x2xf32>
    %258 = tpu.matmul %195, %257, %cst_157 {dimension_numbers = #tpu.dot_dimension_numbers<[1], [0], [0], [1], [0, 0, 1, 1], [], []>} : vector<4x4xf32>, vector<4x2xf32>, vector<4x2xf32> -> vector<4x2xf32>
    %cst_158 = arith.constant dense<0.000000e+00> : vector<2x2xf32>
    %259 = tpu.matmul %256, %258, %cst_158 {dimension_numbers = #tpu.dot_dimension_numbers<[1], [0], [0], [1], [0, 0, 1, 1], [], []>} : vector<2x4xf32>, vector<4x2xf32>, vector<2x2xf32> -> vector<2x2xf32>
    %cst_159 = arith.constant dense<0.000000e+00> : vector<4x2xf32>
    %260 = tpu.matmul %197, %257, %cst_159 {dimension_numbers = #tpu.dot_dimension_numbers<[1], [0], [0], [1], [0, 0, 1, 1], [], []>} : vector<4x4xf32>, vector<4x2xf32>, vector<4x2xf32> -> vector<4x2xf32>
    %cst_160 = arith.constant dense<0.000000e+00> : vector<2x2xf32>
    %261 = tpu.matmul %256, %260, %cst_160 {dimension_numbers = #tpu.dot_dimension_numbers<[1], [0], [0], [1], [0, 0, 1, 1], [], []>} : vector<2x4xf32>, vector<4x2xf32>, vector<2x2xf32> -> vector<2x2xf32>
    %c0_161 = arith.constant 0 : index
    %c0_162 = arith.constant 0 : index
    %262 = vector.load %arg7[%c0_161, %c0_162] : memref<3x2xf32, #tpu.memory_space<vmem>>, vector<3x2xf32>
    %c0_163 = arith.constant 0 : index
    %c0_164 = arith.constant 0 : index
    %263 = vector.load %arg12[%c0_163, %c0_164] : memref<2x3xf32, #tpu.memory_space<vmem>>, vector<2x3xf32>
    %cst_165 = arith.constant dense<0.000000e+00> : vector<2x3xf32>
    %264 = tpu.matmul %259, %263, %cst_165 {dimension_numbers = #tpu.dot_dimension_numbers<[1], [0], [0], [1], [0, 0, 1, 1], [], []>} : vector<2x2xf32>, vector<2x3xf32>, vector<2x3xf32> -> vector<2x3xf32>
    %cst_166 = arith.constant dense<0.000000e+00> : vector<3x3xf32>
    %265 = tpu.matmul %262, %264, %cst_166 {dimension_numbers = #tpu.dot_dimension_numbers<[1], [0], [0], [1], [0, 0, 1, 1], [], []>} : vector<3x2xf32>, vector<2x3xf32>, vector<3x3xf32> -> vector<3x3xf32>
    %cst_167 = arith.constant dense<0.000000e+00> : vector<2x3xf32>
    %266 = tpu.matmul %261, %263, %cst_167 {dimension_numbers = #tpu.dot_dimension_numbers<[1], [0], [0], [1], [0, 0, 1, 1], [], []>} : vector<2x2xf32>, vector<2x3xf32>, vector<2x3xf32> -> vector<2x3xf32>
    %cst_168 = arith.constant dense<0.000000e+00> : vector<3x3xf32>
    %267 = tpu.matmul %262, %266, %cst_168 {dimension_numbers = #tpu.dot_dimension_numbers<[1], [0], [0], [1], [0, 0, 1, 1], [], []>} : vector<3x2xf32>, vector<2x3xf32>, vector<3x3xf32> -> vector<3x3xf32>
    %268 = arith.mulf %259, %259 : vector<2x2xf32>
    %cst_169 = arith.constant dense<0.000000e+00> : vector<2x3xf32>
    %269 = tpu.matmul %268, %263, %cst_169 {dimension_numbers = #tpu.dot_dimension_numbers<[1], [0], [0], [1], [0, 0, 1, 1], [], []>} : vector<2x2xf32>, vector<2x3xf32>, vector<2x3xf32> -> vector<2x3xf32>
    %cst_170 = arith.constant dense<0.000000e+00> : vector<3x3xf32>
    %270 = tpu.matmul %262, %269, %cst_170 {dimension_numbers = #tpu.dot_dimension_numbers<[1], [0], [0], [1], [0, 0, 1, 1], [], []>} : vector<3x2xf32>, vector<2x3xf32>, vector<3x3xf32> -> vector<3x3xf32>
    %271 = arith.mulf %261, %261 : vector<2x2xf32>
    %cst_171 = arith.constant dense<0.000000e+00> : vector<2x3xf32>
    %272 = tpu.matmul %271, %263, %cst_171 {dimension_numbers = #tpu.dot_dimension_numbers<[1], [0], [0], [1], [0, 0, 1, 1], [], []>} : vector<2x2xf32>, vector<2x3xf32>, vector<2x3xf32> -> vector<2x3xf32>
    %cst_172 = arith.constant dense<0.000000e+00> : vector<3x3xf32>
    %273 = tpu.matmul %262, %272, %cst_172 {dimension_numbers = #tpu.dot_dimension_numbers<[1], [0], [0], [1], [0, 0, 1, 1], [], []>} : vector<3x2xf32>, vector<2x3xf32>, vector<3x3xf32> -> vector<3x3xf32>
    %274 = arith.mulf %265, %265 : vector<3x3xf32>
    %275 = arith.mulf %267, %267 : vector<3x3xf32>
    %276 = arith.subf %274, %275 : vector<3x3xf32>
    %cst_173 = arith.constant 2.500000e-01 : f32
    %277 = vector.broadcast %cst_173 : f32 to vector<3x3xf32>
    %278 = arith.mulf %277, %276 : vector<3x3xf32>
    %279 = arith.addf %274, %275 : vector<3x3xf32>
    %cst_174 = arith.constant 5.000000e-01 : f32
    %280 = vector.broadcast %cst_174 : f32 to vector<3x3xf32>
    %281 = arith.mulf %280, %279 : vector<3x3xf32>
    %282 = arith.subf %270, %273 : vector<3x3xf32>
    %cst_175 = arith.constant 2.500000e-01 : f32
    %283 = vector.broadcast %cst_175 : f32 to vector<3x3xf32>
    %284 = arith.mulf %283, %282 : vector<3x3xf32>
    %285 = arith.subf %284, %278 : vector<3x3xf32>
    %286 = arith.addf %270, %273 : vector<3x3xf32>
    %cst_176 = arith.constant 5.000000e-01 : f32
    %287 = vector.broadcast %cst_176 : f32 to vector<3x3xf32>
    %288 = arith.mulf %287, %286 : vector<3x3xf32>
    %289 = arith.subf %288, %281 : vector<3x3xf32>
    %cst_177 = arith.constant 2.000000e+00 : f32
    %290 = vector.broadcast %cst_177 : f32 to vector<3x3xf32>
    %291 = arith.mulf %290, %285 : vector<3x3xf32>
    %cst_178 = arith.constant 5.852250e+01 : f32
    %292 = vector.broadcast %cst_178 : f32 to vector<3x3xf32>
    %293 = arith.addf %291, %292 : vector<3x3xf32>
    %cst_179 = arith.constant 5.852250e+01 : f32
    %294 = vector.broadcast %cst_179 : f32 to vector<3x3xf32>
    %295 = arith.addf %289, %294 : vector<3x3xf32>
    %cst_180 = arith.constant 2.000000e+00 : f32
    %296 = vector.broadcast %cst_180 : f32 to vector<3x3xf32>
    %297 = arith.mulf %296, %278 : vector<3x3xf32>
    %cst_181 = arith.constant 6.502500e+00 : f32
    %298 = vector.broadcast %cst_181 : f32 to vector<3x3xf32>
    %299 = arith.addf %297, %298 : vector<3x3xf32>
    %300 = arith.mulf %299, %293 : vector<3x3xf32>
    %cst_182 = arith.constant 6.502500e+00 : f32
    %301 = vector.broadcast %cst_182 : f32 to vector<3x3xf32>
    %302 = arith.addf %281, %301 : vector<3x3xf32>
    %303 = arith.mulf %302, %295 : vector<3x3xf32>
    %304 = arith.divf %300, %303 : vector<3x3xf32>
    %305 = arith.divf %293, %295 : vector<3x3xf32>
    %306 = vector.shape_cast %304 : vector<3x3xf32> to vector<1x3x3xf32>
    %cst_183 = arith.constant dense<0.000000e+00> : vector<1xf32>
    %307 = vector.multi_reduction <add>, %306, %cst_183 [1, 2] : vector<1x3x3xf32> to vector<1xf32>
    %308 = vector.shape_cast %307 : vector<1xf32> to vector<1x1x1xf32>
    %309 = vector.extract %308[0, 0, 0] : f32 from vector<1x1x1xf32>
    %cst_184 = arith.constant 0.111111112 : f32
    %310 = arith.mulf %309, %cst_184 : f32
    %311 = vector.broadcast %310 : f32 to vector<1x1x1xf32>
    %c0_185 = arith.constant 0 : index
    %c0_186 = arith.constant 0 : index
    %c4 = arith.constant 4 : index
    %312 = vector.load %arg21[%c0_185, %c0_186, %c4] : memref<1x1x5xf32, #tpu.memory_space<vmem>>, vector<1x1x1xf32>
    tpu.vector_store %arg21[%c0_185, %c0_186, %c4], %311 {strides = array<i32>} : memref<1x1x5xf32, #tpu.memory_space<vmem>>, vector<1x1x1xf32>,
    %313 = vector.shape_cast %305 : vector<3x3xf32> to vector<1x3x3xf32>
    %cst_187 = arith.constant dense<0.000000e+00> : vector<1xf32>
    %314 = vector.multi_reduction <add>, %313, %cst_187 [1, 2] : vector<1x3x3xf32> to vector<1xf32>
    %315 = vector.shape_cast %314 : vector<1xf32> to vector<1x1x1xf32>
    %316 = vector.extract %315[0, 0, 0] : f32 from vector<1x1x1xf32>
    %cst_188 = arith.constant 0.111111112 : f32
    %317 = arith.mulf %316, %cst_188 : f32
    %318 = vector.broadcast %317 : f32 to vector<1x1x1xf32>
    %c0_189 = arith.constant 0 : index
    %c0_190 = arith.constant 0 : index
    %c4_191 = arith.constant 4 : index
    %319 = vector.load %arg22[%c0_189, %c0_190, %c4_191] : memref<1x1x5xf32, #tpu.memory_space<vmem>>, vector<1x1x1xf32>
    tpu.vector_store %arg22[%c0_189, %c0_190, %c4_191], %318 {strides = array<i32>} : memref<1x1x5xf32, #tpu.memory_space<vmem>>, vector<1x1x1xf32>,
    return
  }
  func.func @transform_0(%arg0: i32) -> (i32, i32, i32) {
    %c0_i32 = arith.constant 0 : i32
    %c0_i32_0 = arith.constant 0 : i32
    %c0_i32_1 = arith.constant 0 : i32
    return %arg0, %c0_i32, %c0_i32_0 : i32, i32, i32
  }
  func.func @transform_1(%arg0: i32) -> (i32, i32, i32) {
    %c0_i32 = arith.constant 0 : i32
    %c0_i32_0 = arith.constant 0 : i32
    %c0_i32_1 = arith.constant 0 : i32
    return %arg0, %c0_i32, %c0_i32_0 : i32, i32, i32
  }
  func.func @transform_2(%arg0: i32) -> (i32, i32) {
    %c0_i32 = arith.constant 0 : i32
    %c0_i32_0 = arith.constant 0 : i32
    %c0_i32_1 = arith.constant 0 : i32
    return %c0_i32, %c0_i32_0 : i32, i32
  }
  func.func @transform_3(%arg0: i32) -> (i32, i32) {
    %c0_i32 = arith.constant 0 : i32
    %c0_i32_0 = arith.constant 0 : i32
    %c0_i32_1 = arith.constant 0 : i32
    return %c0_i32, %c0_i32_0 : i32, i32
  }
  func.func @transform_4(%arg0: i32) -> (i32, i32) {
    %c0_i32 = arith.constant 0 : i32
    %c0_i32_0 = arith.constant 0 : i32
    %c0_i32_1 = arith.constant 0 : i32
    return %c0_i32, %c0_i32_0 : i32, i32
  }
  func.func @transform_5(%arg0: i32) -> (i32, i32) {
    %c0_i32 = arith.constant 0 : i32
    %c0_i32_0 = arith.constant 0 : i32
    %c0_i32_1 = arith.constant 0 : i32
    return %c0_i32, %c0_i32_0 : i32, i32
  }
  func.func @transform_6(%arg0: i32) -> (i32, i32) {
    %c0_i32 = arith.constant 0 : i32
    %c0_i32_0 = arith.constant 0 : i32
    %c0_i32_1 = arith.constant 0 : i32
    return %c0_i32, %c0_i32_0 : i32, i32
  }
  func.func @transform_7(%arg0: i32) -> (i32, i32) {
    %c0_i32 = arith.constant 0 : i32
    %c0_i32_0 = arith.constant 0 : i32
    %c0_i32_1 = arith.constant 0 : i32
    return %c0_i32, %c0_i32_0 : i32, i32
  }
  func.func @transform_8(%arg0: i32) -> (i32, i32) {
    %c0_i32 = arith.constant 0 : i32
    %c0_i32_0 = arith.constant 0 : i32
    %c0_i32_1 = arith.constant 0 : i32
    return %c0_i32, %c0_i32_0 : i32, i32
  }
  func.func @transform_9(%arg0: i32) -> (i32, i32) {
    %c0_i32 = arith.constant 0 : i32
    %c0_i32_0 = arith.constant 0 : i32
    %c0_i32_1 = arith.constant 0 : i32
    return %c0_i32, %c0_i32_0 : i32, i32
  }
  func.func @transform_10(%arg0: i32) -> (i32, i32) {
    %c0_i32 = arith.constant 0 : i32
    %c0_i32_0 = arith.constant 0 : i32
    %c0_i32_1 = arith.constant 0 : i32
    return %c0_i32, %c0_i32_0 : i32, i32
  }
  func.func @transform_11(%arg0: i32) -> (i32, i32) {
    %c0_i32 = arith.constant 0 : i32
    %c0_i32_0 = arith.constant 0 : i32
    %c0_i32_1 = arith.constant 0 : i32
    return %c0_i32, %c0_i32_0 : i32, i32
  }
  func.func @transform_12(%arg0: i32) -> (i32, i32) {
    %c0_i32 = arith.constant 0 : i32
    %c0_i32_0 = arith.constant 0 : i32
    %c0_i32_1 = arith.constant 0 : i32
    return %c0_i32, %c0_i32_0 : i32, i32
  }
  func.func @transform_13(%arg0: i32) -> (i32, i32) {
    %c0_i32 = arith.constant 0 : i32
    %c0_i32_0 = arith.constant 0 : i32
    %c0_i32_1 = arith.constant 0 : i32
    return %c0_i32, %c0_i32_0 : i32, i32
  }
  func.func @transform_14(%arg0: i32) -> (i32, i32) {
    %c0_i32 = arith.constant 0 : i32
    %c0_i32_0 = arith.constant 0 : i32
    %c0_i32_1 = arith.constant 0 : i32
    return %c0_i32, %c0_i32_0 : i32, i32
  }
  func.func @transform_15(%arg0: i32) -> (i32, i32) {
    %c0_i32 = arith.constant 0 : i32
    %c0_i32_0 = arith.constant 0 : i32
    %c0_i32_1 = arith.constant 0 : i32
    return %c0_i32, %c0_i32_0 : i32, i32
  }
  func.func @transform_16(%arg0: i32) -> (i32, i32) {
    %c0_i32 = arith.constant 0 : i32
    %c0_i32_0 = arith.constant 0 : i32
    %c0_i32_1 = arith.constant 0 : i32
    return %c0_i32, %c0_i32_0 : i32, i32
  }
  func.func @transform_17(%arg0: i32) -> (i32, i32) {
    %c0_i32 = arith.constant 0 : i32
    %c0_i32_0 = arith.constant 0 : i32
    %c0_i32_1 = arith.constant 0 : i32
    return %c0_i32, %c0_i32_0 : i32, i32
  }
  func.func @transform_18(%arg0: i32) -> (i32, i32) {
    %c0_i32 = arith.constant 0 : i32
    %c0_i32_0 = arith.constant 0 : i32
    %c0_i32_1 = arith.constant 0 : i32
    return %c0_i32, %c0_i32_0 : i32, i32
  }
  func.func @transform_19(%arg0: i32) -> (i32, i32) {
    %c0_i32 = arith.constant 0 : i32
    %c0_i32_0 = arith.constant 0 : i32
    %c0_i32_1 = arith.constant 0 : i32
    return %c0_i32, %c0_i32_0 : i32, i32
  }
  func.func @transform_20(%arg0: i32) -> (i32, i32, i32) {
    %c0_i32 = arith.constant 0 : i32
    %c0_i32_0 = arith.constant 0 : i32
    %c0_i32_1 = arith.constant 0 : i32
    return %arg0, %c0_i32, %c0_i32_0 : i32, i32, i32
  }
  func.func @transform_21(%arg0: i32) -> (i32, i32, i32) {
    %c0_i32 = arith.constant 0 : i32
    %c0_i32_0 = arith.constant 0 : i32
    %c0_i32_1 = arith.constant 0 : i32
    return %arg0, %c0_i32, %c0_i32_0 : i32, i32, i32
  }
}

</mosaic_0001>

<bundles_post_ra>
// kernel: tpu_custom_call.1
= control target key start
LH: loop header
LB: loop body
LE: loop exit
PB: predicated region body
PF: predicated region fallthrough
CT: control target
= control target key end

     0   :  { %s7406_s0 = inlined_call_operand.hbm [shape: f32[6,32,32], index: 0, kind: input, shape index: {}]   ;;  %s7407_s1 = inlined_call_operand.hbm [shape: f32[6,32,32], index: 1, kind: input, shape index: {}]   ;;  %s7408_s2 = inlined_call_operand.vmem [shape: f32[32,32], index: 2, kind: input, shape index: {}]   ;;  %s7409_s3 = inlined_call_operand.vmem [shape: f32[16,16], index: 3, kind: input, shape index: {}]   ;;  %s7410_s4 = inlined_call_operand.vmem [shape: f32[9,8], index: 4, kind: input, shape index: {}]   ;;  %s7411_s5 = inlined_call_operand.vmem [shape: f32[5,4], index: 5, kind: input, shape index: {}]   ;;  %s7412_s6 = inlined_call_operand.vmem [shape: f32[3,2], index: 6, kind: input, shape index: {}]   ;;  %s7413_s7 = inlined_call_operand.vmem [shape: f32[32,32], index: 7, kind: input, shape index: {}]   ;;  %s7414_s8 = inlined_call_operand.vmem [shape: f32[16,16], index: 8, kind: input, shape index: {}]   ;;  %s7415_s9 = inlined_call_operand.vmem [shape: f32[8,9], index: 9, kind: input, shape index: {}]   ;;  %s7416_s10 = inlined_call_operand.vmem [shape: f32[4,5], index: 10, kind: input, shape index: {}]   ;;  %s7417_s11 = inlined_call_operand.vmem [shape: f32[2,3], index: 11, kind: input, shape index: {}]   ;;  %s7418_s12 = inlined_call_operand.vmem [shape: f32[16,32], index: 12, kind: input, shape index: {}]   ;;  %s7419_s13 = inlined_call_operand.vmem [shape: f32[8,16], index: 13, kind: input, shape index: {}]   ;;  %s7420_s14 = inlined_call_operand.vmem [shape: f32[4,8], index: 14, kind: input, shape index: {}]   ;;  %s7421_s15 = inlined_call_operand.vmem [shape: f32[2,4], index: 15, kind: input, shape index: {}]   ;;  %s7422_s16 = inlined_call_operand.vmem [shape: f32[32,16], index: 16, kind: input, shape index: {}]   ;;  %s7423_s17 = inlined_call_operand.vmem [shape: f32[16,8], index: 17, kind: input, shape index: {}]   ;;  %s7424_s18 = inlined_call_operand.vmem [shape: f32[8,4], index: 18, kind: input, shape index: {}]   ;;  %s7425_s19 = inlined_call_operand.vmem [shape: f32[4,2], index: 19, kind: input, shape index: {}]   ;;  %s7426_s20 = inlined_call_operand.vmem [shape: f32[6,1,5], index: 20, kind: output, shape index: {0}]   ;;  %s7427_s21 = inlined_call_operand.vmem [shape: f32[6,1,5], index: 21, kind: output, shape index: {1}]  }
   0x1   :  { %7440 = sst [smem:[#allocation11_spill]] %s7406_s0 }
   0x2   :  { %7441 = sst [smem:[#allocation12_spill]] %s7407_s1 }
   0x3   :  { %7442 = sst [smem:[#allocation13_spill]] %s7408_s2 }
   0x4   :  { %7443 = sst [smem:[#allocation14_spill]] %s7409_s3 }
   0x5   :  { %7444 = sst [smem:[#allocation15_spill]] %s7410_s4 }
   0x6   :  { %7445 = sst [smem:[#allocation16_spill]] %s7411_s5 }
   0x7   :  { %7446 = sst [smem:[#allocation17_spill]] %s7412_s6 }
   0x8   :  { %7447 = sst [smem:[#allocation18_spill]] %s7416_s10 }
   0x9   :  { %7448 = sst [smem:[#allocation19_spill]] %s7417_s11 }
   0xa   :  { %7449 = sst [smem:[#allocation20_spill]] %s7421_s15 }
   0xb   :  { %7450 = sst [smem:[#allocation21_spill]] %s7425_s19 }
   0xc   :  { %27 = vsyncpa [#allocation3], 0 }
   0xd   :  { %29 = vsyncpa [#allocation3 + $0x1], 0 }
   0xe   :  { %30 = vsyncpa [#allocation5], 0 }
   0xf   :  { %32 = vsyncpa [#allocation5 + $0x1], 0  ;;  %s6861_s2 = smov 0   ;;  %s6863_s25 = smov 0  }
  0x10   :  { %s6865_s26 = smov 0   ;;  %s6867_s27 = smov 0  }
  0x11 LB: > { %7451 = sst [smem:[#allocation8_spill]] %s6738_s26  ;;  %s6880_s3 = sadd.s32 4294967295, %s6742_s27   ;;  %s6742_s27 = sphi %s6867_s27, %s7475_s27   ;;  %s6738_s26 = sphi %s6865_s26, %s7477_s26   ;;  %s6734_s25 = sphi %s6863_s25, %s7479_s25   ;;  %s6730_s2 = sphi %s6861_s2, %s7478_s2  }
  0x12   : > { %s6883_s28 = sadd.s32 1, %s6742_s27   ;;  %s45_s0 = sadd.s32 1, %s6738_s26 }
  0x13   : > { %7452 = sst [smem:[#allocation9_spill]] %s6883_s28  ;;  %s42_s29 = ssub.s32 %s6742_s27, %s6883_s28 }
  0x14   : > { %p43_p0 = scmp.eq.s32.totalorder %s42_s29, 0  ;;  %p52_p1 = scmp.ne.s32.totalorder %s6738_s26, %s6734_s25 }
  0x15   : > { %p53_p2 = scmp.eq.s32.totalorder %s6742_s27, 0  ;;  %p58_p3 = scmp.ne.s32.totalorder %s6734_s25, %s6730_s2 }
  0x16   : > { %s6893_s4 = scalar_select %p43_p0, %s6738_s26, %s45_s0  }
  0x17   : > { %p54_p4 = por %p53_p2, %p52_p1  ;;  %p59_p5 = scmp.eq.s32.totalorder %s6880_s3, 0 }
  0x18   : > { %7453 = sst [smem:[#allocation10_spill]] %s6893_s4  ;;  %p6566_p6 = scmp.lt.s32.totalorder %s6742_s27, 6 }
  0x19   : > { %p6897_p7 = por %p59_p5, %p58_p3  ;;  %s6902_s5 = sand.u32 1, %s6738_s26  }
  0x1a   : > { %s7436_s22 = sshll.u32 %s6902_s5, 5  ;;  %s7437_s23 = sshll.u32 %s6742_s27, 9 }
  0x1b   : > { %s7454_s30 = scalar_select %p6897_p7, 1, 0 }
  0x1c   : > { %s7455_s2 = sld [smem:[#allocation11_spill]]  ;;  %s596_s4 = scalar_lea.vmem [#allocation2], %s7436_s22 }
  0x1d   : > { %s603_s28 = sshll.u32 %s596_s4, 4  ;;  %p6917_p8 = pnand %p6566_p6, %p54_p4  ;;  %s6915_s28 = int_to_ptr.vmem [resolvable:$true] %s603_s28 }
  0x1f   : > { %p6646_p11 = pneg %p6917_p8 }
  0x22   : > { %s7456_s29 = smov %s7455_s2  ;;  %s6911_s0 = scalar_lea.hbm %s7455_s2, %s7437_s23 }
  0x23   : > { %s6644_s1 = scalar_lea.hbm %s6911_s0, 512  ;;  %s6649_s2 = scalar_lea.hbm %s7456_s29, 3072 }
  0x24   : > { %p6645_p10 = scmp.ne.s32.totalorder %s6911_s0, %s6644_s1  ;;  %p6650_p0 = scmp.lt.u32.totalorder %s6911_s0, %s7456_s29 }
  0x25   : > { %p6651_p1 = scmp.lt.u32.totalorder %s6649_s2, %s6644_s1  ;;  %p6653_p3 = scmp.lt.u32.totalorder %s6644_s1, %s6911_s0 }
  0x26   : > { %p6647_p12 = pnand %p6646_p11, %p6645_p10 }
  0x27   : > { %p6652_p2 = por %p6651_p1, %p6650_p0 }
  0x28   : > { %p6648_p13 = pneg %p6647_p12 }
  0x29   : > { %p6654_p4 = por %p6653_p3, %p6652_p2 }
  0x2b   : > { %p6655_p5 = pnand %p6654_p4, %p6648_p13 }
  0x2d   : > { %6658 = shalt.err (!%p6655_p5)
}
  0x2e   : > { %s6659_s6 = scalar_lea.vmem %s6915_s28, 512  ;;  %s6744_s24 = smov [#allocation2]  }
  0x2f   : > { %p6660_p6 = scmp.ne.s32.totalorder %s6915_s28, %s6659_s6  ;;  %s6664_s4 = sshll.u32 %s6744_s24, 4  ;;  %s6665_s4 = int_to_ptr.vmem [resolvable:$false] %s6664_s4 }
  0x30   : > { %s6666_s22 = scalar_lea.vmem %s6665_s4, 1024  ;;  %p6667_p9 = scmp.lt.s32.totalorder %s6915_s28, %s6665_s4 }
  0x31   : > { %p6662_p10 = pnand %p6660_p6, %p6646_p11  ;;  %p6668_p0 = scmp.lt.s32.totalorder %s6666_s22, %s6659_s6 }
  0x33   : > { %p6663_p12 = pneg %p6662_p10  ;;  %p6669_p1 = por %p6668_p0, %p6667_p9 }
  0x35   : > { %p6670_p2 = pnand %p6669_p1, %p6663_p12 }
  0x37   : > { %6673 = shalt.err (!%p6670_p2)
}
  0x38   : > { %s6745_s23 = smov 128   ;;  %s6746_s1 = smov 8  }
  0x39   : > { %s7458_s6 = scalar_lea.sflag [#allocation3], %s6902_s5  ;;  %p632_p9 = scmp.lt.s32.totalorder %s6742_s27, 7 }
  0x3a   : > { %6562 = dma.hbm_to_vmem [thread:$0]  (!%p6917_p8), %s6911_s0, 512, %s6915_s28, %s7458_s6, %s6745_s23, %s6745_s23, %s6746_s1  }
  0x3b   : > { %s7459_s2 = sshll.u32 %s6742_s27, 9  ;;  %s7460_s22 = sld [smem:[#allocation12_spill]] }
  0x3c   : > { %p7461_p13 = scmp.ge.s32.totalorder %s6742_s27, 1  ;;  %s7463_s15 = sshll.u32 %s6902_s5, 5 }
  0x3d   : > { %s617_s19 = scalar_lea.vmem [#allocation4], %s7463_s15  ;;  %s614_s28 = scalar_lea.sflag [#allocation5], %s6902_s5 }
  0x3e   : > { %p6963_p3 = pnand %p7461_p13, %p632_p9  ;;  %s624_s10 = sshll.u32 %s617_s19, 4  ;;  %s6969_s10 = int_to_ptr.vmem [resolvable:$true] %s624_s10 }
  0x41   : > { %s6959_s29 = scalar_lea.hbm %s7460_s22, %s7459_s2  ;;  %s6679_s2 = scalar_lea.hbm %s7460_s22, 3072 }
  0x42   : > { %s6674_s0 = scalar_lea.hbm %s6959_s29, 512  ;;  %p6680_p10 = scmp.lt.u32.totalorder %s6959_s29, %s7460_s22 }
  0x43   : > { %p6675_p4 = scmp.ne.s32.totalorder %s6959_s29, %s6674_s0  ;;  %p6681_p12 = scmp.lt.u32.totalorder %s6679_s2, %s6674_s0 }
  0x44   : > { %p6683_p1 = scmp.lt.u32.totalorder %s6674_s0, %s6959_s29 }
  0x45   : > { %p6677_p5 = pnand %p6675_p4, %p6646_p11  ;;  %p6682_p0 = por %p6681_p12, %p6680_p10 }
  0x47   : > { %p6678_p6 = pneg %p6677_p5  ;;  %p6684_p2 = por %p6683_p1, %p6682_p0 }
  0x49   : > { %p6685_p9 = pnand %p6684_p2, %p6678_p6 }
  0x4b   : > { %6688 = shalt.err (!%p6685_p9)
}
  0x4c   : > { %s6689_s15 = scalar_lea.vmem %s6969_s10, 512  ;;  %s6747_s19 = smov [#allocation4]  }
  0x4d   : > { %p6690_p13 = scmp.ne.s32.totalorder %s6969_s10, %s6689_s15  ;;  %s6694_s27 = sshll.u32 %s6747_s19, 4  ;;  %s6695_s27 = int_to_ptr.vmem [resolvable:$false] %s6694_s27 }
  0x4e   : > { %s6696_s6 = scalar_lea.vmem %s6695_s27, 1024  ;;  %p6697_p7 = scmp.lt.s32.totalorder %s6969_s10, %s6695_s27 }
  0x4f   : > { %p6692_p4 = pnand %p6690_p13, %p6646_p11  ;;  %p6698_p10 = scmp.lt.s32.totalorder %s6696_s6, %s6689_s15 }
  0x51   : > { %p6693_p5 = pneg %p6692_p4  ;;  %p6699_p12 = por %p6698_p10, %p6697_p7 }
  0x53   : > { %p6700_p0 = pnand %p6699_p12, %p6693_p5 }
  0x55   : > { %6703 = shalt.err (!%p6700_p0)
}
  0x56   : > { %6565 = dma.hbm_to_vmem [thread:$0]  (!%p6917_p8), %s6959_s29, 512, %s6969_s10, %s614_s28, %s6745_s23, %s6745_s23, %s6746_s1  }
  0x57   : > { %636 = sbr.rel (%p6963_p3) target bundleno = 2581 (0xa15), region = 100  ;;  %s638_s0 = sand.u32 (!%p6963_p3), 1, %s6734_s25  }
  0x58   : > { %s5653_s2 = sshll.u32 (!%p6963_p3), %s638_s0, 5  ;;  %s639_s24 = scalar_lea.sflag (!%p6963_p3), [#allocation3], %s638_s0 }
  0x59   : > { %s642_s4 = scalar_lea.vmem (!%p6963_p3), [#allocation2], %s5653_s2  ;;  %p7464_p7 = scmp.ne.s32.totalorder (!%p6963_p3), %s7454_s30, 0 }
  0x5e   : > { %6721 = dma.done.wait (%p7464_p7), %s639_s24, 512  }
  0x5f   : > { %6723 = vsyncadd (%p7464_p7), %s639_s24, 4294966784  ;;  %s648_s26 = scalar_lea.sflag [#allocation5], %s638_s0  ;;  %s651_s5 = scalar_lea.vmem [#allocation4], %s5653_s2 }
  0x60   : > { %6725 = dma.done.wait (%p7464_p7), %s648_s26, 512  }
  0x61   : > { %6727 = vsyncadd (%p7464_p7), %s648_s26, 4294966784  ;;  %v742_v0 = vld [vmem:[%s7413_s7] sm:$0xff]  ;;  %v743_v1 = vld [vmem:[%s7413_s7 + $0x8] sm:$0xff]  ;;  %vm746_vm0 = vcmask 261120   ;;  %s7465_s11 = sld [smem:[#allocation13_spill]]  ;;  %vm1966_vm1 = vcmask 130048  }
  0x62   : > { %v744_v2 = vld [vmem:[%s7413_s7 + $0x10] sm:$0xff]  ;;  %v6393_v3 = vpack.c.bf16 %v743_v1, %v742_v0  ;;  %v745_v4 = vld [vmem:[%s7413_s7 + $0x18] sm:$0xff]  ;;  %v722_v5 = vld [vmem:[%s642_s4] sm:$0xff]  ;;  %s7466_s15 = sld [smem:[#allocation14_spill]]  ;;  %vm6749_vm2 = vmmov 0   ;;  %p716_p8 = scmp.lt.s32.totalorder %s6880_s3, 5 }
  0x63   : > { %v726_v6 = vld [vmem:[%s651_s5] sm:$0xff]  ;;  %v6397_v7 = vpack.c.bf16 %v745_v4, %v744_v2  ;;  %v723_v9 = vld [vmem:[%s642_s4 + $0x8] sm:$0xff]  ;;  %v724_v11 = vld [vmem:[%s642_s4 + $0x10] sm:$0xff]  ;;  %vm1609_vm3 = vcmask 0   ;;  %vm2979_vm4 = vcmask 64512   ;;  %vm2663_vm5 = vcmask 8200  }
  0x64   : > { %v7023_v8 = vadd.f32 %v726_v6, %v722_v5  ;;  %6394 = vmatprep.subr.bf16.mxu0 %v6393_v3  ;;  %v727_v10 = vld [vmem:[%s651_s5 + $0x8] sm:$0xff]  ;;  %v728_v12 = vld [vmem:[%s651_s5 + $0x10] sm:$0xff]  ;;  %v725_v15 = vld [vmem:[%s642_s4 + $0x18] sm:$0xff]  ;;  %v734_v18 = vsub.f32 %v722_v5, %v726_v6  ;;  %s7481_s3 = smov (!%p716_p8, %s6880_s3), 5  ;;  %s7469_s27 = sld [smem:[#allocation18_spill]]  ;;  %vm3952_vm6 = vcmask 1043456  }
  0x65   : > { %6396 = vmatpush3.bf16.msra.mxu0 %v6393_v3  ;;  %v731_v13 = vadd.f32 %v727_v10, %v723_v9  ;;  %v732_v14 = vadd.f32 %v728_v12, %v724_v11  ;;  %v729_v16 = vld [vmem:[%s651_s5 + $0x18] sm:$0xff]  ;;  %v735_v19 = vsub.f32 %v723_v9, %v727_v10  ;;  %v736_v20 = vsub.f32 %v724_v11, %v728_v12  ;;  %v1632_v25 = vld [vmem:[%s7422_s16] sm:$0xff]  ;;  %v1633_v26 = vld [vmem:[%s7422_s16 + $0x8] sm:$0xff]  ;;  %s7176_s0 = scalar_lea.vmem %s7426_s20, %s7481_s3  ;;  %s7183_s10 = scalar_lea.vmem %s7427_s21, %s7481_s3 }
  0x66   : > { %5995 = vmatprep.mubr.msk.f32.mxu0 %vm746_vm0, %v7023_v8  ;;  %6398 = vmatprep.subr.bf16.mxu0 %v6397_v7  ;;  %v733_v17 = vadd.f32 %v729_v16, %v725_v15  ;;  %v737_v21 = vsub.f32 %v725_v15, %v729_v16  ;;  %v1123_v22 = vmul.f32 %v7023_v8, %v7023_v8  ;;  %v1634_v30 = vld [vmem:[%s7422_s16 + $0x10] sm:$0xff]  ;;  %v1635_v31 = vld [vmem:[%s7422_s16 + $0x18] sm:$0xff]  ;;  %v1630_v6 = vld [vmem:[%s7418_s12] sm:$0xff]  ;;  %vm3948_vm7 = vcmask 31744  }
  0x67   : > { %v1124_v23 = vmul.f32 %v731_v13, %v731_v13  ;;  %v1125_v24 = vmul.f32 %v732_v14, %v732_v14  ;;  %v1309_v28 = vmul.f32 %v734_v18, %v734_v18  ;;  %v6457_v29 = vpack.c.bf16 %v1633_v26, %v1632_v25  ;;  %v738_v36 = vld [vmem:[%s7465_s11] sm:$0xff]  ;;  %v739_v45 = vld [vmem:[%s7465_s11 + $0x8] sm:$0xff]  ;;  %v740_v47 = vld [vmem:[%s7465_s11 + $0x10] sm:$0xff] }
  0x68   : > { %v1126_v27 = vmul.f32 %v733_v17, %v733_v17  ;;  %v1310_v32 = vmul.f32 %v735_v19, %v735_v19  ;;  %v1311_v33 = vmul.f32 %v736_v20, %v736_v20  ;;  %v6461_v34 = vpack.c.bf16 %v1635_v31, %v1634_v30  ;;  %6009 = vmatprep.mubr.msk.f32.mxu1 %vm746_vm0, %v738_v36  ;;  %v741_v50 = vld [vmem:[%s7465_s11 + $0x18] sm:$0xff]  ;;  %v1631_v9 = vld [vmem:[%s7418_s12 + $0x8] sm:$0xff] }
  0x69   : > { %6400 = vmatpush3.bf16.msra.mxu0 %v6397_v7  ;;  %v1312_v35 = vmul.f32 %v737_v21, %v737_v21  ;;  %v1965_v15 = vld [vmem:[%s7414_s8 + $0x8] sm:$0xff]  ;;  %vm3630_vm8 = vcmask 65536   ;;  %vm3628_vm9 = vcmask 72704   ;;  %vm3644_vm10 = vcmask 16400  }
  0x6a   : > { %6410 = vmatprep.subr.bf16.mxu0 %v6393_v3  ;;  %vm4894_vm11 = vcmask 1041408   ;;  %vm4890_vm12 = vcmask 15360   ;;  %vm4566_vm13 = vcmask 36864   ;;  %vm4579_vm14 = vcmask 24600  }
  0x6b   : > { %vm5508_vm15 = vcmask 18432  }
  0x6c   : > { %5996 = vmatmul.mubr.msk.f32.vlgmr.msra.gmra.mrb[0].mxu0 %vm746_vm0, %v731_v13 }
  0x6d   : > { %6412 = vmatpush3.bf16.msra.mxu0 %v6393_v3  ;;  %5998 = vmatprep.mubr.msk.f32.mxu0 %vm746_vm0, %v732_v14 }
  0x6e   : > { %6414 = vmatprep.subr.bf16.mxu0 %v6397_v7 }
  0x70   : > { %5999 = vmatmul.mubr.msk.f32.gmra.mrb[2].mxu0 %vm746_vm0, %v733_v17 }
  0x71   : > { %6416 = vmatpush3.bf16.msra.mxu0 %v6397_v7  ;;  %6023 = vmatprep.mubr.msk.f32.mxu0 %vm746_vm0, %v734_v18 }
  0x72   : > { %6426 = vmatprep.subr.bf16.mxu0 %v6393_v3 }
  0x74   : > { %6024 = vmatmul.mubr.msk.f32.vlgmr.msra.gmra.mrb[4].mxu0 %vm746_vm0, %v735_v19 }
  0x75   : > { %6428 = vmatpush3.bf16.msra.mxu0 %v6393_v3  ;;  %6026 = vmatprep.mubr.msk.f32.mxu0 %vm746_vm0, %v736_v20 }
  0x76   : > { %6430 = vmatprep.subr.bf16.mxu0 %v6397_v7 }
  0x78   : > { %6027 = vmatmul.mubr.msk.f32.gmra.mrb[6].mxu0 %vm746_vm0, %v737_v21 }
  0x79   : > { %6432 = vmatpush3.bf16.msra.mxu0 %v6397_v7  ;;  %6051 = vmatprep.mubr.msk.f32.mxu0 %vm746_vm0, %v1123_v22 }
  0x7a   : > { %6442 = vmatprep.subr.bf16.mxu0 %v6393_v3 }
  0x7c   : > { %6052 = vmatmul.mubr.msk.f32.vlgmr.msra.gmra.mrb[8].mxu0 %vm746_vm0, %v1124_v23 }
  0x7d   : > { %6444 = vmatpush3.bf16.msra.mxu0 %v6393_v3  ;;  %6054 = vmatprep.mubr.msk.f32.mxu0 %vm746_vm0, %v1125_v24 }
  0x7e   : > { %6446 = vmatprep.subr.bf16.mxu0 %v6397_v7 }
  0x80   : > { %6055 = vmatmul.mubr.msk.f32.gmra.mrb[10].mxu0 %vm746_vm0, %v1126_v27 }
  0x81   : > { %6448 = vmatpush3.bf16.msra.mxu0 %v6397_v7  ;;  %6079 = vmatprep.mubr.msk.f32.mxu0 %vm746_vm0, %v1309_v28 }
  0x82   : > { %6458 = vmatprep.subr.bf16.mxu0 %v6457_v29 }
  0x84   : > { %6080 = vmatmul.mubr.msk.f32.vlgmr.msra.gmra.mrb[12].mxu0 %vm746_vm0, %v1310_v32 }
  0x85   : > { %6460 = vmatpush3.bf16.msra.mxu0 %v6457_v29  ;;  %6082 = vmatprep.mubr.msk.f32.mxu0 %vm746_vm0, %v1311_v33 }
  0x86   : > { %6462 = vmatprep.subr.bf16.mxu0 %v6461_v34 }
  0x88   : > { %6083 = vmatmul.mubr.msk.f32.gmra.mrb[14].mxu0 %vm746_vm0, %v1312_v35 }
  0x89   : > { %6464 = vmatpush3.bf16.msra.mxu0 %v6461_v34  ;;  %6107 = vmatprep.mubr.msk.f32.mxu0 %vm746_vm0, %v7023_v8 }
  0x8a   : > { %6474 = vmatprep.subr.bf16.mxu0 %v6457_v29 }
  0x8c   : > { %6108 = vmatmul.mubr.msk.f32.vlgmr.msra.gmra.mrb[16].mxu0 %vm746_vm0, %v731_v13 }
  0x8d   : > { %6476 = vmatpush3.bf16.msra.mxu0 %v6457_v29  ;;  %6110 = vmatprep.mubr.msk.f32.mxu0 %vm746_vm0, %v732_v14  ;;  %v1964_v14 = vld [vmem:[%s7414_s8] sm:$0xff] }
  0x8e   : > { %6478 = vmatprep.subr.bf16.mxu0 %v6461_v34  ;;  %v7109_v16 = vpack.c.bf16 %v1965_v15, %v1964_v14 }
  0x90   : > { %6111 = vmatmul.mubr.msk.f32.gmra.mrb[18].mxu0 %vm746_vm0, %v733_v17 }
  0x91   : > { %6480 = vmatpush3.bf16.msra.mxu0 %v6461_v34  ;;  %6132 = vmatprep.mubr.msk.f32.mxu0 %vm746_vm0, %v734_v18 }
  0x94   : > { %6133 = vmatmul.mubr.msk.f32.vlgmr.msra.gmra.mrb[20].mxu0 %vm746_vm0, %v735_v19 }
  0x95   : > { %6135 = vmatprep.mubr.msk.f32.mxu0 %vm746_vm0, %v736_v20 }
  0x98   : > { %6136 = vmatmul.mubr.msk.f32.gmra.mrb[22].mxu0 %vm746_vm0, %v737_v21 }
 0x13f   : > { %v5997_v37 = vpop.f32.mrb[0].mxu0 }
 0x140   : > { %v825_v38 = vpop.f32.mrb[1].mxu0 }
 0x141   : > { %v6401_v39 = vpack.c.bf16 %v5997_v37, %v825_v38 }
 0x143   : > { %v6000_v40 = vpop.f32.mrb[2].mxu0  ;;  %6402 = vmatprep.subr.bf16.mxu1 %v6401_v39 }
 0x144   : > { %v835_v41 = vpop.f32.mrb[3].mxu0  ;;  %6404 = vmatpush3.bf16.msra.mxu1 %v6401_v39 }
 0x145   : > { %v6405_v42 = vpack.c.bf16 %v6000_v40, %v835_v41 }
 0x147   : > { %6406 = vmatprep.subr.bf16.mxu1 %v6405_v42  ;;  %v6025_v43 = vpop.f32.mrb[4].mxu0 }
 0x148   : > { %6408 = vmatpush3.bf16.msra.mxu1 %v6405_v42  ;;  %v1019_v44 = vpop.f32.mrb[5].mxu0 }
 0x149   : > { %v6417_v46 = vpack.c.bf16 %v6025_v43, %v1019_v44 }
 0x14b   : > { %6010 = vmatmul.mubr.msk.f32.vlgmr.msra.gmra.mrb[0].mxu1 %vm746_vm0, %v739_v45  ;;  %v6028_v48 = vpop.f32.mrb[6].mxu0  ;;  %6418 = vmatprep.subr.bf16.mxu1 %v6417_v46 }
 0x14c   : > { %v1029_v49 = vpop.f32.mrb[7].mxu0  ;;  %6420 = vmatpush3.bf16.msra.mxu1 %v6417_v46  ;;  %6012 = vmatprep.mubr.msk.f32.mxu1 %vm746_vm0, %v740_v47 }
 0x14d   : > { %v6421_v51 = vpack.c.bf16 %v6028_v48, %v1029_v49 }
 0x14f   : > { %6013 = vmatmul.mubr.msk.f32.gmra.mrb[2].mxu1 %vm746_vm0, %v741_v50  ;;  %6422 = vmatprep.subr.bf16.mxu1 %v6421_v51  ;;  %v6053_v52 = vpop.f32.mrb[8].mxu0 }
 0x150   : > { %6424 = vmatpush3.bf16.msra.mxu1 %v6421_v51  ;;  %v1205_v53 = vpop.f32.mrb[9].mxu0  ;;  %6037 = vmatprep.mubr.msk.f32.mxu1 %vm746_vm0, %v738_v36 }
 0x151   : > { %v6433_v54 = vpack.c.bf16 %v6053_v52, %v1205_v53 }
 0x153   : > { %6038 = vmatmul.mubr.msk.f32.vlgmr.msra.gmra.mrb[4].mxu1 %vm746_vm0, %v739_v45  ;;  %v6056_v55 = vpop.f32.mrb[10].mxu0  ;;  %6434 = vmatprep.subr.bf16.mxu1 %v6433_v54 }
 0x154   : > { %v1215_v56 = vpop.f32.mrb[11].mxu0  ;;  %6436 = vmatpush3.bf16.msra.mxu1 %v6433_v54  ;;  %6040 = vmatprep.mubr.msk.f32.mxu1 %vm746_vm0, %v740_v47 }
 0x155   : > { %v6437_v57 = vpack.c.bf16 %v6056_v55, %v1215_v56 }
 0x157   : > { %6041 = vmatmul.mubr.msk.f32.gmra.mrb[6].mxu1 %vm746_vm0, %v741_v50  ;;  %6438 = vmatprep.subr.bf16.mxu1 %v6437_v57  ;;  %v6081_v58 = vpop.f32.mrb[12].mxu0 }
 0x158   : > { %6440 = vmatpush3.bf16.msra.mxu1 %v6437_v57  ;;  %v1391_v59 = vpop.f32.mrb[13].mxu0  ;;  %6065 = vmatprep.mubr.msk.f32.mxu1 %vm746_vm0, %v738_v36 }
 0x159   : > { %v6449_v60 = vpack.c.bf16 %v6081_v58, %v1391_v59 }
 0x15b   : > { %6066 = vmatmul.mubr.msk.f32.vlgmr.msra.gmra.mrb[8].mxu1 %vm746_vm0, %v739_v45  ;;  %v6084_v61 = vpop.f32.mrb[14].mxu0  ;;  %6450 = vmatprep.subr.bf16.mxu1 %v6449_v60 }
 0x15c   : > { %v1401_v62 = vpop.f32.mrb[15].mxu0  ;;  %6452 = vmatpush3.bf16.msra.mxu1 %v6449_v60  ;;  %6068 = vmatprep.mubr.msk.f32.mxu1 %vm746_vm0, %v740_v47 }
 0x15d   : > { %v6453_v63 = vpack.c.bf16 %v6084_v61, %v1401_v62 }
 0x15f   : > { %6069 = vmatmul.mubr.msk.f32.gmra.mrb[10].mxu1 %vm746_vm0, %v741_v50  ;;  %6454 = vmatprep.subr.bf16.mxu1 %v6453_v63  ;;  %v6109_v0 = vpop.f32.mrb[16].mxu0 }
 0x160   : > { %6456 = vmatpush3.bf16.msra.mxu1 %v6453_v63  ;;  %v1702_v1 = vpop.f32.mrb[17].mxu0  ;;  %6093 = vmatprep.mubr.msk.f32.mxu1 %vm746_vm0, %v738_v36 }
 0x161   : > { %v6465_v2 = vpack.c.bf16 %v6109_v0, %v1702_v1 }
 0x163   : > { %6094 = vmatmul.mubr.msk.f32.vlgmr.msra.gmra.mrb[12].mxu1 %vm746_vm0, %v739_v45  ;;  %v6112_v3 = vpop.f32.mrb[18].mxu0  ;;  %6466 = vmatprep.subr.bf16.mxu1 %v6465_v2 }
 0x164   : > { %v1712_v4 = vpop.f32.mrb[19].mxu0  ;;  %6468 = vmatpush3.bf16.msra.mxu1 %v6465_v2  ;;  %6096 = vmatprep.mubr.msk.f32.mxu1 %vm746_vm0, %v740_v47 }
 0x165   : > { %v6469_v5 = vpack.c.bf16 %v6112_v3, %v1712_v4 }
 0x167   : > { %6097 = vmatmul.mubr.msk.f32.gmra.mrb[14].mxu1 %vm746_vm0, %v741_v50  ;;  %6470 = vmatprep.subr.bf16.mxu1 %v6469_v5  ;;  %v6134_v7 = vpop.f32.mrb[20].mxu0 }
 0x168   : > { %6472 = vmatpush3.bf16.msra.mxu1 %v6469_v5  ;;  %v1868_v8 = vpop.f32.mrb[21].mxu0  ;;  %6121 = vmatprep.mubr.msk.f32.mxu1 %vm746_vm0, %v1630_v6 }
 0x169   : > { %v6481_v10 = vpack.c.bf16 %v6134_v7, %v1868_v8 }
 0x16b   : > { %6122 = vmatmul.mubr.msk.f32.vlgmr.msra.gmra.mrb[16].mxu1 %vm746_vm0, %v1631_v9  ;;  %v6137_v11 = vpop.f32.mrb[22].mxu0  ;;  %6482 = vmatprep.subr.bf16.mxu1 %v6481_v10 }
 0x16c   : > { %v1878_v12 = vpop.f32.mrb[23].mxu0  ;;  %6484 = vmatpush3.bf16.msra.mxu1 %v6481_v10  ;;  %6146 = vmatprep.mubr.msk.f32.mxu1 %vm746_vm0, %v1630_v6 }
 0x16d   : > { %v6485_v13 = vpack.c.bf16 %v6137_v11, %v1878_v12 }
 0x16f   : > { %6486 = vmatprep.subr.bf16.mxu1 %v6485_v13 }
 0x170   : > { %6488 = vmatpush3.bf16.msra.mxu1 %v6485_v13 }
 0x171   : > { %6490 = vmatprep.subr.bf16.mxu1 %v7109_v16 }
 0x173   : > { %6147 = vmatmul.mubr.msk.f32.vlgmr.msra.gmra.mrb[18].mxu1 %vm746_vm0, %v1631_v9 }
 0x174   : > { %6492 = vmatpush3.bf16.msra.mxu1 %v7109_v16 }
 0x175   : > { %6498 = vmatprep.subr.bf16.mxu1 %v7109_v16 }
 0x21e   : > { %v6011_v17 = vpop.f32.mrb[0].mxu1 }
 0x21f   : > { %v922_v18 = vpop.f32.mrb[1].mxu1  ;;  %v1496_v22 = vmul.f32 %v6011_v17, %v6011_v17 }
 0x220   : > { %v1495_v25 = vmul.f32 %v922_v18, %v922_v18 }
 0x222   : > { %v6014_v19 = vpop.f32.mrb[2].mxu1 }
 0x223   : > { %v932_v20 = vpop.f32.mrb[3].mxu1  ;;  %v1498_v32 = vmul.f32 %v6014_v19, %v6014_v19 }
 0x224   : > { %v1497_v35 = vmul.f32 %v932_v20, %v932_v20 }
 0x226   : > { %v6039_v21 = vpop.f32.mrb[4].mxu1 }
 0x227   : > { %v1500_v23 = vmul.f32 %v6039_v21, %v6039_v21  ;;  %v1104_v24 = vpop.f32.mrb[5].mxu1 }
 0x228   : > { %v1499_v26 = vmul.f32 %v1104_v24, %v1104_v24 }
 0x229   : > { %v1504_v27 = vsub.f32 %v1496_v22, %v1500_v23  ;;  %v1512_v28 = vadd.f32 %v1500_v23, %v1496_v22 }
 0x22a   : > { %v1503_v29 = vsub.f32 %v1495_v25, %v1499_v26  ;;  %v1511_v30 = vadd.f32 %v1499_v26, %v1495_v25  ;;  %v6042_v31 = vpop.f32.mrb[6].mxu1 }
 0x22b   : > { %v1502_v33 = vmul.f32 %v6042_v31, %v6042_v31  ;;  %v1114_v34 = vpop.f32.mrb[7].mxu1  ;;  %v1508_v43 = vmul.f32 0.25, %v1504_v27  ;;  %v1516_v46 = vmul.f32 0.5, %v1512_v28 }
 0x22c   : > { %v1501_v36 = vmul.f32 %v1114_v34, %v1114_v34  ;;  %v1507_v44 = vmul.f32 0.25, %v1503_v29  ;;  %v1515_v47 = vmul.f32 0.5, %v1511_v30 }
 0x22d   : > { %v1506_v37 = vsub.f32 %v1498_v32, %v1502_v33  ;;  %v1514_v38 = vadd.f32 %v1502_v33, %v1498_v32  ;;  %v1556_v49 = vmul.f32 2.0, %v1508_v43  ;;  %v1568_v55 = vadd.f32 6.5025, %v1516_v46 }
 0x22e   : > { %v1505_v39 = vsub.f32 %v1497_v35, %v1501_v36  ;;  %v1513_v40 = vadd.f32 %v1501_v36, %v1497_v35  ;;  %v6067_v41 = vpop.f32.mrb[8].mxu1  ;;  %v1555_v50 = vmul.f32 2.0, %v1507_v44  ;;  %v1567_v56 = vadd.f32 6.5025, %v1515_v47 }
 0x22f   : > { %v1290_v42 = vpop.f32.mrb[9].mxu1  ;;  %v1510_v51 = vmul.f32 0.25, %v1506_v37  ;;  %v1518_v52 = vmul.f32 0.5, %v1514_v38  ;;  %v1560_v60 = vadd.f32 6.5025, %v1556_v49 }
 0x230   : > { %v1509_v53 = vmul.f32 0.25, %v1505_v39  ;;  %v1559_v61 = vadd.f32 6.5025, %v1555_v50  ;;  %v1517_v1 = vmul.f32 0.5, %v1513_v40 }
 0x231   : > { %v1558_v0 = vmul.f32 2.0, %v1510_v51  ;;  %v1570_v4 = vadd.f32 6.5025, %v1518_v52 }
 0x232   : > { %v6070_v45 = vpop.f32.mrb[10].mxu1  ;;  %v1557_v5 = vmul.f32 2.0, %v1509_v53 }
 0x233   : > { %v1300_v48 = vpop.f32.mrb[11].mxu1 }
 0x236   : > { %v6095_v54 = vpop.f32.mrb[12].mxu1 }
 0x237   : > { %v1520_v57 = vsub.f32 %v6067_v41, %v6095_v54  ;;  %v1532_v58 = vadd.f32 %v6095_v54, %v6067_v41  ;;  %v1476_v59 = vpop.f32.mrb[13].mxu1  ;;  %v1562_v41 = vadd.f32 6.5025, %v1558_v0 }
 0x238   : > { %v1519_v62 = vsub.f32 %v1290_v42, %v1476_v59  ;;  %v1531_v63 = vadd.f32 %v1476_v59, %v1290_v42 }
 0x239   : > { %v1524_v2 = vmul.f32 0.25, %v1520_v57  ;;  %v1536_v3 = vmul.f32 0.5, %v1532_v58 }
 0x23a   : > { %v1523_v6 = vmul.f32 0.25, %v1519_v62  ;;  %v1535_v7 = vmul.f32 0.5, %v1531_v63  ;;  %v6098_v8 = vpop.f32.mrb[14].mxu1 }
 0x23b   : > { %v1528_v9 = vsub.f32 %v1524_v2, %v1508_v43  ;;  %v1540_v10 = vsub.f32 %v1536_v3, %v1516_v46  ;;  %v1522_v11 = vsub.f32 %v6070_v45, %v6098_v8  ;;  %v1534_v12 = vadd.f32 %v6098_v8, %v6070_v45  ;;  %v1486_v13 = vpop.f32.mrb[15].mxu1 }
 0x23c   : > { %v1527_v14 = vsub.f32 %v1523_v6, %v1507_v44  ;;  %v1539_v15 = vsub.f32 %v1535_v7, %v1515_v47  ;;  %v1521_v17 = vsub.f32 %v1300_v48, %v1486_v13  ;;  %v1533_v18 = vadd.f32 %v1486_v13, %v1300_v48 }
 0x23d   : > { %v1544_v19 = vmul.f32 2.0, %v1528_v9  ;;  %v1552_v20 = vadd.f32 58.5225, %v1540_v10  ;;  %v1526_v21 = vmul.f32 0.25, %v1522_v11  ;;  %v1538_v22 = vmul.f32 0.5, %v1534_v12 }
 0x23e   : > { %v1543_v23 = vmul.f32 2.0, %v1527_v14  ;;  %v1551_v24 = vadd.f32 58.5225, %v1539_v15  ;;  %v1525_v25 = vmul.f32 0.25, %v1521_v17  ;;  %v1537_v26 = vmul.f32 0.5, %v1533_v18  ;;  %v7114_v27 = vpop.f32.mrb[16].mxu1 }
 0x23f   : > { %v1548_v28 = vadd.f32 58.5225, %v1544_v19  ;;  %v1572_v29 = vmul.f32 %v1568_v55, %v1552_v20  ;;  %6604 = vrcp.f32 %v1552_v20  ;;  %v1530_v30 = vsub.f32 %v1526_v21, %v1510_v51  ;;  %v7116_v31 = vpop.f32.mrb[17].mxu1  ;;  %v2681_v55 = vld [vmem:[%s7423_s17] sm:$0xff] }
 0x240   : > { %v1547_v32 = vadd.f32 58.5225, %v1543_v23  ;;  %v1571_v33 = vmul.f32 %v1567_v56, %v1551_v24  ;;  %6606 = vrcp.f32 %v1551_v24  ;;  %v1542_v34 = vsub.f32 %v1538_v22, %v1518_v52  ;;  %6153 = vmatprep.mubr.msk.f32.mxu1 %vm1966_vm1, %v7116_v31  ;;  %v2682_v56 = vld [vmem:[%s7423_s17 + $0x8] sm:$0xff] }
 0x241   : > { %v1564_v35 = vmul.f32 %v1560_v60, %v1548_v28  ;;  %6608 = vrcp.f32 %v1572_v29  ;;  %v1546_v36 = vmul.f32 2.0, %v1530_v30  ;;  %v1529_v37 = vsub.f32 %v1525_v25, %v1509_v53  ;;  %6154 = vmatmul.mubr.msk.f32.vlgmr.msra.gmra.mrb[20].mxu1 %vm1966_vm1, %v7114_v27 }
 0x242   : > { %v1563_v38 = vmul.f32 %v1559_v61, %v1547_v32  ;;  %6610 = vrcp.f32 %v1571_v33  ;;  %v1554_v39 = vadd.f32 58.5225, %v1542_v34  ;;  %v1541_v40 = vsub.f32 %v1537_v26, %v1517_v1  ;;  %6500 = vmatpush3.bf16.msra.mxu1 %v7109_v16 }
 0x243   : > { %v1545_v42 = vmul.f32 2.0, %v1529_v37  ;;  %6506 = vmatprep.subr.bf16.mxu1 %v7109_v16  ;;  %v1550_v43 = vadd.f32 58.5225, %v1546_v36  ;;  %v1569_v44 = vadd.f32 6.5025, %v1517_v1  ;;  %v2285_v54 = vmul.f32 %v7116_v31, %v7116_v31 }
 0x244   : > { %v1574_v45 = vmul.f32 %v1570_v4, %v1554_v39  ;;  %6612 = vrcp.f32 %v1554_v39  ;;  %v1553_v46 = vadd.f32 58.5225, %v1541_v40  ;;  %v1561_v47 = vadd.f32 6.5025, %v1557_v5 }
 0x245   : > { %v1549_v48 = vadd.f32 58.5225, %v1545_v42  ;;  %v1566_v49 = vmul.f32 %v1562_v41, %v1550_v43  ;;  %v2286_v61 = vmul.f32 %v7114_v27, %v7114_v27  ;;  %v6521_v62 = vpack.c.bf16 %v2682_v56, %v2681_v55 }
 0x246   : > { %6614 = vrcp.f32 %v1574_v45  ;;  %v1573_v50 = vmul.f32 %v1569_v44, %v1553_v46  ;;  %v6148_v51 = vpop.f32.mrb[18].mxu1 }
 0x247   : > { %v1565_v52 = vmul.f32 %v1561_v47, %v1549_v48  ;;  %6616 = vrcp.f32 %v1553_v46  ;;  %v1953_v53 = vpop.f32.mrb[19].mxu1  ;;  %v2444_v9 = vmul.f32 %v6148_v51, %v6148_v51  ;;  %v1963_v46 = vld [vmem:[%s7466_s15 + $0x8] sm:$0xff] }
 0x248   : > { %6618 = vrcp.f32 %v1573_v50  ;;  %6167 = vmatprep.mubr.msk.f32.mxu1 %vm1966_vm1, %v1953_v53  ;;  %v2443_v1 = vmul.f32 %v1953_v53, %v1953_v53 }
 0x249   : > { %v6605_v57 = vpop.eup %6604  ;;  %6168 = vmatmul.mubr.msk.f32.vlgmr.msra.gmra.mrb[22].mxu1 %vm1966_vm1, %v6148_v51 }
 0x24a   : > { %v6607_v58 = vpop.eup %6606  ;;  %6508 = vmatpush3.bf16.msra.mxu1 %v7109_v16  ;;  %6181 = vmatprep.mubr.msk.f32.mxu1 %vm1966_vm1, %v2285_v54  ;;  %v1586_v59 = vmul.f32 %v6605_v57, %v1548_v28  ;;  %v6748_v28 = vmov 0.0  }
 0x24b   : > { %v6609_v60 = vpop.eup %6608  ;;  %6514 = vmatprep.subr.bf16.mxu1 %v7109_v16  ;;  %v1584_v63 = vmul.f32 %v6607_v58, %v1547_v32 }
 0x24c   : > { %v6611_v0 = vpop.eup %6610  ;;  %v1612_v2 = vsel %vm746_vm0, %v1586_v59, 0.0  ;;  %v1578_v3 = vmul.f32 %v6609_v60, %v1564_v35  ;;  %v6750_v59 = vmov 0.0|0.0  }
 0x24d   : > { %6182 = vmatmul.mubr.msk.f32.vlgmr.msra.gmra.mrb[24].mxu1 %vm1966_vm1, %v2286_v61  ;;  %v1611_v4 = vsel %vm746_vm0, %v1584_v63, 0.0  ;;  %v1576_v5 = vmul.f32 %v6611_v0, %v1563_v38  ;;  %v2680_v0 = vld [vmem:[%s7419_s13] sm:$0xff] }
 0x24e   : > { %v6613_v6 = vpop.eup %6612  ;;  %6516 = vmatpush3.bf16.msra.mxu1 %v7109_v16  ;;  %6195 = vmatprep.mubr.msk.f32.mxu1 %vm1966_vm1, %v2443_v1  ;;  %v1613_v7 = vadd.f32 %v1612_v2, %v1611_v4  ;;  %v1592_v8 = vsel %vm746_vm0, %v1578_v3, 0.0  ;;  %v7200_v2 = vld [vmem:[%s7415_s9] sm:$0xff] }
 0x24f   : > { %6522 = vmatprep.subr.bf16.mxu1 %v6521_v62  ;;  %v1590_v10 = vmul.f32 %v6613_v6, %v1550_v43  ;;  %v1591_v11 = vsel %vm746_vm0, %v1576_v5, 0.0 }
 0x250   : > { %v6615_v12 = vpop.eup %6614  ;;  %v1593_v13 = vadd.f32 %v1592_v8, %v1591_v11 }
 0x251   : > { %v6617_v14 = vpop.eup %6616  ;;  %6196 = vmatmul.mubr.msk.f32.vlgmr.msra.gmra.mrb[26].mxu1 %vm1966_vm1, %v2444_v9  ;;  %v1582_v15 = vmul.f32 %v6615_v12, %v1566_v49  ;;  %v1616_v22 = vsel %vm746_vm0, %v1590_v10, 0.0 }
 0x252   : > { %v6619_v17 = vpop.eup %6618  ;;  %6524 = vmatpush3.bf16.msra.mxu1 %v6521_v62  ;;  %6209 = vmatprep.mubr.msk.f32.mxu1 %vm1966_vm1, %v7116_v31  ;;  %v1588_v16 = vmul.f32 %v6617_v14, %v1549_v48 }
 0x253   : > { %6529 = vmatprep.subr.bf16.mxu1 %v6521_v62  ;;  %v1580_v18 = vmul.f32 %v6619_v17, %v1565_v52  ;;  %v1596_v25 = vsel %vm746_vm0, %v1582_v15, 0.0 }
 0x254   : > { %v1614_v19 = vsel %vm746_vm0, %v1588_v16, 0.0 }
 0x255   : > { %6210 = vmatmul.mubr.msk.f32.vlgmr.msra.gmra.mrb[28].mxu1 %vm1966_vm1, %v7114_v27  ;;  %v1615_v20 = vadd.f32 %v1614_v19, %v1613_v7  ;;  %v1594_v21 = vsel %vm746_vm0, %v1580_v18, 0.0  ;;  %v1962_v27 = vld [vmem:[%s7466_s15] sm:$0xff]  ;;  %vm5521_vm0 = vcmask 32800  }
 0x256   : > { %6531 = vmatpush3.bf16.msra.mxu1 %v6521_v62  ;;  %6223 = vmatprep.mubr.msk.f32.mxu1 %vm1966_vm1, %v1953_v53  ;;  %v1595_v23 = vadd.f32 %v1594_v21, %v1593_v13 }
 0x257   : > { %v1617_v24 = vadd.f32 %v1616_v22, %v1615_v20  ;;  %6160 = vmatprep.mubr.msk.f32.mxu0 %vm1966_vm1, %v1962_v27  ;;  %6233 = vmatprep.subr.mxu1 %v6748_v28 }
 0x258   : > { %v1597_v26 = vadd.f32 %v1596_v25, %v1595_v23 }
 0x259   : > { %1618 = vadd.xlane.f32.xlu0 %v1617_v24  ;;  %6224 = vmatmul.mubr.msk.f32.vlgmr.msra.gmra.mrb[30].mxu1 %vm1966_vm1, %v6148_v51 }
 0x25a   : > { %6235 = vmatprep.mubr.msk.f32.mxu1 %vm6749_vm2, %v6748_v28  ;;  %6234 = vmatpush3.msra.mxu1 %v7200_v2 }
 0x25b   : > { %6243 = vmatprep.subr.mxu1 %v6748_v28 }
 0x25d   : > { %1598 = vadd.xlane.f32.xlu0 %v1597_v26 }
 0x2e6   : > { %v1619_v29 = vpop.xlane.xlu0 %1618 }
 0x2e7   : > { %v1620_v30 = vrot.slane %v1619_v29, 4 }
 0x2e9   : > { %v1621_v31 = vadd.f32 %v1620_v30, %v1619_v29 }
 0x2ea   : > { %v1599_v32 = vpop.xlane.xlu0 %1598 }
 0x2eb   : > { %v1622_v33 = vrot.slane %v1621_v31, 2  ;;  %v1600_v34 = vrot.slane %v1599_v32, 4 }
 0x2ed   : > { %v1601_v35 = vadd.f32 %v1600_v34, %v1599_v32  ;;  %v1623_v36 = vadd.f32 %v1622_v33, %v1621_v31 }
 0x2ef   : > { %v1602_v37 = vrot.slane %v1601_v35, 2  ;;  %v1624_v39 = vrot.slane %v1623_v36, 1 }
 0x2f1   : > { %v1603_v38 = vadd.f32 %v1602_v37, %v1601_v35  ;;  %v1625_v42 = vadd.f32 %v1624_v39, %v1623_v36 }
 0x2f3   : > { %v1604_v40 = vrot.slane %v1603_v38, 1 }
 0x2f5   : > { %v1605_v41 = vadd.f32 %v1604_v40, %v1603_v38 }
 0x2f7   : > { %6535 = vpush %v1605_v41 }
 0x2f8   : > { %6537 = vpush %v1625_v42 }
 0x314   : > { %v6155_v43 = vpop.f32.mrb[20].mxu1 }
 0x315   : > { %v2039_v44 = vpop.f32.mrb[21].mxu1 }
 0x316   : > { %v6493_v45 = vpack.c.bf16 %v6155_v43, %v2039_v44 }
 0x318   : > { %6494 = vmatprep.subr.bf16.mxu0 %v6493_v45 }
 0x319   : > { %6496 = vmatpush3.bf16.msra.mxu0 %v6493_v45 }
 0x31c   : > { %v6169_v47 = vpop.f32.mrb[22].mxu1  ;;  %6161 = vmatmul.mubr.msk.f32.vlgmr.msra.gmra.mrb[24].mxu0 %vm1966_vm1, %v1963_v46 }
 0x31d   : > { %v2201_v48 = vpop.f32.mrb[23].mxu1  ;;  %6174 = vmatprep.mubr.msk.f32.mxu0 %vm1966_vm1, %v1962_v27 }
 0x31e   : > { %v6501_v49 = vpack.c.bf16 %v6169_v47, %v2201_v48 }
 0x320   : > { %6502 = vmatprep.subr.bf16.mxu0 %v6501_v49  ;;  %v6183_v50 = vpop.f32.mrb[24].mxu1 }
 0x321   : > { %6504 = vmatpush3.bf16.msra.mxu0 %v6501_v49  ;;  %v2359_v51 = vpop.f32.mrb[25].mxu1 }
 0x322   : > { %v6509_v52 = vpack.c.bf16 %v6183_v50, %v2359_v51 }
 0x324   : > { %6175 = vmatmul.mubr.msk.f32.vlgmr.msra.gmra.mrb[26].mxu0 %vm1966_vm1, %v1963_v46  ;;  %6510 = vmatprep.subr.bf16.mxu0 %v6509_v52  ;;  %v6197_v53 = vpop.f32.mrb[26].mxu1 }
 0x325   : > { %6512 = vmatpush3.bf16.msra.mxu0 %v6509_v52  ;;  %v2517_v54 = vpop.f32.mrb[27].mxu1  ;;  %6188 = vmatprep.mubr.msk.f32.mxu0 %vm1966_vm1, %v1962_v27 }
 0x326   : > { %v6517_v55 = vpack.c.bf16 %v6197_v53, %v2517_v54 }
 0x328   : > { %s6536_s2 = spop %6535  ;;  %6189 = vmatmul.mubr.msk.f32.vlgmr.msra.gmra.mrb[28].mxu0 %vm1966_vm1, %v1963_v46  ;;  %6518 = vmatprep.subr.bf16.mxu0 %v6517_v55  ;;  %v6211_v56 = vpop.f32.mrb[28].mxu1 }
 0x329   : > { %s1607_s24 = smul.f32 0.0009765625, %s6536_s2  ;;  %s6538_s4 = spop %6537  ;;  %6520 = vmatpush3.bf16.msra.mxu0 %v6517_v55  ;;  %v2749_v57 = vpop.f32.mrb[29].mxu1  ;;  %6202 = vmatprep.mubr.msk.f32.mxu0 %vm1966_vm1, %v1962_v27 }
 0x32a   : > { %s1627_s29 = smul.f32 0.0009765625, %s6538_s4  ;;  %v6526_v58 = vpack.c.bf16 %v6211_v56, %v2749_v57  ;;  %6525 = vmatprep.subr.bf16.mxu0 %v6750_v59  ;;  %s7467_s2 = sld [smem:[#allocation15_spill]] }
 0x32b   : > { %v1608_v60 = vstv %s1607_s24  ;;  %s7470_s4 = sld [smem:[#allocation21_spill]] }
 0x32c   : > { %1610 = vst.msk [vmem:[%s7176_s0] sm:$0x1] %vm1609_vm3, %v1608_v60  ;;  %v1628_v61 = vstv %s1627_s29  ;;  %6203 = vmatmul.mubr.msk.f32.vlgmr.msra.gmra.mrb[30].mxu0 %vm1966_vm1, %v1963_v46  ;;  %v6225_v62 = vpop.f32.mrb[30].mxu1  ;;  %s7471_s29 = sld [smem:[#allocation16_spill]] }
 0x32d   : > { %1629 = vst.msk [vmem:[%s7183_s10] sm:$0x1] %vm1609_vm3, %v1628_v61  ;;  %6527 = vmatpush3.bf16.msra.mxu0 %v6526_v58  ;;  %v2897_v63 = vpop.f32.mrb[31].mxu1  ;;  %6216 = vmatprep.mubr.msk.f32.mxu0 %vm6749_vm2, %v6748_v28  ;;  %v3662_v58 = vld [vmem:[%s7424_s18] sm:$0xff] }
 0x32e   : > { %v6533_v1 = vpack.c.bf16 %v6225_v62, %v2897_v63  ;;  %6532 = vmatprep.subr.bf16.mxu0 %v6750_v59 }
 0x330   : > { %6217 = vmatmul.mubr.msk.f32.vlgmr.msra.gmra.mrb[32].mxu0 %vm1966_vm1, %v2680_v0  ;;  %s7468_s24 = smov %s7467_s2 }
 0x331   : > { %6534 = vmatpush3.bf16.msra.mxu0 %v6533_v1  ;;  %6230 = vmatprep.mubr.msk.f32.mxu0 %vm6749_vm2, %v6748_v28 }
 0x334   : > { %6231 = vmatmul.mubr.msk.f32.vlgmr.msra.gmra.mrb[34].mxu0 %vm1966_vm1, %v2680_v0 }
 0x3ef   : > { %v6162_v3 = vpop.f32.mrb[24].mxu0 }
 0x3f0   : > { %v2120_v4 = vpop.f32.mrb[25].mxu0  ;;  %v2602_v6 = vmul.f32 %v6162_v3, %v6162_v3 }
 0x3f1   : > { %v2601_v9 = vmul.f32 %v2120_v4, %v2120_v4 }
 0x3f7   : > { %v6176_v5 = vpop.f32.mrb[26].mxu0 }
 0x3f8   : > { %v2604_v7 = vmul.f32 %v6176_v5, %v6176_v5  ;;  %v2276_v8 = vpop.f32.mrb[27].mxu0 }
 0x3f9   : > { %v2603_v10 = vmul.f32 %v2276_v8, %v2276_v8 }
 0x3fa   : > { %v2606_v11 = vsub.f32 %v2602_v6, %v2604_v7  ;;  %v2610_v12 = vadd.f32 %v2604_v7, %v2602_v6 }
 0x3fb   : > { %v2605_v13 = vsub.f32 %v2601_v9, %v2603_v10  ;;  %v2609_v14 = vadd.f32 %v2603_v10, %v2601_v9  ;;  %v6190_v15 = vpop.f32.mrb[28].mxu0  ;;  %v2976_v9 = vld [vmem:[%s7467_s2] sm:$0xff] }
 0x3fc   : > { %v2434_v17 = vpop.f32.mrb[29].mxu0  ;;  %v2608_v18 = vmul.f32 0.25, %v2606_v11  ;;  %v2612_v25 = vmul.f32 0.5, %v2610_v12  ;;  %6240 = vmatprep.mubr.msk.f32.mxu0 %vm2979_vm4, %v2976_v9 }
 0x3fd   : > { %v2607_v22 = vmul.f32 0.25, %v2605_v13  ;;  %v2611_v29 = vmul.f32 0.5, %v2609_v14 }
 0x3fe   : > { %v2632_v33 = vmul.f32 2.0, %v2608_v18  ;;  %v2638_v40 = vadd.f32 6.5025, %v2612_v25 }
 0x3ff   : > { %v6204_v16 = vpop.f32.mrb[30].mxu0  ;;  %v2631_v37 = vmul.f32 2.0, %v2607_v22  ;;  %v2637_v43 = vadd.f32 6.5025, %v2611_v29 }
 0x400   : > { %v2614_v19 = vsub.f32 %v6190_v15, %v6204_v16  ;;  %v2620_v20 = vadd.f32 %v6204_v16, %v6190_v15  ;;  %v2592_v21 = vpop.f32.mrb[31].mxu0  ;;  %v2634_v47 = vadd.f32 6.5025, %v2632_v33 }
 0x401   : > { %v2613_v23 = vsub.f32 %v2434_v17, %v2592_v21  ;;  %v2619_v24 = vadd.f32 %v2592_v21, %v2434_v17  ;;  %v2633_v51 = vadd.f32 6.5025, %v2631_v37 }
 0x402   : > { %v2616_v26 = vmul.f32 0.25, %v2614_v19  ;;  %v2622_v27 = vmul.f32 0.5, %v2620_v20 }
 0x403   : > { %v2615_v30 = vmul.f32 0.25, %v2613_v23  ;;  %v2621_v31 = vmul.f32 0.5, %v2619_v24  ;;  %v2827_v32 = vpop.f32.mrb[32].mxu0 }
 0x404   : > { %v2618_v34 = vsub.f32 %v2616_v26, %v2608_v18  ;;  %v2624_v35 = vsub.f32 %v2622_v27, %v2612_v25  ;;  %v6218_v36 = vpop.f32.mrb[33].mxu0  ;;  %6236 = vmatmul.mubr.msk.f32.vlgmr.msra.gmra.mrb[32].mxu1 %vm2979_vm4, %v2827_v32  ;;  %v3282_v54 = vmul.f32 %v2827_v32, %v2827_v32  ;;  %v2977_v25 = vld [vmem:[%s7468_s24 + $0x8] sm:$0x1] }
 0x405   : > { %v2617_v38 = vsub.f32 %v2615_v30, %v2607_v22  ;;  %v2623_v39 = vsub.f32 %v2621_v31, %v2611_v29  ;;  %6244 = vmatpush3.msra.mxu1 %v7200_v2  ;;  %6245 = vmatprep.mubr.msk.f32.mxu1 %vm6749_vm2, %v6748_v28 }
 0x406   : > { %v2626_v41 = vmul.f32 2.0, %v2618_v34  ;;  %v2630_v42 = vadd.f32 58.5225, %v2624_v35  ;;  %6253 = vmatprep.subr.mxu1 %v6748_v28  ;;  %v3661_v35 = vld [vmem:[%s7420_s14] sm:$0xf] }
 0x407   : > { %v2625_v44 = vmul.f32 2.0, %v2617_v38  ;;  %v2629_v45 = vadd.f32 58.5225, %v2623_v39  ;;  %v2972_v46 = vpop.f32.mrb[34].mxu0 }
 0x408   : > { %v2640_v48 = vmul.f32 %v2638_v40, %v2630_v42  ;;  %6620 = vrcp.f32 %v2630_v42  ;;  %v6232_v49 = vpop.f32.mrb[35].mxu0  ;;  %6246 = vmatmul.mubr.msk.f32.vlgmr.msra.gmra.mrb[34].mxu1 %vm2979_vm4, %v2972_v46  ;;  %v2628_v50 = vadd.f32 58.5225, %v2626_v41  ;;  %v3431_v57 = vmul.f32 %v2972_v46, %v2972_v46  ;;  %v7270_v41 = vld [vmem:[%s7469_s27] sm:$0xf] }
 0x409   : > { %v2639_v52 = vmul.f32 %v2637_v43, %v2629_v45  ;;  %6622 = vrcp.f32 %v2629_v45  ;;  %6254 = vmatpush3.msra.mxu1 %v7200_v2  ;;  %6255 = vmatprep.mubr.msk.f32.mxu1 %vm6749_vm2, %v6748_v28  ;;  %v2627_v53 = vadd.f32 58.5225, %v2625_v44 }
 0x40a   : > { %6624 = vrcp.f32 %v2640_v48  ;;  %6263 = vmatprep.subr.mxu1 %v6748_v28  ;;  %v2636_v55 = vmul.f32 %v2634_v47, %v2628_v50 }
 0x40b   : > { %6626 = vrcp.f32 %v2639_v52  ;;  %v2635_v56 = vmul.f32 %v2633_v51, %v2627_v53 }
 0x40c   : > { %6256 = vmatmul.mubr.msk.f32.vlgmr.msra.gmra.mrb[36].mxu1 %vm2979_vm4, %v3282_v54 }
 0x40d   : > { %6264 = vmatpush3.msra.mxu1 %v7200_v2  ;;  %6265 = vmatprep.mubr.msk.f32.mxu1 %vm6749_vm2, %v6748_v28 }
 0x40e   : > { %6273 = vmatprep.subr.mxu1 %v6748_v28 }
 0x410   : > { %6266 = vmatmul.mubr.msk.f32.vlgmr.msra.gmra.mrb[38].mxu1 %vm2979_vm4, %v3431_v57 }
 0x411   : > { %6274 = vmatpush3.msra.mxu1 %v3662_v58  ;;  %6275 = vmatprep.mubr.msk.f32.mxu1 %vm6749_vm2, %v6748_v28 }
 0x412   : > { %v6621_v59 = vpop.eup %6620  ;;  %6283 = vmatprep.subr.mxu1 %v6748_v28 }
 0x413   : > { %v6623_v60 = vpop.eup %6622  ;;  %v2648_v61 = vmul.f32 %v6621_v59, %v2628_v50 }
 0x414   : > { %v6625_v62 = vpop.eup %6624  ;;  %6276 = vmatmul.mubr.msk.f32.vlgmr.msra.gmra.mrb[40].mxu1 %vm2979_vm4, %v2827_v32  ;;  %v2646_v63 = vmul.f32 %v6623_v60, %v2627_v53 }
 0x415   : > { %v6627_v0 = vpop.eup %6626  ;;  %6284 = vmatpush3.msra.mxu1 %v3662_v58  ;;  %6285 = vmatprep.mubr.msk.f32.mxu1 %vm6749_vm2, %v6748_v28  ;;  %v2666_v1 = vsel %vm1966_vm1, %v2648_v61, 0.0  ;;  %v2644_v2 = vmul.f32 %v6625_v62, %v2636_v55 }
 0x416   : > { %v2665_v3 = vsel %vm1966_vm1, %v2646_v63, 0.0  ;;  %v2642_v4 = vmul.f32 %v6627_v0, %v2635_v56  ;;  %6293 = vmatprep.subr.mxu1 %v6748_v28 }
 0x417   : > { %v2667_v5 = vadd.f32 %v2666_v1, %v2665_v3  ;;  %v2650_v6 = vsel %vm1966_vm1, %v2644_v2, 0.0 }
 0x418   : > { %6286 = vmatmul.mubr.msk.f32.vlgmr.msra.gmra.mrb[42].mxu1 %vm2979_vm4, %v2972_v46  ;;  %v2649_v7 = vsel %vm1966_vm1, %v2642_v4, 0.0 }
 0x419   : > { %2668 = vadd.xlane.f32.xlu1 %v2667_v5  ;;  %v2651_v8 = vadd.f32 %v2650_v6, %v2649_v7  ;;  %6295 = vmatprep.mubr.msk.f32.mxu1 %vm6749_vm2, %v6748_v28 }
 0x41a   : > { %6294 = vmatpush3.msk.msra.mxu1 %vm3952_vm6, %v7270_v41 }
 0x41b   : > { %6303 = vmatprep.subr.mxu1 %v6748_v28 }
 0x41d   : > { %2652 = vadd.xlane.f32.xlu1 %v2651_v8 }
 0x4a6   : > { %v2669_v10 = vpop.xlane.xlu1 %2668 }
 0x4a7   : > { %v2670_v11 = vrot.slane %v2669_v10, 4 }
 0x4a9   : > { %v2671_v12 = vadd.f32 %v2670_v11, %v2669_v10 }
 0x4aa   : > { %v2653_v13 = vpop.xlane.xlu1 %2652 }
 0x4ab   : > { %v2672_v14 = vrot.slane %v2671_v12, 2  ;;  %v2654_v15 = vrot.slane %v2653_v13, 4 }
 0x4ad   : > { %v2655_v17 = vadd.f32 %v2654_v15, %v2653_v13  ;;  %v2673_v16 = vadd.f32 %v2672_v14, %v2671_v12 }
 0x4af   : > { %v2656_v18 = vrot.slane %v2655_v17, 2  ;;  %v2674_v20 = vrot.slane %v2673_v16, 1 }
 0x4b1   : > { %v2657_v19 = vadd.f32 %v2656_v18, %v2655_v17  ;;  %v2675_v23 = vadd.f32 %v2674_v20, %v2673_v16 }
 0x4b3   : > { %v2658_v21 = vrot.slane %v2657_v19, 1 }
 0x4b5   : > { %v2659_v22 = vadd.f32 %v2658_v21, %v2657_v19 }
 0x4b7   : > { %6539 = vpush %v2659_v22 }
 0x4b8   : > { %6541 = vpush %v2675_v23 }
 0x4d7   : > { %v3049_v24 = vpop.f32.mrb[32].mxu1 }
 0x4d8   : > { %v6237_v26 = vpop.f32.mrb[33].mxu1  ;;  %6238 = vmatprep.subr.mxu0 %v3049_v24 }
 0x4d9   : > { %6239 = vmatpush3.msra.mxu0 %v3049_v24 }
 0x4da   : > { %6241 = vmatmul.mubr.msk.f32.vlgmr.msra.gmra.mrb[36].mxu0 %vm2979_vm4, %v2977_v25 }
 0x4db   : > { %v3203_v27 = vpop.f32.mrb[34].mxu1  ;;  %6250 = vmatprep.mubr.msk.f32.mxu0 %vm2979_vm4, %v2976_v9 }
 0x4dc   : > { %v6247_v29 = vpop.f32.mrb[35].mxu1  ;;  %6248 = vmatprep.subr.mxu0 %v3203_v27 }
 0x4dd   : > { %6249 = vmatpush3.msra.mxu0 %v3203_v27 }
 0x4de   : > { %6251 = vmatmul.mubr.msk.f32.vlgmr.msra.gmra.mrb[38].mxu0 %vm2979_vm4, %v2977_v25 }
 0x4df   : > { %v3352_v30 = vpop.f32.mrb[36].mxu1  ;;  %6260 = vmatprep.mubr.msk.f32.mxu0 %vm2979_vm4, %v2976_v9 }
 0x4e0   : > { %v6257_v31 = vpop.f32.mrb[37].mxu1  ;;  %6258 = vmatprep.subr.mxu0 %v3352_v30 }
 0x4e1   : > { %6259 = vmatpush3.msra.mxu0 %v3352_v30 }
 0x4e2   : > { %6261 = vmatmul.mubr.msk.f32.vlgmr.msra.gmra.mrb[40].mxu0 %vm2979_vm4, %v2977_v25 }
 0x4e3   : > { %v3501_v32 = vpop.f32.mrb[38].mxu1  ;;  %6270 = vmatprep.mubr.msk.f32.mxu0 %vm2979_vm4, %v2976_v9 }
 0x4e4   : > { %v6267_v33 = vpop.f32.mrb[39].mxu1  ;;  %6268 = vmatprep.subr.mxu0 %v3501_v32 }
 0x4e5   : > { %6269 = vmatpush3.msra.mxu0 %v3501_v32  ;;  %v4595_v33 = vld [vmem:[%s7470_s4] sm:$0xf]  ;;  %s7473_s4 = sld [smem:[#allocation19_spill]] }
 0x4e6   : > { %6271 = vmatmul.mubr.msk.f32.vlgmr.msra.gmra.mrb[42].mxu0 %vm2979_vm4, %v2977_v25  ;;  %6278 = vmatprep.subr.mxu0 %v6748_v28 }
 0x4e7   : > { %v3729_v34 = vpop.f32.mrb[40].mxu1  ;;  %6280 = vmatprep.mubr.msk.f32.mxu0 %vm6749_vm2, %v6748_v28 }
 0x4e8   : > { %s6540_s23 = spop %6539  ;;  %v6277_v36 = vpop.f32.mrb[41].mxu1  ;;  %6279 = vmatpush3.msra.mxu0 %v3729_v34 }
 0x4e9   : > { %s2661_s3 = smul.f32 0.00390625, %s6540_s23  ;;  %s6542_s1 = spop %6541  ;;  %6288 = vmatprep.subr.mxu0 %v6748_v28 }
 0x4ea   : > { %s2677_s28 = smul.f32 0.00390625, %s6542_s1  ;;  %6281 = vmatmul.mubr.msk.f32.vlgmr.msra.gmra.mrb[44].mxu0 %vm2979_vm4, %v3661_v35 }
 0x4eb   : > { %v2662_v37 = vstv %s2661_s3  ;;  %v3872_v38 = vpop.f32.mrb[42].mxu1  ;;  %6290 = vmatprep.mubr.msk.f32.mxu0 %vm6749_vm2, %v6748_v28 }
 0x4ec   : > { %2664 = vst.msk [vmem:[%s7176_s0] sm:$0x1] %vm2663_vm5, %v2662_v37  ;;  %v2678_v39 = vstv %s2677_s28  ;;  %v6287_v40 = vpop.f32.mrb[43].mxu1  ;;  %6289 = vmatpush3.msra.mxu0 %v3872_v38  ;;  %s7472_s28 = sld [smem:[#allocation20_spill]] }
 0x4ed   : > { %2679 = vst.msk [vmem:[%s7183_s10] sm:$0x1] %vm2663_vm5, %v2678_v39  ;;  %6298 = vmatprep.subr.mxu0 %v6748_v28 }
 0x4ee   : > { %6291 = vmatmul.mubr.msk.f32.vlgmr.msra.gmra.mrb[46].mxu0 %vm2979_vm4, %v3661_v35 }
 0x4ef   : > { %6300 = vmatprep.mubr.msk.f32.mxu0 %vm6749_vm2, %v6748_v28 }
 0x5ad   : > { %v6242_v42 = vpop.f32.mrb[36].mxu0 }
 0x5ae   : > { %v3125_v43 = vpop.f32.mrb[37].mxu0  ;;  %v3581_v45 = vmul.f32 %v6242_v42, %v6242_v42 }
 0x5af   : > { %v3580_v48 = vmul.f32 %v3125_v43, %v3125_v43 }
 0x5b1   : > { %v6252_v44 = vpop.f32.mrb[38].mxu0 }
 0x5b2   : > { %v3583_v46 = vmul.f32 %v6252_v44, %v6252_v44  ;;  %v3273_v47 = vpop.f32.mrb[39].mxu0 }
 0x5b3   : > { %v3582_v49 = vmul.f32 %v3273_v47, %v3273_v47 }
 0x5b4   : > { %v3585_v50 = vsub.f32 %v3581_v45, %v3583_v46  ;;  %v3589_v51 = vadd.f32 %v3583_v46, %v3581_v45 }
 0x5b5   : > { %v3584_v52 = vsub.f32 %v3580_v48, %v3582_v49  ;;  %v3588_v53 = vadd.f32 %v3582_v49, %v3580_v48  ;;  %v6262_v54 = vpop.f32.mrb[40].mxu0 }
 0x5b6   : > { %v3422_v55 = vpop.f32.mrb[41].mxu0  ;;  %v3587_v57 = vmul.f32 0.25, %v3585_v50  ;;  %v3591_v0 = vmul.f32 0.5, %v3589_v51 }
 0x5b7   : > { %v3586_v61 = vmul.f32 0.25, %v3584_v52  ;;  %v3590_v3 = vmul.f32 0.5, %v3588_v53 }
 0x5b8   : > { %v3611_v7 = vmul.f32 2.0, %v3587_v57  ;;  %v3617_v14 = vadd.f32 6.5025, %v3591_v0 }
 0x5b9   : > { %v6272_v56 = vpop.f32.mrb[42].mxu0  ;;  %v3610_v11 = vmul.f32 2.0, %v3586_v61  ;;  %v3616_v16 = vadd.f32 6.5025, %v3590_v3 }
 0x5ba   : > { %v3593_v58 = vsub.f32 %v6262_v54, %v6272_v56  ;;  %v3599_v59 = vadd.f32 %v6272_v56, %v6262_v54  ;;  %v3571_v60 = vpop.f32.mrb[43].mxu0  ;;  %v3613_v21 = vadd.f32 6.5025, %v3611_v7  ;;  %v4594_v7 = vld [vmem:[%s7472_s28] sm:$0x3] }
 0x5bb   : > { %v3592_v62 = vsub.f32 %v3422_v55, %v3571_v60  ;;  %v3598_v63 = vadd.f32 %v3571_v60, %v3422_v55  ;;  %v3612_v25 = vadd.f32 6.5025, %v3610_v11 }
 0x5bc   : > { %v3595_v1 = vmul.f32 0.25, %v3593_v58  ;;  %v3601_v2 = vmul.f32 0.5, %v3599_v59 }
 0x5bd   : > { %v3594_v4 = vmul.f32 0.25, %v3592_v62  ;;  %v3600_v5 = vmul.f32 0.5, %v3598_v63  ;;  %v3802_v6 = vpop.f32.mrb[44].mxu0  ;;  %v3946_v62 = vld [vmem:[%s7471_s29] sm:$0x1f]  ;;  %s7474_s29 = sld [smem:[#allocation17_spill]] }
 0x5be   : > { %v3597_v8 = vsub.f32 %v3595_v1, %v3587_v57  ;;  %v3603_v9 = vsub.f32 %v3601_v2, %v3591_v0  ;;  %v6282_v10 = vpop.f32.mrb[45].mxu0  ;;  %6296 = vmatmul.mubr.msk.f32.vlgmr.msra.gmra.mrb[44].mxu1 %vm3948_vm7, %v3802_v6  ;;  %v4248_v29 = vmul.f32 %v3802_v6, %v3802_v6 }
 0x5bf   : > { %v3596_v12 = vsub.f32 %v3594_v4, %v3586_v61  ;;  %v3602_v13 = vsub.f32 %v3600_v5, %v3590_v3  ;;  %6304 = vmatpush3.msk.msra.mxu1 %vm3952_vm6, %v7270_v41  ;;  %6305 = vmatprep.mubr.msk.f32.mxu1 %vm6749_vm2, %v6748_v28 }
 0x5c0   : > { %v3605_v15 = vmul.f32 2.0, %v3597_v8  ;;  %v3609_v17 = vadd.f32 58.5225, %v3603_v9  ;;  %6313 = vmatprep.subr.mxu1 %v6748_v28 }
 0x5c1   : > { %v3604_v18 = vmul.f32 2.0, %v3596_v12  ;;  %v3608_v19 = vadd.f32 58.5225, %v3602_v13  ;;  %v3942_v20 = vpop.f32.mrb[46].mxu0 }
 0x5c2   : > { %v3607_v22 = vadd.f32 58.5225, %v3605_v15  ;;  %v3619_v23 = vmul.f32 %v3617_v14, %v3609_v17  ;;  %6628 = vrcp.f32 %v3609_v17  ;;  %v6292_v24 = vpop.f32.mrb[47].mxu0  ;;  %6306 = vmatmul.mubr.msk.f32.vlgmr.msra.gmra.mrb[46].mxu1 %vm3948_vm7, %v3942_v20  ;;  %v4395_v32 = vmul.f32 %v3942_v20, %v3942_v20  ;;  %v4889_v14 = vld [vmem:[%s7473_s4] sm:$0x3] }
 0x5c3   : > { %v3606_v26 = vadd.f32 58.5225, %v3604_v18  ;;  %v3618_v27 = vmul.f32 %v3616_v16, %v3608_v19  ;;  %6630 = vrcp.f32 %v3608_v19  ;;  %6314 = vmatpush3.msk.msra.mxu1 %vm3952_vm6, %v7270_v41  ;;  %6315 = vmatprep.mubr.msk.f32.mxu1 %vm6749_vm2, %v6748_v28 }
 0x5c4   : > { %6632 = vrcp.f32 %v3619_v23  ;;  %6323 = vmatprep.subr.mxu1 %v6748_v28  ;;  %v3615_v30 = vmul.f32 %v3613_v21, %v3607_v22 }
 0x5c5   : > { %6634 = vrcp.f32 %v3618_v27  ;;  %v3614_v31 = vmul.f32 %v3612_v25, %v3606_v26 }
 0x5c6   : > { %6316 = vmatmul.mubr.msk.f32.vlgmr.msra.gmra.mrb[48].mxu1 %vm3948_vm7, %v4248_v29 }
 0x5c7   : > { %6324 = vmatpush3.msk.msra.mxu1 %vm3952_vm6, %v7270_v41  ;;  %6325 = vmatprep.mubr.msk.f32.mxu1 %vm6749_vm2, %v6748_v28 }
 0x5c8   : > { %6333 = vmatprep.subr.mxu1 %v6748_v28 }
 0x5ca   : > { %6326 = vmatmul.mubr.msk.f32.vlgmr.msra.gmra.mrb[50].mxu1 %vm3948_vm7, %v4395_v32 }
 0x5cb   : > { %6334 = vmatpush3.msk.msra.mxu1 %vm3952_vm6, %v4595_v33  ;;  %6335 = vmatprep.mubr.msk.f32.mxu1 %vm6749_vm2, %v6748_v28 }
 0x5cc   : > { %v6629_v34 = vpop.eup %6628  ;;  %6343 = vmatprep.subr.mxu1 %v6748_v28 }
 0x5cd   : > { %v6631_v35 = vpop.eup %6630  ;;  %v3627_v36 = vmul.f32 %v6629_v34, %v3607_v22 }
 0x5ce   : > { %v6633_v37 = vpop.eup %6632  ;;  %6336 = vmatmul.mubr.msk.f32.vlgmr.msra.gmra.mrb[52].mxu1 %vm3948_vm7, %v3802_v6  ;;  %v3625_v38 = vmul.f32 %v6631_v35, %v3606_v26 }
 0x5cf   : > { %v6635_v39 = vpop.eup %6634  ;;  %6344 = vmatpush3.msk.msra.mxu1 %vm3952_vm6, %v4595_v33  ;;  %6345 = vmatprep.mubr.msk.f32.mxu1 %vm6749_vm2, %v6748_v28  ;;  %v3647_v40 = vsel %vm3630_vm8, %v3627_v36, 0.0  ;;  %v3623_v41 = vmul.f32 %v6633_v37, %v3615_v30 }
 0x5d0   : > { %v3646_v42 = vsel %vm3628_vm9, %v3625_v38, 0.0  ;;  %v3621_v43 = vmul.f32 %v6635_v39, %v3614_v31  ;;  %6353 = vmatprep.subr.mxu1 %v6748_v28 }
 0x5d1   : > { %v3648_v44 = vadd.f32 %v3647_v40, %v3646_v42  ;;  %v3631_v45 = vsel %vm3630_vm8, %v3623_v41, 0.0 }
 0x5d2   : > { %6346 = vmatmul.mubr.msk.f32.vlgmr.msra.gmra.mrb[54].mxu1 %vm3948_vm7, %v3942_v20  ;;  %v3629_v46 = vsel %vm3628_vm9, %v3621_v43, 0.0 }
 0x5d3   : > { %3649 = vadd.xlane.f32.xlu1 %v3648_v44  ;;  %v3632_v47 = vadd.f32 %v3631_v45, %v3629_v46  ;;  %6355 = vmatprep.mubr.msk.f32.mxu1 %vm6749_vm2, %v6748_v28 }
 0x5d4   : > { %6354 = vmatpush3.msk.msra.mxu1 %vm4894_vm11, %v4889_v14 }
 0x5d5   : > { %3633 = vadd.xlane.f32.xlu0 %v3632_v47  ;;  %6363 = vmatprep.subr.mxu1 %v6748_v28 }
 0x660   : > { %v3650_v48 = vpop.xlane.xlu1 %3649 }
 0x661   : > { %v3651_v49 = vrot.slane %v3650_v48, 4 }
 0x662   : > { %v3634_v50 = vpop.xlane.xlu0 %3633 }
 0x663   : > { %v3652_v51 = vadd.f32 %v3651_v49, %v3650_v48  ;;  %v3635_v52 = vrot.slane %v3634_v50, 4 }
 0x665   : > { %v3653_v53 = vrot.slane %v3652_v51, 2  ;;  %v3636_v54 = vadd.f32 %v3635_v52, %v3634_v50 }
 0x667   : > { %v3637_v55 = vrot.slane %v3636_v54, 2  ;;  %v3654_v56 = vadd.f32 %v3653_v53, %v3652_v51 }
 0x669   : > { %v3638_v57 = vadd.f32 %v3637_v55, %v3636_v54  ;;  %v3655_v58 = vrot.slane %v3654_v56, 1 }
 0x66b   : > { %v3639_v59 = vrot.slane %v3638_v57, 1  ;;  %v3656_v61 = vadd.f32 %v3655_v58, %v3654_v56 }
 0x66d   : > { %v3640_v60 = vadd.f32 %v3639_v59, %v3638_v57 }
 0x66f   : > { %6543 = vpush %v3640_v60 }
 0x670   : > { %6545 = vpush %v3656_v61 }
 0x691   : > { %v4022_v63 = vpop.f32.mrb[44].mxu1 }
 0x692   : > { %v6297_v0 = vpop.f32.mrb[45].mxu1  ;;  %6299 = vmatpush3.msk.msra.mxu0 %vm3952_vm6, %v4022_v63 }
 0x693   : > { %6301 = vmatmul.mubr.msk.f32.vlgmr.msra.gmra.mrb[48].mxu0 %vm3948_vm7, %v3946_v62  ;;  %6308 = vmatprep.subr.mxu0 %v6748_v28 }
 0x694   : > { %6310 = vmatprep.mubr.msk.f32.mxu0 %vm6749_vm2, %v6748_v28 }
 0x695   : > { %v4171_v1 = vpop.f32.mrb[46].mxu1 }
 0x696   : > { %v6307_v2 = vpop.f32.mrb[47].mxu1  ;;  %6309 = vmatpush3.msk.msra.mxu0 %vm3952_vm6, %v4171_v1 }
 0x697   : > { %6311 = vmatmul.mubr.msk.f32.vlgmr.msra.gmra.mrb[50].mxu0 %vm3948_vm7, %v3946_v62  ;;  %6318 = vmatprep.subr.mxu0 %v6748_v28 }
 0x698   : > { %6320 = vmatprep.mubr.msk.f32.mxu0 %vm6749_vm2, %v6748_v28 }
 0x699   : > { %v4318_v3 = vpop.f32.mrb[48].mxu1 }
 0x69a   : > { %v6317_v4 = vpop.f32.mrb[49].mxu1  ;;  %6319 = vmatpush3.msk.msra.mxu0 %vm3952_vm6, %v4318_v3 }
 0x69b   : > { %6321 = vmatmul.mubr.msk.f32.vlgmr.msra.gmra.mrb[52].mxu0 %vm3948_vm7, %v3946_v62  ;;  %6328 = vmatprep.subr.mxu0 %v6748_v28 }
 0x69c   : > { %6330 = vmatprep.mubr.msk.f32.mxu0 %vm6749_vm2, %v6748_v28 }
 0x69d   : > { %v4465_v5 = vpop.f32.mrb[50].mxu1 }
 0x69e   : > { %v6327_v6 = vpop.f32.mrb[51].mxu1  ;;  %6329 = vmatpush3.msk.msra.mxu0 %vm3952_vm6, %v4465_v5 }
 0x69f   : > { %6331 = vmatmul.mubr.msk.f32.vlgmr.msra.gmra.mrb[54].mxu0 %vm3948_vm7, %v3946_v62  ;;  %6338 = vmatprep.subr.mxu0 %v6748_v28  ;;  %v4888_v6 = vld [vmem:[%s7474_s29] sm:$0x7] }
 0x6a0   : > { %s6544_s23 = spop %6543  ;;  %6340 = vmatprep.mubr.msk.f32.mxu0 %vm6749_vm2, %v6748_v28 }
 0x6a1   : > { %s3642_s19 = smul.f32 0.012345679, %s6544_s23  ;;  %s6546_s30 = spop %6545  ;;  %v4665_v8 = vpop.f32.mrb[52].mxu1 }
 0x6a2   : > { %s3658_s27 = smul.f32 0.012345679, %s6546_s30  ;;  %v6337_v9 = vpop.f32.mrb[53].mxu1  ;;  %6339 = vmatpush3.msk.msra.mxu0 %vm3952_vm6, %v4665_v8 }
 0x6a3   : > { %v3643_v10 = vstv %s3642_s19  ;;  %6341 = vmatmul.mubr.msk.f32.vlgmr.msra.gmra.mrb[56].mxu0 %vm3948_vm7, %v4594_v7  ;;  %6348 = vmatprep.subr.mxu0 %v6748_v28 }
 0x6a4   : > { %3645 = vst.msk [vmem:[%s7176_s0] sm:$0x1] %vm3644_vm10, %v3643_v10  ;;  %v3659_v11 = vstv %s3658_s27  ;;  %6350 = vmatprep.mubr.msk.f32.mxu0 %vm6749_vm2, %v6748_v28 }
 0x6a5   : > { %3660 = vst.msk [vmem:[%s7183_s10] sm:$0x1] %vm3644_vm10, %v3659_v11  ;;  %v4811_v12 = vpop.f32.mrb[54].mxu1 }
 0x6a6   : > { %v6347_v13 = vpop.f32.mrb[55].mxu1  ;;  %6349 = vmatpush3.msk.msra.mxu0 %vm3952_vm6, %v4811_v12 }
 0x6a7   : > { %6351 = vmatmul.mubr.msk.f32.vlgmr.msra.gmra.mrb[58].mxu0 %vm3948_vm7, %v4594_v7  ;;  %6358 = vmatprep.subr.mxu0 %v6748_v28 }
 0x6a8   : > { %6360 = vmatprep.mubr.msk.f32.mxu0 %vm6749_vm2, %v6748_v28 }
 0x766   : > { %v4098_v15 = vpop.f32.mrb[48].mxu0 }
 0x767   : > { %v6302_v17 = vpop.f32.mrb[49].mxu0  ;;  %v4542_v18 = vmul.f32 %v4098_v15, %v4098_v15 }
 0x76a   : > { %v4244_v16 = vpop.f32.mrb[50].mxu0 }
 0x76b   : > { %v4543_v19 = vmul.f32 %v4244_v16, %v4244_v16  ;;  %v6312_v20 = vpop.f32.mrb[51].mxu0 }
 0x76d   : > { %v4544_v21 = vsub.f32 %v4542_v18, %v4543_v19  ;;  %v4546_v22 = vadd.f32 %v4543_v19, %v4542_v18 }
 0x76e   : > { %v4391_v23 = vpop.f32.mrb[52].mxu0 }
 0x76f   : > { %v6322_v24 = vpop.f32.mrb[53].mxu0  ;;  %v4545_v26 = vmul.f32 0.25, %v4544_v21  ;;  %v4547_v31 = vmul.f32 0.5, %v4546_v22 }
 0x771   : > { %v4557_v35 = vmul.f32 2.0, %v4545_v26  ;;  %v4560_v39 = vadd.f32 6.5025, %v4547_v31 }
 0x772   : > { %v4538_v25 = vpop.f32.mrb[54].mxu0 }
 0x773   : > { %v4548_v27 = vsub.f32 %v4391_v23, %v4538_v25  ;;  %v4551_v29 = vadd.f32 %v4538_v25, %v4391_v23  ;;  %v6332_v30 = vpop.f32.mrb[55].mxu0  ;;  %v4558_v43 = vadd.f32 6.5025, %v4557_v35 }
 0x775   : > { %v4549_v32 = vmul.f32 0.25, %v4548_v27  ;;  %v4552_v33 = vmul.f32 0.5, %v4551_v29 }
 0x776   : > { %v4741_v34 = vpop.f32.mrb[56].mxu0 }
 0x777   : > { %v4550_v36 = vsub.f32 %v4549_v32, %v4545_v26  ;;  %v4553_v37 = vsub.f32 %v4552_v33, %v4547_v31  ;;  %v6342_v38 = vpop.f32.mrb[57].mxu0  ;;  %6356 = vmatmul.mubr.msk.f32.vlgmr.msra.gmra.mrb[56].mxu1 %vm4890_vm12, %v4741_v34  ;;  %v5190_v47 = vmul.f32 %v4741_v34, %v4741_v34 }
 0x778   : > { %6364 = vmatpush3.msk.msra.mxu1 %vm4894_vm11, %v4889_v14  ;;  %6365 = vmatprep.mubr.msk.f32.mxu1 %vm6749_vm2, %v6748_v28 }
 0x779   : > { %v4554_v40 = vmul.f32 2.0, %v4550_v36  ;;  %v4556_v41 = vadd.f32 58.5225, %v4553_v37  ;;  %6373 = vmatprep.subr.mxu1 %v6748_v28 }
 0x77a   : > { %v4884_v42 = vpop.f32.mrb[58].mxu0 }
 0x77b   : > { %v4561_v44 = vmul.f32 %v4560_v39, %v4556_v41  ;;  %6636 = vrcp.f32 %v4556_v41  ;;  %v6352_v45 = vpop.f32.mrb[59].mxu0  ;;  %6366 = vmatmul.mubr.msk.f32.vlgmr.msra.gmra.mrb[58].mxu1 %vm4890_vm12, %v4884_v42  ;;  %v4555_v46 = vadd.f32 58.5225, %v4554_v40  ;;  %v5337_v49 = vmul.f32 %v4884_v42, %v4884_v42 }
 0x77c   : > { %6374 = vmatpush3.msk.msra.mxu1 %vm4894_vm11, %v4889_v14  ;;  %6375 = vmatprep.mubr.msk.f32.mxu1 %vm6749_vm2, %v6748_v28 }
 0x77d   : > { %6638 = vrcp.f32 %v4561_v44  ;;  %6383 = vmatprep.subr.mxu1 %v6748_v28  ;;  %v4559_v48 = vmul.f32 %v4558_v43, %v4555_v46 }
 0x77f   : > { %6376 = vmatmul.mubr.msk.f32.vlgmr.msra.gmra.mrb[60].mxu1 %vm4890_vm12, %v5190_v47 }
 0x780   : > { %6384 = vmatpush3.msk.msra.mxu1 %vm4894_vm11, %v4889_v14  ;;  %6385 = vmatprep.mubr.msk.f32.mxu1 %vm6749_vm2, %v6748_v28 }
 0x783   : > { %6386 = vmatmul.mubr.msk.f32.vlgmr.msra.gmra.mrb[62].mxu1 %vm4890_vm12, %v5337_v49 }
 0x785   : > { %v6637_v50 = vpop.eup %6636 }
 0x786   : > { %v4565_v51 = vmul.f32 %v6637_v50, %v4555_v46 }
 0x787   : > { %v6639_v52 = vpop.eup %6638 }
 0x788   : > { %v4581_v53 = vsel %vm4566_vm13, %v4565_v51, 0.0  ;;  %v4563_v54 = vmul.f32 %v6639_v52, %v4559_v48 }
 0x789   : > { %4582 = vadd.xlane.f32.xlu1 %v4581_v53 }
 0x78a   : > { %v4567_v55 = vsel %vm4566_vm13, %v4563_v54, 0.0 }
 0x78b   : > { %4568 = vadd.xlane.f32.xlu0 %v4567_v55 }
 0x816   : > { %v4583_v56 = vpop.xlane.xlu1 %4582 }
 0x817   : > { %v4584_v57 = vrot.slane %v4583_v56, 4 }
 0x818   : > { %v4569_v58 = vpop.xlane.xlu0 %4568 }
 0x819   : > { %v4585_v59 = vadd.f32 %v4584_v57, %v4583_v56  ;;  %v4570_v60 = vrot.slane %v4569_v58, 4 }
 0x81b   : > { %v4586_v61 = vrot.slane %v4585_v59, 2  ;;  %v4571_v62 = vadd.f32 %v4570_v60, %v4569_v58 }
 0x81d   : > { %v4572_v63 = vrot.slane %v4571_v62, 2  ;;  %v4587_v0 = vadd.f32 %v4586_v61, %v4585_v59 }
 0x81f   : > { %v4573_v1 = vadd.f32 %v4572_v63, %v4571_v62  ;;  %v4588_v2 = vrot.slane %v4587_v0, 1 }
 0x821   : > { %v4574_v3 = vrot.slane %v4573_v1, 1  ;;  %v4589_v5 = vadd.f32 %v4588_v2, %v4587_v0 }
 0x823   : > { %v4575_v4 = vadd.f32 %v4574_v3, %v4573_v1 }
 0x825   : > { %6547 = vpush %v4575_v4 }
 0x826   : > { %6549 = vpush %v4589_v5 }
 0x84a   : > { %v4964_v7 = vpop.f32.mrb[56].mxu1 }
 0x84b   : > { %v6357_v8 = vpop.f32.mrb[57].mxu1  ;;  %6359 = vmatpush3.msk.msra.mxu0 %vm4894_vm11, %v4964_v7 }
 0x84c   : > { %6361 = vmatmul.mubr.msk.f32.vlgmr.msra.gmra.mrb[60].mxu0 %vm4890_vm12, %v4888_v6  ;;  %6368 = vmatprep.subr.mxu0 %v6748_v28 }
 0x84d   : > { %6370 = vmatprep.mubr.msk.f32.mxu0 %vm6749_vm2, %v6748_v28 }
 0x84e   : > { %v5113_v9 = vpop.f32.mrb[58].mxu1 }
 0x84f   : > { %v6367_v10 = vpop.f32.mrb[59].mxu1  ;;  %6369 = vmatpush3.msk.msra.mxu0 %vm4894_vm11, %v5113_v9 }
 0x850   : > { %6371 = vmatmul.mubr.msk.f32.vlgmr.msra.gmra.mrb[62].mxu0 %vm4890_vm12, %v4888_v6  ;;  %6378 = vmatprep.subr.mxu0 %v6748_v28 }
 0x851   : > { %6380 = vmatprep.mubr.msk.f32.mxu0 %vm6749_vm2, %v6748_v28 }
 0x852   : > { %v5260_v11 = vpop.f32.mrb[60].mxu1 }
 0x853   : > { %v6377_v12 = vpop.f32.mrb[61].mxu1  ;;  %6379 = vmatpush3.msk.msra.mxu0 %vm4894_vm11, %v5260_v11 }
 0x854   : > { %6381 = vmatmul.mubr.msk.f32.vlgmr.msra.gmra.mrb[64].mxu0 %vm4890_vm12, %v4888_v6  ;;  %6388 = vmatprep.subr.mxu0 %v6748_v28 }
 0x855   : > { %6390 = vmatprep.mubr.msk.f32.mxu0 %vm6749_vm2, %v6748_v28 }
 0x856   : > { %s6548_s23 = spop %6547  ;;  %v5407_v13 = vpop.f32.mrb[62].mxu1 }
 0x857   : > { %s4577_s3 = smul.f32 0.04, %s6548_s23  ;;  %s6550_s1 = spop %6549  ;;  %v6387_v14 = vpop.f32.mrb[63].mxu1  ;;  %6389 = vmatpush3.msk.msra.mxu0 %vm4894_vm11, %v5407_v13 }
 0x858   : > { %s4591_s28 = smul.f32 0.04, %s6550_s1  ;;  %6391 = vmatmul.mubr.msk.f32.vlgmr.msra.gmra.mrb[66].mxu0 %vm4890_vm12, %v4888_v6 }
 0x859   : > { %v4578_v15 = vstv %s4577_s3 }
 0x85a   : > { %4580 = vst.msk [vmem:[%s7176_s0] sm:$0x1] %vm4579_vm14, %v4578_v15  ;;  %v4592_v17 = vstv %s4591_s28 }
 0x85b   : > { %4593 = vst.msk [vmem:[%s7183_s10] sm:$0x1] %vm4579_vm14, %v4592_v17 }
 0x91f   : > { %v5040_v16 = vpop.f32.mrb[60].mxu0 }
 0x920   : > { %v6362_v18 = vpop.f32.mrb[61].mxu0  ;;  %v5484_v20 = vmul.f32 %v5040_v16, %v5040_v16 }
 0x923   : > { %v5186_v19 = vpop.f32.mrb[62].mxu0 }
 0x924   : > { %v5485_v28 = vmul.f32 %v5186_v19, %v5186_v19  ;;  %v6372_v21 = vpop.f32.mrb[63].mxu0 }
 0x926   : > { %v5486_v22 = vsub.f32 %v5484_v20, %v5485_v28  ;;  %v5488_v23 = vadd.f32 %v5485_v28, %v5484_v20 }
 0x927   : > { %v5333_v24 = vpop.f32.mrb[64].mxu0 }
 0x928   : > { %v6382_v25 = vpop.f32.mrb[65].mxu0  ;;  %v5487_v27 = vmul.f32 0.25, %v5486_v22  ;;  %v5489_v32 = vmul.f32 0.5, %v5488_v23 }
 0x92a   : > { %v5499_v35 = vmul.f32 2.0, %v5487_v27  ;;  %v5502_v38 = vadd.f32 6.5025, %v5489_v32 }
 0x92b   : > { %v5480_v26 = vpop.f32.mrb[66].mxu0 }
 0x92c   : > { %v5490_v29 = vsub.f32 %v5333_v24, %v5480_v26  ;;  %v5493_v30 = vadd.f32 %v5480_v26, %v5333_v24  ;;  %v6392_v31 = vpop.f32.mrb[67].mxu0  ;;  %v5500_v41 = vadd.f32 6.5025, %v5499_v35 }
 0x92e   : > { %v5491_v33 = vmul.f32 0.25, %v5490_v29  ;;  %v5494_v34 = vmul.f32 0.5, %v5493_v30 }
 0x930   : > { %v5492_v36 = vsub.f32 %v5491_v33, %v5487_v27  ;;  %v5495_v37 = vsub.f32 %v5494_v34, %v5489_v32 }
 0x932   : > { %v5496_v39 = vmul.f32 2.0, %v5492_v36  ;;  %v5498_v40 = vadd.f32 58.5225, %v5495_v37 }
 0x934   : > { %v5503_v42 = vmul.f32 %v5502_v38, %v5498_v40  ;;  %6640 = vrcp.f32 %v5498_v40  ;;  %v5497_v43 = vadd.f32 58.5225, %v5496_v39 }
 0x936   : > { %6642 = vrcp.f32 %v5503_v42  ;;  %v5501_v44 = vmul.f32 %v5500_v41, %v5497_v43 }
 0x93e   : > { %v6641_v45 = vpop.eup %6640 }
 0x93f   : > { %v5507_v46 = vmul.f32 %v6641_v45, %v5497_v43 }
 0x940   : > { %v6643_v47 = vpop.eup %6642 }
 0x941   : > { %v5523_v48 = vsel %vm5508_vm15, %v5507_v46, 0.0  ;;  %v5505_v49 = vmul.f32 %v6643_v47, %v5501_v44 }
 0x942   : > { %5524 = vadd.xlane.f32.xlu1 %v5523_v48 }
 0x943   : > { %v5509_v50 = vsel %vm5508_vm15, %v5505_v49, 0.0 }
 0x944   : > { %5510 = vadd.xlane.f32.xlu0 %v5509_v50 }
 0x9cf   : > { %v5525_v51 = vpop.xlane.xlu1 %5524 }
 0x9d0   : > { %v5526_v52 = vrot.slane %v5525_v51, 4 }
 0x9d1   : > { %v5511_v53 = vpop.xlane.xlu0 %5510 }
 0x9d2   : > { %v5527_v54 = vadd.f32 %v5526_v52, %v5525_v51  ;;  %v5512_v55 = vrot.slane %v5511_v53, 4 }
 0x9d4   : > { %v5528_v56 = vrot.slane %v5527_v54, 2  ;;  %v5513_v57 = vadd.f32 %v5512_v55, %v5511_v53 }
 0x9d6   : > { %v5529_v58 = vadd.f32 %v5528_v56, %v5527_v54  ;;  %v5514_v59 = vrot.slane %v5513_v57, 2 }
 0x9d8   : > { %v5515_v60 = vadd.f32 %v5514_v59, %v5513_v57  ;;  %v5530_v61 = vrot.slane %v5529_v58, 1 }
 0x9da   : > { %v5516_v62 = vrot.slane %v5515_v60, 1  ;;  %v5531_v0 = vadd.f32 %v5530_v61, %v5529_v58 }
 0x9dc   : > { %v5517_v63 = vadd.f32 %v5516_v62, %v5515_v60 }
 0x9de   : > { %6551 = vpush %v5517_v63 }
 0x9df   : > { %6553 = vpush %v5531_v0 }
 0xa0f   : > { %s6552_s19 = spop %6551 }
 0xa10   : > { %s5519_s30 = smul.f32 0.11111111, %s6552_s19  ;;  %s6554_s27 = spop %6553 }
 0xa11   : > { %s5533_s6 = smul.f32 0.11111111, %s6554_s27 }
 0xa12   : > { %v5520_v1 = vstv %s5519_s30 }
 0xa13   : > { %5522 = vst.msk [vmem:[%s7176_s0] sm:$0x1] %vm5521_vm0, %v5520_v1  ;;  %v5534_v2 = vstv %s5533_s6 }
 0xa14   : > { %5535 = vst.msk [vmem:[%s7183_s10] sm:$0x1] %vm5521_vm0, %v5534_v2 }
 0xa15 PF: > { %s7475_s27 = sld [smem:[#allocation9_spill]]  ;;  %s7476_s4 = sld [smem:[#allocation8_spill]] }
 0xa16   : > { %s7477_s26 = sld [smem:[#allocation10_spill]]  ;;  %s7478_s2 = smov %s6734_s25 }
 0xa1b   : > { %p35_p11 = scmp.ge.s32.totalorder %s7475_s27, 8   ;;  %s7479_s25 = smov %s7476_s4 }
 0xa1d   :  { %37 = sbr.rel (!%p35_p11) target bundleno = 17 (0x11), region = 165 }
 0xa24   :  { %5565 = vsyncpa [#allocation3], 1 }
 0xa25   :  { %5567 = vsyncpa [#allocation3 + $0x1], 1 }
 0xa26   :  { %5568 = vsyncpa [#allocation5], 1 }
 0xa27   :  { %5570 = vsyncpa [#allocation5 + $0x1], 1 }

// kernel: tpu_custom_call.1
= control target key start
LH: loop header
LB: loop body
LE: loop exit
PB: predicated region body
PF: predicated region fallthrough
CT: control target
= control target key end

     0   :  { %s7406_s0 = inlined_call_operand.hbm [shape: f32[6,32,32], index: 0, kind: input, shape index: {}]   ;;  %s7407_s1 = inlined_call_operand.hbm [shape: f32[6,32,32], index: 1, kind: input, shape index: {}]   ;;  %s7408_s2 = inlined_call_operand.vmem [shape: f32[32,32], index: 2, kind: input, shape index: {}]   ;;  %s7409_s3 = inlined_call_operand.vmem [shape: f32[16,16], index: 3, kind: input, shape index: {}]   ;;  %s7410_s4 = inlined_call_operand.vmem [shape: f32[9,8], index: 4, kind: input, shape index: {}]   ;;  %s7411_s5 = inlined_call_operand.vmem [shape: f32[5,4], index: 5, kind: input, shape index: {}]   ;;  %s7412_s6 = inlined_call_operand.vmem [shape: f32[3,2], index: 6, kind: input, shape index: {}]   ;;  %s7413_s7 = inlined_call_operand.vmem [shape: f32[32,32], index: 7, kind: input, shape index: {}]   ;;  %s7414_s8 = inlined_call_operand.vmem [shape: f32[16,16], index: 8, kind: input, shape index: {}]   ;;  %s7415_s9 = inlined_call_operand.vmem [shape: f32[8,9], index: 9, kind: input, shape index: {}]   ;;  %s7416_s10 = inlined_call_operand.vmem [shape: f32[4,5], index: 10, kind: input, shape index: {}]   ;;  %s7417_s11 = inlined_call_operand.vmem [shape: f32[2,3], index: 11, kind: input, shape index: {}]   ;;  %s7418_s12 = inlined_call_operand.vmem [shape: f32[16,32], index: 12, kind: input, shape index: {}]   ;;  %s7419_s13 = inlined_call_operand.vmem [shape: f32[8,16], index: 13, kind: input, shape index: {}]   ;;  %s7420_s14 = inlined_call_operand.vmem [shape: f32[4,8], index: 14, kind: input, shape index: {}]   ;;  %s7421_s15 = inlined_call_operand.vmem [shape: f32[2,4], index: 15, kind: input, shape index: {}]   ;;  %s7422_s16 = inlined_call_operand.vmem [shape: f32[32,16], index: 16, kind: input, shape index: {}]   ;;  %s7423_s17 = inlined_call_operand.vmem [shape: f32[16,8], index: 17, kind: input, shape index: {}]   ;;  %s7424_s18 = inlined_call_operand.vmem [shape: f32[8,4], index: 18, kind: input, shape index: {}]   ;;  %s7425_s19 = inlined_call_operand.vmem [shape: f32[4,2], index: 19, kind: input, shape index: {}]   ;;  %s7426_s20 = inlined_call_operand.vmem [shape: f32[6,1,5], index: 20, kind: output, shape index: {0}]   ;;  %s7427_s21 = inlined_call_operand.vmem [shape: f32[6,1,5], index: 21, kind: output, shape index: {1}]  }
   0x1   :  { %7440 = sst [smem:[#allocation11_spill]] %s7406_s0 }
   0x2   :  { %7441 = sst [smem:[#allocation12_spill]] %s7407_s1 }
   0x3   :  { %7442 = sst [smem:[#allocation13_spill]] %s7408_s2 }
   0x4   :  { %7443 = sst [smem:[#allocation14_spill]] %s7409_s3 }
   0x5   :  { %7444 = sst [smem:[#allocation15_spill]] %s7410_s4 }
   0x6   :  { %7445 = sst [smem:[#allocation16_spill]] %s7411_s5 }
   0x7   :  { %7446 = sst [smem:[#allocation17_spill]] %s7412_s6 }
   0x8   :  { %7447 = sst [smem:[#allocation18_spill]] %s7416_s10 }
   0x9   :  { %7448 = sst [smem:[#allocation19_spill]] %s7417_s11 }
   0xa   :  { %7449 = sst [smem:[#allocation20_spill]] %s7421_s15 }
   0xb   :  { %7450 = sst [smem:[#allocation21_spill]] %s7425_s19 }
   0xc   :  { %27 = vsyncpa [#allocation3], 0 }
   0xd   :  { %29 = vsyncpa [#allocation3 + $0x1], 0 }
   0xe   :  { %30 = vsyncpa [#allocation5], 0 }
   0xf   :  { %32 = vsyncpa [#allocation5 + $0x1], 0  ;;  %s6861_s2 = smov 0   ;;  %s6863_s25 = smov 0  }
  0x10   :  { %s6865_s26 = smov 0   ;;  %s6867_s27 = smov 0  }
  0x11 LB: > { %7451 = sst [smem:[#allocation8_spill]] %s6738_s26  ;;  %s6880_s3 = sadd.s32 4294967295, %s6742_s27   ;;  %s6742_s27 = sphi %s6867_s27, %s7475_s27   ;;  %s6738_s26 = sphi %s6865_s26, %s7477_s26   ;;  %s6734_s25 = sphi %s6863_s25, %s7479_s25   ;;  %s6730_s2 = sphi %s6861_s2, %s7478_s2  }
  0x12   : > { %s6883_s28 = sadd.s32 1, %s6742_s27   ;;  %s45_s0 = sadd.s32 1, %s6738_s26 }
  0x13   : > { %7452 = sst [smem:[#allocation9_spill]] %s6883_s28  ;;  %s42_s29 = ssub.s32 %s6742_s27, %s6883_s28 }
  0x14   : > { %p43_p0 = scmp.eq.s32.totalorder %s42_s29, 0  ;;  %p52_p1 = scmp.ne.s32.totalorder %s6738_s26, %s6734_s25 }
  0x15   : > { %p53_p2 = scmp.eq.s32.totalorder %s6742_s27, 0  ;;  %p58_p3 = scmp.ne.s32.totalorder %s6734_s25, %s6730_s2 }
  0x16   : > { %s6893_s4 = scalar_select %p43_p0, %s6738_s26, %s45_s0  }
  0x17   : > { %p54_p4 = por %p53_p2, %p52_p1  ;;  %p59_p5 = scmp.eq.s32.totalorder %s6880_s3, 0 }
  0x18   : > { %7453 = sst [smem:[#allocation10_spill]] %s6893_s4  ;;  %p6566_p6 = scmp.lt.s32.totalorder %s6742_s27, 6 }
  0x19   : > { %p6897_p7 = por %p59_p5, %p58_p3  ;;  %s6902_s5 = sand.u32 1, %s6738_s26  }
  0x1a   : > { %s7436_s22 = sshll.u32 %s6902_s5, 5  ;;  %s7437_s23 = sshll.u32 %s6742_s27, 9 }
  0x1b   : > { %s7454_s30 = scalar_select %p6897_p7, 1, 0 }
  0x1c   : > { %s7455_s2 = sld [smem:[#allocation11_spill]]  ;;  %s596_s4 = scalar_lea.vmem [#allocation2], %s7436_s22 }
  0x1d   : > { %s603_s28 = sshll.u32 %s596_s4, 4  ;;  %p6917_p8 = pnand %p6566_p6, %p54_p4  ;;  %s6915_s28 = int_to_ptr.vmem [resolvable:$true] %s603_s28 }
  0x1f   : > { %p6646_p11 = pneg %p6917_p8 }
  0x22   : > { %s7456_s29 = smov %s7455_s2  ;;  %s6911_s0 = scalar_lea.hbm %s7455_s2, %s7437_s23 }
  0x23   : > { %s6644_s1 = scalar_lea.hbm %s6911_s0, 512  ;;  %s6649_s2 = scalar_lea.hbm %s7456_s29, 3072 }
  0x24   : > { %p6645_p10 = scmp.ne.s32.totalorder %s6911_s0, %s6644_s1  ;;  %p6650_p0 = scmp.lt.u32.totalorder %s6911_s0, %s7456_s29 }
  0x25   : > { %p6651_p1 = scmp.lt.u32.totalorder %s6649_s2, %s6644_s1  ;;  %p6653_p3 = scmp.lt.u32.totalorder %s6644_s1, %s6911_s0 }
  0x26   : > { %p6647_p12 = pnand %p6646_p11, %p6645_p10 }
  0x27   : > { %p6652_p2 = por %p6651_p1, %p6650_p0 }
  0x28   : > { %p6648_p13 = pneg %p6647_p12 }
  0x29   : > { %p6654_p4 = por %p6653_p3, %p6652_p2 }
  0x2b   : > { %p6655_p5 = pnand %p6654_p4, %p6648_p13 }
  0x2d   : > { %6658 = shalt.err (!%p6655_p5)
}
  0x2e   : > { %s6659_s6 = scalar_lea.vmem %s6915_s28, 512  ;;  %s6744_s24 = smov [#allocation2]  }
  0x2f   : > { %p6660_p6 = scmp.ne.s32.totalorder %s6915_s28, %s6659_s6  ;;  %s6664_s4 = sshll.u32 %s6744_s24, 4  ;;  %s6665_s4 = int_to_ptr.vmem [resolvable:$false] %s6664_s4 }
  0x30   : > { %s6666_s22 = scalar_lea.vmem %s6665_s4, 1024  ;;  %p6667_p9 = scmp.lt.s32.totalorder %s6915_s28, %s6665_s4 }
  0x31   : > { %p6662_p10 = pnand %p6660_p6, %p6646_p11  ;;  %p6668_p0 = scmp.lt.s32.totalorder %s6666_s22, %s6659_s6 }
  0x33   : > { %p6663_p12 = pneg %p6662_p10  ;;  %p6669_p1 = por %p6668_p0, %p6667_p9 }
  0x35   : > { %p6670_p2 = pnand %p6669_p1, %p6663_p12 }
  0x37   : > { %6673 = shalt.err (!%p6670_p2)
}
  0x38   : > { %s6745_s23 = smov 128   ;;  %s6746_s1 = smov 8  }
  0x39   : > { %s7458_s6 = scalar_lea.sflag [#allocation3], %s6902_s5  ;;  %p632_p9 = scmp.lt.s32.totalorder %s6742_s27, 7 }
  0x3a   : > { %6562 = dma.hbm_to_vmem [thread:$0]  (!%p6917_p8), %s6911_s0, 512, %s6915_s28, %s7458_s6, %s6745_s23, %s6745_s23, %s6746_s1  }
  0x3b   : > { %s7459_s2 = sshll.u32 %s6742_s27, 9  ;;  %s7460_s22 = sld [smem:[#allocation12_spill]] }
  0x3c   : > { %p7461_p13 = scmp.ge.s32.totalorder %s6742_s27, 1  ;;  %s7463_s15 = sshll.u32 %s6902_s5, 5 }
  0x3d   : > { %s617_s19 = scalar_lea.vmem [#allocation4], %s7463_s15  ;;  %s614_s28 = scalar_lea.sflag [#allocation5], %s6902_s5 }
  0x3e   : > { %p6963_p3 = pnand %p7461_p13, %p632_p9  ;;  %s624_s10 = sshll.u32 %s617_s19, 4  ;;  %s6969_s10 = int_to_ptr.vmem [resolvable:$true] %s624_s10 }
  0x41   : > { %s6959_s29 = scalar_lea.hbm %s7460_s22, %s7459_s2  ;;  %s6679_s2 = scalar_lea.hbm %s7460_s22, 3072 }
  0x42   : > { %s6674_s0 = scalar_lea.hbm %s6959_s29, 512  ;;  %p6680_p10 = scmp.lt.u32.totalorder %s6959_s29, %s7460_s22 }
  0x43   : > { %p6675_p4 = scmp.ne.s32.totalorder %s6959_s29, %s6674_s0  ;;  %p6681_p12 = scmp.lt.u32.totalorder %s6679_s2, %s6674_s0 }
  0x44   : > { %p6683_p1 = scmp.lt.u32.totalorder %s6674_s0, %s6959_s29 }
  0x45   : > { %p6677_p5 = pnand %p6675_p4, %p6646_p11  ;;  %p6682_p0 = por %p6681_p12, %p6680_p10 }
  0x47   : > { %p6678_p6 = pneg %p6677_p5  ;;  %p6684_p2 = por %p6683_p1, %p6682_p0 }
  0x49   : > { %p6685_p9 = pnand %p6684_p2, %p6678_p6 }
  0x4b   : > { %6688 = shalt.err (!%p6685_p9)
}
  0x4c   : > { %s6689_s15 = scalar_lea.vmem %s6969_s10, 512  ;;  %s6747_s19 = smov [#allocation4]  }
  0x4d   : > { %p6690_p13 = scmp.ne.s32.totalorder %s6969_s10, %s6689_s15  ;;  %s6694_s27 = sshll.u32 %s6747_s19, 4  ;;  %s6695_s27 = int_to_ptr.vmem [resolvable:$false] %s6694_s27 }
  0x4e   : > { %s6696_s6 = scalar_lea.vmem %s6695_s27, 1024  ;;  %p6697_p7 = scmp.lt.s32.totalorder %s6969_s10, %s6695_s27 }
  0x4f   : > { %p6692_p4 = pnand %p6690_p13, %p6646_p11  ;;  %p6698_p10 = scmp.lt.s32.totalorder %s6696_s6, %s6689_s15 }
  0x51   : > { %p6693_p5 = pneg %p6692_p4  ;;  %p6699_p12 = por %p6698_p10, %p6697_p7 }
  0x53   : > { %p6700_p0 = pnand %p6699_p12, %p6693_p5 }
  0x55   : > { %6703 = shalt.err (!%p6700_p0)
}
  0x56   : > { %6565 = dma.hbm_to_vmem [thread:$0]  (!%p6917_p8), %s6959_s29, 512, %s6969_s10, %s614_s28, %s6745_s23, %s6745_s23, %s6746_s1  }
  0x57   : > { %636 = sbr.rel (%p6963_p3) target bundleno = 2581 (0xa15), region = 100  ;;  %s638_s0 = sand.u32 (!%p6963_p3), 1, %s6734_s25  }
  0x58   : > { %s5653_s2 = sshll.u32 (!%p6963_p3), %s638_s0, 5  ;;  %s639_s24 = scalar_lea.sflag (!%p6963_p3), [#allocation3], %s638_s0 }
  0x59   : > { %s642_s4 = scalar_lea.vmem (!%p6963_p3), [#allocation2], %s5653_s2  ;;  %p7464_p7 = scmp.ne.s32.totalorder (!%p6963_p3), %s7454_s30, 0 }
  0x5e   : > { %6721 = dma.done.wait (%p7464_p7), %s639_s24, 512  }
  0x5f   : > { %6723 = vsyncadd (%p7464_p7), %s639_s24, 4294966784  ;;  %s648_s26 = scalar_lea.sflag [#allocation5], %s638_s0  ;;  %s651_s5 = scalar_lea.vmem [#allocation4], %s5653_s2 }
  0x60   : > { %6725 = dma.done.wait (%p7464_p7), %s648_s26, 512  }
  0x61   : > { %6727 = vsyncadd (%p7464_p7), %s648_s26, 4294966784  ;;  %v742_v0 = vld [vmem:[%s7413_s7] sm:$0xff]  ;;  %v743_v1 = vld [vmem:[%s7413_s7 + $0x8] sm:$0xff]  ;;  %vm746_vm0 = vcmask 261120   ;;  %s7465_s11 = sld [smem:[#allocation13_spill]]  ;;  %vm1966_vm1 = vcmask 130048  }
  0x62   : > { %v744_v2 = vld [vmem:[%s7413_s7 + $0x10] sm:$0xff]  ;;  %v6393_v3 = vpack.c.bf16 %v743_v1, %v742_v0  ;;  %v745_v4 = vld [vmem:[%s7413_s7 + $0x18] sm:$0xff]  ;;  %v722_v5 = vld [vmem:[%s642_s4] sm:$0xff]  ;;  %s7466_s15 = sld [smem:[#allocation14_spill]]  ;;  %vm6749_vm2 = vmmov 0   ;;  %p716_p8 = scmp.lt.s32.totalorder %s6880_s3, 5 }
  0x63   : > { %v726_v6 = vld [vmem:[%s651_s5] sm:$0xff]  ;;  %v6397_v7 = vpack.c.bf16 %v745_v4, %v744_v2  ;;  %v723_v9 = vld [vmem:[%s642_s4 + $0x8] sm:$0xff]  ;;  %v724_v11 = vld [vmem:[%s642_s4 + $0x10] sm:$0xff]  ;;  %vm1609_vm3 = vcmask 0   ;;  %vm2979_vm4 = vcmask 64512   ;;  %vm2663_vm5 = vcmask 8200  }
  0x64   : > { %v7023_v8 = vadd.f32 %v726_v6, %v722_v5  ;;  %6394 = vmatprep.subr.bf16.mxu0 %v6393_v3  ;;  %v727_v10 = vld [vmem:[%s651_s5 + $0x8] sm:$0xff]  ;;  %v728_v12 = vld [vmem:[%s651_s5 + $0x10] sm:$0xff]  ;;  %v725_v15 = vld [vmem:[%s642_s4 + $0x18] sm:$0xff]  ;;  %v734_v18 = vsub.f32 %v722_v5, %v726_v6  ;;  %s7481_s3 = smov (!%p716_p8, %s6880_s3), 5  ;;  %s7469_s27 = sld [smem:[#allocation18_spill]]  ;;  %vm3952_vm6 = vcmask 1043456  }
  0x65   : > { %6396 = vmatpush3.bf16.msra.mxu0 %v6393_v3  ;;  %v731_v13 = vadd.f32 %v727_v10, %v723_v9  ;;  %v732_v14 = vadd.f32 %v728_v12, %v724_v11  ;;  %v729_v16 = vld [vmem:[%s651_s5 + $0x18] sm:$0xff]  ;;  %v735_v19 = vsub.f32 %v723_v9, %v727_v10  ;;  %v736_v20 = vsub.f32 %v724_v11, %v728_v12  ;;  %v1632_v25 = vld [vmem:[%s7422_s16] sm:$0xff]  ;;  %v1633_v26 = vld [vmem:[%s7422_s16 + $0x8] sm:$0xff]  ;;  %s7176_s0 = scalar_lea.vmem %s7426_s20, %s7481_s3  ;;  %s7183_s10 = scalar_lea.vmem %s7427_s21, %s7481_s3 }
  0x66   : > { %5995 = vmatprep.mubr.msk.f32.mxu0 %vm746_vm0, %v7023_v8  ;;  %6398 = vmatprep.subr.bf16.mxu0 %v6397_v7  ;;  %v733_v17 = vadd.f32 %v729_v16, %v725_v15  ;;  %v737_v21 = vsub.f32 %v725_v15, %v729_v16  ;;  %v1123_v22 = vmul.f32 %v7023_v8, %v7023_v8  ;;  %v1634_v30 = vld [vmem:[%s7422_s16 + $0x10] sm:$0xff]  ;;  %v1635_v31 = vld [vmem:[%s7422_s16 + $0x18] sm:$0xff]  ;;  %v1630_v6 = vld [vmem:[%s7418_s12] sm:$0xff]  ;;  %vm3948_vm7 = vcmask 31744  }
  0x67   : > { %v1124_v23 = vmul.f32 %v731_v13, %v731_v13  ;;  %v1125_v24 = vmul.f32 %v732_v14, %v732_v14  ;;  %v1309_v28 = vmul.f32 %v734_v18, %v734_v18  ;;  %v6457_v29 = vpack.c.bf16 %v1633_v26, %v1632_v25  ;;  %v738_v36 = vld [vmem:[%s7465_s11] sm:$0xff]  ;;  %v739_v45 = vld [vmem:[%s7465_s11 + $0x8] sm:$0xff]  ;;  %v740_v47 = vld [vmem:[%s7465_s11 + $0x10] sm:$0xff] }
  0x68   : > { %v1126_v27 = vmul.f32 %v733_v17, %v733_v17  ;;  %v1310_v32 = vmul.f32 %v735_v19, %v735_v19  ;;  %v1311_v33 = vmul.f32 %v736_v20, %v736_v20  ;;  %v6461_v34 = vpack.c.bf16 %v1635_v31, %v1634_v30  ;;  %6009 = vmatprep.mubr.msk.f32.mxu1 %vm746_vm0, %v738_v36  ;;  %v741_v50 = vld [vmem:[%s7465_s11 + $0x18] sm:$0xff]  ;;  %v1631_v9 = vld [vmem:[%s7418_s12 + $0x8] sm:$0xff] }
  0x69   : > { %6400 = vmatpush3.bf16.msra.mxu0 %v6397_v7  ;;  %v1312_v35 = vmul.f32 %v737_v21, %v737_v21  ;;  %v1965_v15 = vld [vmem:[%s7414_s8 + $0x8] sm:$0xff]  ;;  %vm3630_vm8 = vcmask 65536   ;;  %vm3628_vm9 = vcmask 72704   ;;  %vm3644_vm10 = vcmask 16400  }
  0x6a   : > { %6410 = vmatprep.subr.bf16.mxu0 %v6393_v3  ;;  %vm4894_vm11 = vcmask 1041408   ;;  %vm4890_vm12 = vcmask 15360   ;;  %vm4566_vm13 = vcmask 36864   ;;  %vm4579_vm14 = vcmask 24600  }
  0x6b   : > { %vm5508_vm15 = vcmask 18432  }
  0x6c   : > { %5996 = vmatmul.mubr.msk.f32.vlgmr.msra.gmra.mrb[0].mxu0 %vm746_vm0, %v731_v13 }
  0x6d   : > { %6412 = vmatpush3.bf16.msra.mxu0 %v6393_v3  ;;  %5998 = vmatprep.mubr.msk.f32.mxu0 %vm746_vm0, %v732_v14 }
  0x6e   : > { %6414 = vmatprep.subr.bf16.mxu0 %v6397_v7 }
  0x70   : > { %5999 = vmatmul.mubr.msk.f32.gmra.mrb[2].mxu0 %vm746_vm0, %v733_v17 }
  0x71   : > { %6416 = vmatpush3.bf16.msra.mxu0 %v6397_v7  ;;  %6023 = vmatprep.mubr.msk.f32.mxu0 %vm746_vm0, %v734_v18 }
  0x72   : > { %6426 = vmatprep.subr.bf16.mxu0 %v6393_v3 }
  0x74   : > { %6024 = vmatmul.mubr.msk.f32.vlgmr.msra.gmra.mrb[4].mxu0 %vm746_vm0, %v735_v19 }
  0x75   : > { %6428 = vmatpush3.bf16.msra.mxu0 %v6393_v3  ;;  %6026 = vmatprep.mubr.msk.f32.mxu0 %vm746_vm0, %v736_v20 }
  0x76   : > { %6430 = vmatprep.subr.bf16.mxu0 %v6397_v7 }
  0x78   : > { %6027 = vmatmul.mubr.msk.f32.gmra.mrb[6].mxu0 %vm746_vm0, %v737_v21 }
  0x79   : > { %6432 = vmatpush3.bf16.msra.mxu0 %v6397_v7  ;;  %6051 = vmatprep.mubr.msk.f32.mxu0 %vm746_vm0, %v1123_v22 }
  0x7a   : > { %6442 = vmatprep.subr.bf16.mxu0 %v6393_v3 }
  0x7c   : > { %6052 = vmatmul.mubr.msk.f32.vlgmr.msra.gmra.mrb[8].mxu0 %vm746_vm0, %v1124_v23 }
  0x7d   : > { %6444 = vmatpush3.bf16.msra.mxu0 %v6393_v3  ;;  %6054 = vmatprep.mubr.msk.f32.mxu0 %vm746_vm0, %v1125_v24 }
  0x7e   : > { %6446 = vmatprep.subr.bf16.mxu0 %v6397_v7 }
  0x80   : > { %6055 = vmatmul.mubr.msk.f32.gmra.mrb[10].mxu0 %vm746_vm0, %v1126_v27 }
  0x81   : > { %6448 = vmatpush3.bf16.msra.mxu0 %v6397_v7  ;;  %6079 = vmatprep.mubr.msk.f32.mxu0 %vm746_vm0, %v1309_v28 }
  0x82   : > { %6458 = vmatprep.subr.bf16.mxu0 %v6457_v29 }
  0x84   : > { %6080 = vmatmul.mubr.msk.f32.vlgmr.msra.gmra.mrb[12].mxu0 %vm746_vm0, %v1310_v32 }
  0x85   : > { %6460 = vmatpush3.bf16.msra.mxu0 %v6457_v29  ;;  %6082 = vmatprep.mubr.msk.f32.mxu0 %vm746_vm0, %v1311_v33 }
  0x86   : > { %6462 = vmatprep.subr.bf16.mxu0 %v6461_v34 }
  0x88   : > { %6083 = vmatmul.mubr.msk.f32.gmra.mrb[14].mxu0 %vm746_vm0, %v1312_v35 }
  0x89   : > { %6464 = vmatpush3.bf16.msra.mxu0 %v6461_v34  ;;  %6107 = vmatprep.mubr.msk.f32.mxu0 %vm746_vm0, %v7023_v8 }
  0x8a   : > { %6474 = vmatprep.subr.bf16.mxu0 %v6457_v29 }
  0x8c   : > { %6108 = vmatmul.mubr.msk.f32.vlgmr.msra.gmra.mrb[16].mxu0 %vm746_vm0, %v731_v13 }
  0x8d   : > { %6476 = vmatpush3.bf16.msra.mxu0 %v6457_v29  ;;  %6110 = vmatprep.mubr.msk.f32.mxu0 %vm746_vm0, %v732_v14  ;;  %v1964_v14 = vld [vmem:[%s7414_s8] sm:$0xff] }
  0x8e   : > { %6478 = vmatprep.subr.bf16.mxu0 %v6461_v34  ;;  %v7109_v16 = vpack.c.bf16 %v1965_v15, %v1964_v14 }
  0x90   : > { %6111 = vmatmul.mubr.msk.f32.gmra.mrb[18].mxu0 %vm746_vm0, %v733_v17 }
  0x91   : > { %6480 = vmatpush3.bf16.msra.mxu0 %v6461_v34  ;;  %6132 = vmatprep.mubr.msk.f32.mxu0 %vm746_vm0, %v734_v18 }
  0x94   : > { %6133 = vmatmul.mubr.msk.f32.vlgmr.msra.gmra.mrb[20].mxu0 %vm746_vm0, %v735_v19 }
  0x95   : > { %6135 = vmatprep.mubr.msk.f32.mxu0 %vm746_vm0, %v736_v20 }
  0x98   : > { %6136 = vmatmul.mubr.msk.f32.gmra.mrb[22].mxu0 %vm746_vm0, %v737_v21 }
 0x13f   : > { %v5997_v37 = vpop.f32.mrb[0].mxu0 }
 0x140   : > { %v825_v38 = vpop.f32.mrb[1].mxu0 }
 0x141   : > { %v6401_v39 = vpack.c.bf16 %v5997_v37, %v825_v38 }
 0x143   : > { %v6000_v40 = vpop.f32.mrb[2].mxu0  ;;  %6402 = vmatprep.subr.bf16.mxu1 %v6401_v39 }
 0x144   : > { %v835_v41 = vpop.f32.mrb[3].mxu0  ;;  %6404 = vmatpush3.bf16.msra.mxu1 %v6401_v39 }
 0x145   : > { %v6405_v42 = vpack.c.bf16 %v6000_v40, %v835_v41 }
 0x147   : > { %6406 = vmatprep.subr.bf16.mxu1 %v6405_v42  ;;  %v6025_v43 = vpop.f32.mrb[4].mxu0 }
 0x148   : > { %6408 = vmatpush3.bf16.msra.mxu1 %v6405_v42  ;;  %v1019_v44 = vpop.f32.mrb[5].mxu0 }
 0x149   : > { %v6417_v46 = vpack.c.bf16 %v6025_v43, %v1019_v44 }
 0x14b   : > { %6010 = vmatmul.mubr.msk.f32.vlgmr.msra.gmra.mrb[0].mxu1 %vm746_vm0, %v739_v45  ;;  %v6028_v48 = vpop.f32.mrb[6].mxu0  ;;  %6418 = vmatprep.subr.bf16.mxu1 %v6417_v46 }
 0x14c   : > { %v1029_v49 = vpop.f32.mrb[7].mxu0  ;;  %6420 = vmatpush3.bf16.msra.mxu1 %v6417_v46  ;;  %6012 = vmatprep.mubr.msk.f32.mxu1 %vm746_vm0, %v740_v47 }
 0x14d   : > { %v6421_v51 = vpack.c.bf16 %v6028_v48, %v1029_v49 }
 0x14f   : > { %6013 = vmatmul.mubr.msk.f32.gmra.mrb[2].mxu1 %vm746_vm0, %v741_v50  ;;  %6422 = vmatprep.subr.bf16.mxu1 %v6421_v51  ;;  %v6053_v52 = vpop.f32.mrb[8].mxu0 }
 0x150   : > { %6424 = vmatpush3.bf16.msra.mxu1 %v6421_v51  ;;  %v1205_v53 = vpop.f32.mrb[9].mxu0  ;;  %6037 = vmatprep.mubr.msk.f32.mxu1 %vm746_vm0, %v738_v36 }
 0x151   : > { %v6433_v54 = vpack.c.bf16 %v6053_v52, %v1205_v53 }
 0x153   : > { %6038 = vmatmul.mubr.msk.f32.vlgmr.msra.gmra.mrb[4].mxu1 %vm746_vm0, %v739_v45  ;;  %v6056_v55 = vpop.f32.mrb[10].mxu0  ;;  %6434 = vmatprep.subr.bf16.mxu1 %v6433_v54 }
 0x154   : > { %v1215_v56 = vpop.f32.mrb[11].mxu0  ;;  %6436 = vmatpush3.bf16.msra.mxu1 %v6433_v54  ;;  %6040 = vmatprep.mubr.msk.f32.mxu1 %vm746_vm0, %v740_v47 }
 0x155   : > { %v6437_v57 = vpack.c.bf16 %v6056_v55, %v1215_v56 }
 0x157   : > { %6041 = vmatmul.mubr.msk.f32.gmra.mrb[6].mxu1 %vm746_vm0, %v741_v50  ;;  %6438 = vmatprep.subr.bf16.mxu1 %v6437_v57  ;;  %v6081_v58 = vpop.f32.mrb[12].mxu0 }
 0x158   : > { %6440 = vmatpush3.bf16.msra.mxu1 %v6437_v57  ;;  %v1391_v59 = vpop.f32.mrb[13].mxu0  ;;  %6065 = vmatprep.mubr.msk.f32.mxu1 %vm746_vm0, %v738_v36 }
 0x159   : > { %v6449_v60 = vpack.c.bf16 %v6081_v58, %v1391_v59 }
 0x15b   : > { %6066 = vmatmul.mubr.msk.f32.vlgmr.msra.gmra.mrb[8].mxu1 %vm746_vm0, %v739_v45  ;;  %v6084_v61 = vpop.f32.mrb[14].mxu0  ;;  %6450 = vmatprep.subr.bf16.mxu1 %v6449_v60 }
 0x15c   : > { %v1401_v62 = vpop.f32.mrb[15].mxu0  ;;  %6452 = vmatpush3.bf16.msra.mxu1 %v6449_v60  ;;  %6068 = vmatprep.mubr.msk.f32.mxu1 %vm746_vm0, %v740_v47 }
 0x15d   : > { %v6453_v63 = vpack.c.bf16 %v6084_v61, %v1401_v62 }
 0x15f   : > { %6069 = vmatmul.mubr.msk.f32.gmra.mrb[10].mxu1 %vm746_vm0, %v741_v50  ;;  %6454 = vmatprep.subr.bf16.mxu1 %v6453_v63  ;;  %v6109_v0 = vpop.f32.mrb[16].mxu0 }
 0x160   : > { %6456 = vmatpush3.bf16.msra.mxu1 %v6453_v63  ;;  %v1702_v1 = vpop.f32.mrb[17].mxu0  ;;  %6093 = vmatprep.mubr.msk.f32.mxu1 %vm746_vm0, %v738_v36 }
 0x161   : > { %v6465_v2 = vpack.c.bf16 %v6109_v0, %v1702_v1 }
 0x163   : > { %6094 = vmatmul.mubr.msk.f32.vlgmr.msra.gmra.mrb[12].mxu1 %vm746_vm0, %v739_v45  ;;  %v6112_v3 = vpop.f32.mrb[18].mxu0  ;;  %6466 = vmatprep.subr.bf16.mxu1 %v6465_v2 }
 0x164   : > { %v1712_v4 = vpop.f32.mrb[19].mxu0  ;;  %6468 = vmatpush3.bf16.msra.mxu1 %v6465_v2  ;;  %6096 = vmatprep.mubr.msk.f32.mxu1 %vm746_vm0, %v740_v47 }
 0x165   : > { %v6469_v5 = vpack.c.bf16 %v6112_v3, %v1712_v4 }
 0x167   : > { %6097 = vmatmul.mubr.msk.f32.gmra.mrb[14].mxu1 %vm746_vm0, %v741_v50  ;;  %6470 = vmatprep.subr.bf16.mxu1 %v6469_v5  ;;  %v6134_v7 = vpop.f32.mrb[20].mxu0 }
 0x168   : > { %6472 = vmatpush3.bf16.msra.mxu1 %v6469_v5  ;;  %v1868_v8 = vpop.f32.mrb[21].mxu0  ;;  %6121 = vmatprep.mubr.msk.f32.mxu1 %vm746_vm0, %v1630_v6 }
 0x169   : > { %v6481_v10 = vpack.c.bf16 %v6134_v7, %v1868_v8 }
 0x16b   : > { %6122 = vmatmul.mubr.msk.f32.vlgmr.msra.gmra.mrb[16].mxu1 %vm746_vm0, %v1631_v9  ;;  %v6137_v11 = vpop.f32.mrb[22].mxu0  ;;  %6482 = vmatprep.subr.bf16.mxu1 %v6481_v10 }
 0x16c   : > { %v1878_v12 = vpop.f32.mrb[23].mxu0  ;;  %6484 = vmatpush3.bf16.msra.mxu1 %v6481_v10  ;;  %6146 = vmatprep.mubr.msk.f32.mxu1 %vm746_vm0, %v1630_v6 }
 0x16d   : > { %v6485_v13 = vpack.c.bf16 %v6137_v11, %v1878_v12 }
 0x16f   : > { %6486 = vmatprep.subr.bf16.mxu1 %v6485_v13 }
 0x170   : > { %6488 = vmatpush3.bf16.msra.mxu1 %v6485_v13 }
 0x171   : > { %6490 = vmatprep.subr.bf16.mxu1 %v7109_v16 }
 0x173   : > { %6147 = vmatmul.mubr.msk.f32.vlgmr.msra.gmra.mrb[18].mxu1 %vm746_vm0, %v1631_v9 }
 0x174   : > { %6492 = vmatpush3.bf16.msra.mxu1 %v7109_v16 }
 0x175   : > { %6498 = vmatprep.subr.bf16.mxu1 %v7109_v16 }
 0x21e   : > { %v6011_v17 = vpop.f32.mrb[0].mxu1 }
 0x21f   : > { %v922_v18 = vpop.f32.mrb[1].mxu1  ;;  %v1496_v22 = vmul.f32 %v6011_v17, %v6011_v17 }
 0x220   : > { %v1495_v25 = vmul.f32 %v922_v18, %v922_v18 }
 0x222   : > { %v6014_v19 = vpop.f32.mrb[2].mxu1 }
 0x223   : > { %v932_v20 = vpop.f32.mrb[3].mxu1  ;;  %v1498_v32 = vmul.f32 %v6014_v19, %v6014_v19 }
 0x224   : > { %v1497_v35 = vmul.f32 %v932_v20, %v932_v20 }
 0x226   : > { %v6039_v21 = vpop.f32.mrb[4].mxu1 }
 0x227   : > { %v1500_v23 = vmul.f32 %v6039_v21, %v6039_v21  ;;  %v1104_v24 = vpop.f32.mrb[5].mxu1 }
 0x228   : > { %v1499_v26 = vmul.f32 %v1104_v24, %v1104_v24 }
 0x229   : > { %v1504_v27 = vsub.f32 %v1496_v22, %v1500_v23  ;;  %v1512_v28 = vadd.f32 %v1500_v23, %v1496_v22 }
 0x22a   : > { %v1503_v29 = vsub.f32 %v1495_v25, %v1499_v26  ;;  %v1511_v30 = vadd.f32 %v1499_v26, %v1495_v25  ;;  %v6042_v31 = vpop.f32.mrb[6].mxu1 }
 0x22b   : > { %v1502_v33 = vmul.f32 %v6042_v31, %v6042_v31  ;;  %v1114_v34 = vpop.f32.mrb[7].mxu1  ;;  %v1508_v43 = vmul.f32 0.25, %v1504_v27  ;;  %v1516_v46 = vmul.f32 0.5, %v1512_v28 }
 0x22c   : > { %v1501_v36 = vmul.f32 %v1114_v34, %v1114_v34  ;;  %v1507_v44 = vmul.f32 0.25, %v1503_v29  ;;  %v1515_v47 = vmul.f32 0.5, %v1511_v30 }
 0x22d   : > { %v1506_v37 = vsub.f32 %v1498_v32, %v1502_v33  ;;  %v1514_v38 = vadd.f32 %v1502_v33, %v1498_v32  ;;  %v1556_v49 = vmul.f32 2.0, %v1508_v43  ;;  %v1568_v55 = vadd.f32 6.5025, %v1516_v46 }
 0x22e   : > { %v1505_v39 = vsub.f32 %v1497_v35, %v1501_v36  ;;  %v1513_v40 = vadd.f32 %v1501_v36, %v1497_v35  ;;  %v6067_v41 = vpop.f32.mrb[8].mxu1  ;;  %v1555_v50 = vmul.f32 2.0, %v1507_v44  ;;  %v1567_v56 = vadd.f32 6.5025, %v1515_v47 }
 0x22f   : > { %v1290_v42 = vpop.f32.mrb[9].mxu1  ;;  %v1510_v51 = vmul.f32 0.25, %v1506_v37  ;;  %v1518_v52 = vmul.f32 0.5, %v1514_v38  ;;  %v1560_v60 = vadd.f32 6.5025, %v1556_v49 }
 0x230   : > { %v1509_v53 = vmul.f32 0.25, %v1505_v39  ;;  %v1559_v61 = vadd.f32 6.5025, %v1555_v50  ;;  %v1517_v1 = vmul.f32 0.5, %v1513_v40 }
 0x231   : > { %v1558_v0 = vmul.f32 2.0, %v1510_v51  ;;  %v1570_v4 = vadd.f32 6.5025, %v1518_v52 }
 0x232   : > { %v6070_v45 = vpop.f32.mrb[10].mxu1  ;;  %v1557_v5 = vmul.f32 2.0, %v1509_v53 }
 0x233   : > { %v1300_v48 = vpop.f32.mrb[11].mxu1 }
 0x236   : > { %v6095_v54 = vpop.f32.mrb[12].mxu1 }
 0x237   : > { %v1520_v57 = vsub.f32 %v6067_v41, %v6095_v54  ;;  %v1532_v58 = vadd.f32 %v6095_v54, %v6067_v41  ;;  %v1476_v59 = vpop.f32.mrb[13].mxu1  ;;  %v1562_v41 = vadd.f32 6.5025, %v1558_v0 }
 0x238   : > { %v1519_v62 = vsub.f32 %v1290_v42, %v1476_v59  ;;  %v1531_v63 = vadd.f32 %v1476_v59, %v1290_v42 }
 0x239   : > { %v1524_v2 = vmul.f32 0.25, %v1520_v57  ;;  %v1536_v3 = vmul.f32 0.5, %v1532_v58 }
 0x23a   : > { %v1523_v6 = vmul.f32 0.25, %v1519_v62  ;;  %v1535_v7 = vmul.f32 0.5, %v1531_v63  ;;  %v6098_v8 = vpop.f32.mrb[14].mxu1 }
 0x23b   : > { %v1528_v9 = vsub.f32 %v1524_v2, %v1508_v43  ;;  %v1540_v10 = vsub.f32 %v1536_v3, %v1516_v46  ;;  %v1522_v11 = vsub.f32 %v6070_v45, %v6098_v8  ;;  %v1534_v12 = vadd.f32 %v6098_v8, %v6070_v45  ;;  %v1486_v13 = vpop.f32.mrb[15].mxu1 }
 0x23c   : > { %v1527_v14 = vsub.f32 %v1523_v6, %v1507_v44  ;;  %v1539_v15 = vsub.f32 %v1535_v7, %v1515_v47  ;;  %v1521_v17 = vsub.f32 %v1300_v48, %v1486_v13  ;;  %v1533_v18 = vadd.f32 %v1486_v13, %v1300_v48 }
 0x23d   : > { %v1544_v19 = vmul.f32 2.0, %v1528_v9  ;;  %v1552_v20 = vadd.f32 58.5225, %v1540_v10  ;;  %v1526_v21 = vmul.f32 0.25, %v1522_v11  ;;  %v1538_v22 = vmul.f32 0.5, %v1534_v12 }
 0x23e   : > { %v1543_v23 = vmul.f32 2.0, %v1527_v14  ;;  %v1551_v24 = vadd.f32 58.5225, %v1539_v15  ;;  %v1525_v25 = vmul.f32 0.25, %v1521_v17  ;;  %v1537_v26 = vmul.f32 0.5, %v1533_v18  ;;  %v7114_v27 = vpop.f32.mrb[16].mxu1 }
 0x23f   : > { %v1548_v28 = vadd.f32 58.5225, %v1544_v19  ;;  %v1572_v29 = vmul.f32 %v1568_v55, %v1552_v20  ;;  %6604 = vrcp.f32 %v1552_v20  ;;  %v1530_v30 = vsub.f32 %v1526_v21, %v1510_v51  ;;  %v7116_v31 = vpop.f32.mrb[17].mxu1  ;;  %v2681_v55 = vld [vmem:[%s7423_s17] sm:$0xff] }
 0x240   : > { %v1547_v32 = vadd.f32 58.5225, %v1543_v23  ;;  %v1571_v33 = vmul.f32 %v1567_v56, %v1551_v24  ;;  %6606 = vrcp.f32 %v1551_v24  ;;  %v1542_v34 = vsub.f32 %v1538_v22, %v1518_v52  ;;  %6153 = vmatprep.mubr.msk.f32.mxu1 %vm1966_vm1, %v7116_v31  ;;  %v2682_v56 = vld [vmem:[%s7423_s17 + $0x8] sm:$0xff] }
 0x241   : > { %v1564_v35 = vmul.f32 %v1560_v60, %v1548_v28  ;;  %6608 = vrcp.f32 %v1572_v29  ;;  %v1546_v36 = vmul.f32 2.0, %v1530_v30  ;;  %v1529_v37 = vsub.f32 %v1525_v25, %v1509_v53  ;;  %6154 = vmatmul.mubr.msk.f32.vlgmr.msra.gmra.mrb[20].mxu1 %vm1966_vm1, %v7114_v27 }
 0x242   : > { %v1563_v38 = vmul.f32 %v1559_v61, %v1547_v32  ;;  %6610 = vrcp.f32 %v1571_v33  ;;  %v1554_v39 = vadd.f32 58.5225, %v1542_v34  ;;  %v1541_v40 = vsub.f32 %v1537_v26, %v1517_v1  ;;  %6500 = vmatpush3.bf16.msra.mxu1 %v7109_v16 }
 0x243   : > { %v1545_v42 = vmul.f32 2.0, %v1529_v37  ;;  %6506 = vmatprep.subr.bf16.mxu1 %v7109_v16  ;;  %v1550_v43 = vadd.f32 58.5225, %v1546_v36  ;;  %v1569_v44 = vadd.f32 6.5025, %v1517_v1  ;;  %v2285_v54 = vmul.f32 %v7116_v31, %v7116_v31 }
 0x244   : > { %v1574_v45 = vmul.f32 %v1570_v4, %v1554_v39  ;;  %6612 = vrcp.f32 %v1554_v39  ;;  %v1553_v46 = vadd.f32 58.5225, %v1541_v40  ;;  %v1561_v47 = vadd.f32 6.5025, %v1557_v5 }
 0x245   : > { %v1549_v48 = vadd.f32 58.5225, %v1545_v42  ;;  %v1566_v49 = vmul.f32 %v1562_v41, %v1550_v43  ;;  %v2286_v61 = vmul.f32 %v7114_v27, %v7114_v27  ;;  %v6521_v62 = vpack.c.bf16 %v2682_v56, %v2681_v55 }
 0x246   : > { %6614 = vrcp.f32 %v1574_v45  ;;  %v1573_v50 = vmul.f32 %v1569_v44, %v1553_v46  ;;  %v6148_v51 = vpop.f32.mrb[18].mxu1 }
 0x247   : > { %v1565_v52 = vmul.f32 %v1561_v47, %v1549_v48  ;;  %6616 = vrcp.f32 %v1553_v46  ;;  %v1953_v53 = vpop.f32.mrb[19].mxu1  ;;  %v2444_v9 = vmul.f32 %v6148_v51, %v6148_v51  ;;  %v1963_v46 = vld [vmem:[%s7466_s15 + $0x8] sm:$0xff] }
 0x248   : > { %6618 = vrcp.f32 %v1573_v50  ;;  %6167 = vmatprep.mubr.msk.f32.mxu1 %vm1966_vm1, %v1953_v53  ;;  %v2443_v1 = vmul.f32 %v1953_v53, %v1953_v53 }
 0x249   : > { %v6605_v57 = vpop.eup %6604  ;;  %6168 = vmatmul.mubr.msk.f32.vlgmr.msra.gmra.mrb[22].mxu1 %vm1966_vm1, %v6148_v51 }
 0x24a   : > { %v6607_v58 = vpop.eup %6606  ;;  %6508 = vmatpush3.bf16.msra.mxu1 %v7109_v16  ;;  %6181 = vmatprep.mubr.msk.f32.mxu1 %vm1966_vm1, %v2285_v54  ;;  %v1586_v59 = vmul.f32 %v6605_v57, %v1548_v28  ;;  %v6748_v28 = vmov 0.0  }
 0x24b   : > { %v6609_v60 = vpop.eup %6608  ;;  %6514 = vmatprep.subr.bf16.mxu1 %v7109_v16  ;;  %v1584_v63 = vmul.f32 %v6607_v58, %v1547_v32 }
 0x24c   : > { %v6611_v0 = vpop.eup %6610  ;;  %v1612_v2 = vsel %vm746_vm0, %v1586_v59, 0.0  ;;  %v1578_v3 = vmul.f32 %v6609_v60, %v1564_v35  ;;  %v6750_v59 = vmov 0.0|0.0  }
 0x24d   : > { %6182 = vmatmul.mubr.msk.f32.vlgmr.msra.gmra.mrb[24].mxu1 %vm1966_vm1, %v2286_v61  ;;  %v1611_v4 = vsel %vm746_vm0, %v1584_v63, 0.0  ;;  %v1576_v5 = vmul.f32 %v6611_v0, %v1563_v38  ;;  %v2680_v0 = vld [vmem:[%s7419_s13] sm:$0xff] }
 0x24e   : > { %v6613_v6 = vpop.eup %6612  ;;  %6516 = vmatpush3.bf16.msra.mxu1 %v7109_v16  ;;  %6195 = vmatprep.mubr.msk.f32.mxu1 %vm1966_vm1, %v2443_v1  ;;  %v1613_v7 = vadd.f32 %v1612_v2, %v1611_v4  ;;  %v1592_v8 = vsel %vm746_vm0, %v1578_v3, 0.0  ;;  %v7200_v2 = vld [vmem:[%s7415_s9] sm:$0xff] }
 0x24f   : > { %6522 = vmatprep.subr.bf16.mxu1 %v6521_v62  ;;  %v1590_v10 = vmul.f32 %v6613_v6, %v1550_v43  ;;  %v1591_v11 = vsel %vm746_vm0, %v1576_v5, 0.0 }
 0x250   : > { %v6615_v12 = vpop.eup %6614  ;;  %v1593_v13 = vadd.f32 %v1592_v8, %v1591_v11 }
 0x251   : > { %v6617_v14 = vpop.eup %6616  ;;  %6196 = vmatmul.mubr.msk.f32.vlgmr.msra.gmra.mrb[26].mxu1 %vm1966_vm1, %v2444_v9  ;;  %v1582_v15 = vmul.f32 %v6615_v12, %v1566_v49  ;;  %v1616_v22 = vsel %vm746_vm0, %v1590_v10, 0.0 }
 0x252   : > { %v6619_v17 = vpop.eup %6618  ;;  %6524 = vmatpush3.bf16.msra.mxu1 %v6521_v62  ;;  %6209 = vmatprep.mubr.msk.f32.mxu1 %vm1966_vm1, %v7116_v31  ;;  %v1588_v16 = vmul.f32 %v6617_v14, %v1549_v48 }
 0x253   : > { %6529 = vmatprep.subr.bf16.mxu1 %v6521_v62  ;;  %v1580_v18 = vmul.f32 %v6619_v17, %v1565_v52  ;;  %v1596_v25 = vsel %vm746_vm0, %v1582_v15, 0.0 }
 0x254   : > { %v1614_v19 = vsel %vm746_vm0, %v1588_v16, 0.0 }
 0x255   : > { %6210 = vmatmul.mubr.msk.f32.vlgmr.msra.gmra.mrb[28].mxu1 %vm1966_vm1, %v7114_v27  ;;  %v1615_v20 = vadd.f32 %v1614_v19, %v1613_v7  ;;  %v1594_v21 = vsel %vm746_vm0, %v1580_v18, 0.0  ;;  %v1962_v27 = vld [vmem:[%s7466_s15] sm:$0xff]  ;;  %vm5521_vm0 = vcmask 32800  }
 0x256   : > { %6531 = vmatpush3.bf16.msra.mxu1 %v6521_v62  ;;  %6223 = vmatprep.mubr.msk.f32.mxu1 %vm1966_vm1, %v1953_v53  ;;  %v1595_v23 = vadd.f32 %v1594_v21, %v1593_v13 }
 0x257   : > { %v1617_v24 = vadd.f32 %v1616_v22, %v1615_v20  ;;  %6160 = vmatprep.mubr.msk.f32.mxu0 %vm1966_vm1, %v1962_v27  ;;  %6233 = vmatprep.subr.mxu1 %v6748_v28 }
 0x258   : > { %v1597_v26 = vadd.f32 %v1596_v25, %v1595_v23 }
 0x259   : > { %1618 = vadd.xlane.f32.xlu0 %v1617_v24  ;;  %6224 = vmatmul.mubr.msk.f32.vlgmr.msra.gmra.mrb[30].mxu1 %vm1966_vm1, %v6148_v51 }
 0x25a   : > { %6235 = vmatprep.mubr.msk.f32.mxu1 %vm6749_vm2, %v6748_v28  ;;  %6234 = vmatpush3.msra.mxu1 %v7200_v2 }
 0x25b   : > { %6243 = vmatprep.subr.mxu1 %v6748_v28 }
 0x25d   : > { %1598 = vadd.xlane.f32.xlu0 %v1597_v26 }
 0x2e6   : > { %v1619_v29 = vpop.xlane.xlu0 %1618 }
 0x2e7   : > { %v1620_v30 = vrot.slane %v1619_v29, 4 }
 0x2e9   : > { %v1621_v31 = vadd.f32 %v1620_v30, %v1619_v29 }
 0x2ea   : > { %v1599_v32 = vpop.xlane.xlu0 %1598 }
 0x2eb   : > { %v1622_v33 = vrot.slane %v1621_v31, 2  ;;  %v1600_v34 = vrot.slane %v1599_v32, 4 }
 0x2ed   : > { %v1601_v35 = vadd.f32 %v1600_v34, %v1599_v32  ;;  %v1623_v36 = vadd.f32 %v1622_v33, %v1621_v31 }
 0x2ef   : > { %v1602_v37 = vrot.slane %v1601_v35, 2  ;;  %v1624_v39 = vrot.slane %v1623_v36, 1 }
 0x2f1   : > { %v1603_v38 = vadd.f32 %v1602_v37, %v1601_v35  ;;  %v1625_v42 = vadd.f32 %v1624_v39, %v1623_v36 }
 0x2f3   : > { %v1604_v40 = vrot.slane %v1603_v38, 1 }
 0x2f5   : > { %v1605_v41 = vadd.f32 %v1604_v40, %v1603_v38 }
 0x2f7   : > { %6535 = vpush %v1605_v41 }
 0x2f8   : > { %6537 = vpush %v1625_v42 }
 0x314   : > { %v6155_v43 = vpop.f32.mrb[20].mxu1 }
 0x315   : > { %v2039_v44 = vpop.f32.mrb[21].mxu1 }
 0x316   : > { %v6493_v45 = vpack.c.bf16 %v6155_v43, %v2039_v44 }
 0x318   : > { %6494 = vmatprep.subr.bf16.mxu0 %v6493_v45 }
 0x319   : > { %6496 = vmatpush3.bf16.msra.mxu0 %v6493_v45 }
 0x31c   : > { %v6169_v47 = vpop.f32.mrb[22].mxu1  ;;  %6161 = vmatmul.mubr.msk.f32.vlgmr.msra.gmra.mrb[24].mxu0 %vm1966_vm1, %v1963_v46 }
 0x31d   : > { %v2201_v48 = vpop.f32.mrb[23].mxu1  ;;  %6174 = vmatprep.mubr.msk.f32.mxu0 %vm1966_vm1, %v1962_v27 }
 0x31e   : > { %v6501_v49 = vpack.c.bf16 %v6169_v47, %v2201_v48 }
 0x320   : > { %6502 = vmatprep.subr.bf16.mxu0 %v6501_v49  ;;  %v6183_v50 = vpop.f32.mrb[24].mxu1 }
 0x321   : > { %6504 = vmatpush3.bf16.msra.mxu0 %v6501_v49  ;;  %v2359_v51 = vpop.f32.mrb[25].mxu1 }
 0x322   : > { %v6509_v52 = vpack.c.bf16 %v6183_v50, %v2359_v51 }
 0x324   : > { %6175 = vmatmul.mubr.msk.f32.vlgmr.msra.gmra.mrb[26].mxu0 %vm1966_vm1, %v1963_v46  ;;  %6510 = vmatprep.subr.bf16.mxu0 %v6509_v52  ;;  %v6197_v53 = vpop.f32.mrb[26].mxu1 }
 0x325   : > { %6512 = vmatpush3.bf16.msra.mxu0 %v6509_v52  ;;  %v2517_v54 = vpop.f32.mrb[27].mxu1  ;;  %6188 = vmatprep.mubr.msk.f32.mxu0 %vm1966_vm1, %v1962_v27 }
 0x326   : > { %v6517_v55 = vpack.c.bf16 %v6197_v53, %v2517_v54 }
 0x328   : > { %s6536_s2 = spop %6535  ;;  %6189 = vmatmul.mubr.msk.f32.vlgmr.msra.gmra.mrb[28].mxu0 %vm1966_vm1, %v1963_v46  ;;  %6518 = vmatprep.subr.bf16.mxu0 %v6517_v55  ;;  %v6211_v56 = vpop.f32.mrb[28].mxu1 }
 0x329   : > { %s1607_s24 = smul.f32 0.0009765625, %s6536_s2  ;;  %s6538_s4 = spop %6537  ;;  %6520 = vmatpush3.bf16.msra.mxu0 %v6517_v55  ;;  %v2749_v57 = vpop.f32.mrb[29].mxu1  ;;  %6202 = vmatprep.mubr.msk.f32.mxu0 %vm1966_vm1, %v1962_v27 }
 0x32a   : > { %s1627_s29 = smul.f32 0.0009765625, %s6538_s4  ;;  %v6526_v58 = vpack.c.bf16 %v6211_v56, %v2749_v57  ;;  %6525 = vmatprep.subr.bf16.mxu0 %v6750_v59  ;;  %s7467_s2 = sld [smem:[#allocation15_spill]] }
 0x32b   : > { %v1608_v60 = vstv %s1607_s24  ;;  %s7470_s4 = sld [smem:[#allocation21_spill]] }
 0x32c   : > { %1610 = vst.msk [vmem:[%s7176_s0] sm:$0x1] %vm1609_vm3, %v1608_v60  ;;  %v1628_v61 = vstv %s1627_s29  ;;  %6203 = vmatmul.mubr.msk.f32.vlgmr.msra.gmra.mrb[30].mxu0 %vm1966_vm1, %v1963_v46  ;;  %v6225_v62 = vpop.f32.mrb[30].mxu1  ;;  %s7471_s29 = sld [smem:[#allocation16_spill]] }
 0x32d   : > { %1629 = vst.msk [vmem:[%s7183_s10] sm:$0x1] %vm1609_vm3, %v1628_v61  ;;  %6527 = vmatpush3.bf16.msra.mxu0 %v6526_v58  ;;  %v2897_v63 = vpop.f32.mrb[31].mxu1  ;;  %6216 = vmatprep.mubr.msk.f32.mxu0 %vm6749_vm2, %v6748_v28  ;;  %v3662_v58 = vld [vmem:[%s7424_s18] sm:$0xff] }
 0x32e   : > { %v6533_v1 = vpack.c.bf16 %v6225_v62, %v2897_v63  ;;  %6532 = vmatprep.subr.bf16.mxu0 %v6750_v59 }
 0x330   : > { %6217 = vmatmul.mubr.msk.f32.vlgmr.msra.gmra.mrb[32].mxu0 %vm1966_vm1, %v2680_v0  ;;  %s7468_s24 = smov %s7467_s2 }
 0x331   : > { %6534 = vmatpush3.bf16.msra.mxu0 %v6533_v1  ;;  %6230 = vmatprep.mubr.msk.f32.mxu0 %vm6749_vm2, %v6748_v28 }
 0x334   : > { %6231 = vmatmul.mubr.msk.f32.vlgmr.msra.gmra.mrb[34].mxu0 %vm1966_vm1, %v2680_v0 }
 0x3ef   : > { %v6162_v3 = vpop.f32.mrb[24].mxu0 }
 0x3f0   : > { %v2120_v4 = vpop.f32.mrb[25].mxu0  ;;  %v2602_v6 = vmul.f32 %v6162_v3, %v6162_v3 }
 0x3f1   : > { %v2601_v9 = vmul.f32 %v2120_v4, %v2120_v4 }
 0x3f7   : > { %v6176_v5 = vpop.f32.mrb[26].mxu0 }
 0x3f8   : > { %v2604_v7 = vmul.f32 %v6176_v5, %v6176_v5  ;;  %v2276_v8 = vpop.f32.mrb[27].mxu0 }
 0x3f9   : > { %v2603_v10 = vmul.f32 %v2276_v8, %v2276_v8 }
 0x3fa   : > { %v2606_v11 = vsub.f32 %v2602_v6, %v2604_v7  ;;  %v2610_v12 = vadd.f32 %v2604_v7, %v2602_v6 }
 0x3fb   : > { %v2605_v13 = vsub.f32 %v2601_v9, %v2603_v10  ;;  %v2609_v14 = vadd.f32 %v2603_v10, %v2601_v9  ;;  %v6190_v15 = vpop.f32.mrb[28].mxu0  ;;  %v2976_v9 = vld [vmem:[%s7467_s2] sm:$0xff] }
 0x3fc   : > { %v2434_v17 = vpop.f32.mrb[29].mxu0  ;;  %v2608_v18 = vmul.f32 0.25, %v2606_v11  ;;  %v2612_v25 = vmul.f32 0.5, %v2610_v12  ;;  %6240 = vmatprep.mubr.msk.f32.mxu0 %vm2979_vm4, %v2976_v9 }
 0x3fd   : > { %v2607_v22 = vmul.f32 0.25, %v2605_v13  ;;  %v2611_v29 = vmul.f32 0.5, %v2609_v14 }
 0x3fe   : > { %v2632_v33 = vmul.f32 2.0, %v2608_v18  ;;  %v2638_v40 = vadd.f32 6.5025, %v2612_v25 }
 0x3ff   : > { %v6204_v16 = vpop.f32.mrb[30].mxu0  ;;  %v2631_v37 = vmul.f32 2.0, %v2607_v22  ;;  %v2637_v43 = vadd.f32 6.5025, %v2611_v29 }
 0x400   : > { %v2614_v19 = vsub.f32 %v6190_v15, %v6204_v16  ;;  %v2620_v20 = vadd.f32 %v6204_v16, %v6190_v15  ;;  %v2592_v21 = vpop.f32.mrb[31].mxu0  ;;  %v2634_v47 = vadd.f32 6.5025, %v2632_v33 }
 0x401   : > { %v2613_v23 = vsub.f32 %v2434_v17, %v2592_v21  ;;  %v2619_v24 = vadd.f32 %v2592_v21, %v2434_v17  ;;  %v2633_v51 = vadd.f32 6.5025, %v2631_v37 }
 0x402   : > { %v2616_v26 = vmul.f32 0.25, %v2614_v19  ;;  %v2622_v27 = vmul.f32 0.5, %v2620_v20 }
 0x403   : > { %v2615_v30 = vmul.f32 0.25, %v2613_v23  ;;  %v2621_v31 = vmul.f32 0.5, %v2619_v24  ;;  %v2827_v32 = vpop.f32.mrb[32].mxu0 }
 0x404   : > { %v2618_v34 = vsub.f32 %v2616_v26, %v2608_v18  ;;  %v2624_v35 = vsub.f32 %v2622_v27, %v2612_v25  ;;  %v6218_v36 = vpop.f32.mrb[33].mxu0  ;;  %6236 = vmatmul.mubr.msk.f32.vlgmr.msra.gmra.mrb[32].mxu1 %vm2979_vm4, %v2827_v32  ;;  %v3282_v54 = vmul.f32 %v2827_v32, %v2827_v32  ;;  %v2977_v25 = vld [vmem:[%s7468_s24 + $0x8] sm:$0x1] }
 0x405   : > { %v2617_v38 = vsub.f32 %v2615_v30, %v2607_v22  ;;  %v2623_v39 = vsub.f32 %v2621_v31, %v2611_v29  ;;  %6244 = vmatpush3.msra.mxu1 %v7200_v2  ;;  %6245 = vmatprep.mubr.msk.f32.mxu1 %vm6749_vm2, %v6748_v28 }
 0x406   : > { %v2626_v41 = vmul.f32 2.0, %v2618_v34  ;;  %v2630_v42 = vadd.f32 58.5225, %v2624_v35  ;;  %6253 = vmatprep.subr.mxu1 %v6748_v28  ;;  %v3661_v35 = vld [vmem:[%s7420_s14] sm:$0xf] }
 0x407   : > { %v2625_v44 = vmul.f32 2.0, %v2617_v38  ;;  %v2629_v45 = vadd.f32 58.5225, %v2623_v39  ;;  %v2972_v46 = vpop.f32.mrb[34].mxu0 }
 0x408   : > { %v2640_v48 = vmul.f32 %v2638_v40, %v2630_v42  ;;  %6620 = vrcp.f32 %v2630_v42  ;;  %v6232_v49 = vpop.f32.mrb[35].mxu0  ;;  %6246 = vmatmul.mubr.msk.f32.vlgmr.msra.gmra.mrb[34].mxu1 %vm2979_vm4, %v2972_v46  ;;  %v2628_v50 = vadd.f32 58.5225, %v2626_v41  ;;  %v3431_v57 = vmul.f32 %v2972_v46, %v2972_v46  ;;  %v7270_v41 = vld [vmem:[%s7469_s27] sm:$0xf] }
 0x409   : > { %v2639_v52 = vmul.f32 %v2637_v43, %v2629_v45  ;;  %6622 = vrcp.f32 %v2629_v45  ;;  %6254 = vmatpush3.msra.mxu1 %v7200_v2  ;;  %6255 = vmatprep.mubr.msk.f32.mxu1 %vm6749_vm2, %v6748_v28  ;;  %v2627_v53 = vadd.f32 58.5225, %v2625_v44 }
 0x40a   : > { %6624 = vrcp.f32 %v2640_v48  ;;  %6263 = vmatprep.subr.mxu1 %v6748_v28  ;;  %v2636_v55 = vmul.f32 %v2634_v47, %v2628_v50 }
 0x40b   : > { %6626 = vrcp.f32 %v2639_v52  ;;  %v2635_v56 = vmul.f32 %v2633_v51, %v2627_v53 }
 0x40c   : > { %6256 = vmatmul.mubr.msk.f32.vlgmr.msra.gmra.mrb[36].mxu1 %vm2979_vm4, %v3282_v54 }
 0x40d   : > { %6264 = vmatpush3.msra.mxu1 %v7200_v2  ;;  %6265 = vmatprep.mubr.msk.f32.mxu1 %vm6749_vm2, %v6748_v28 }
 0x40e   : > { %6273 = vmatprep.subr.mxu1 %v6748_v28 }
 0x410   : > { %6266 = vmatmul.mubr.msk.f32.vlgmr.msra.gmra.mrb[38].mxu1 %vm2979_vm4, %v3431_v57 }
 0x411   : > { %6274 = vmatpush3.msra.mxu1 %v3662_v58  ;;  %6275 = vmatprep.mubr.msk.f32.mxu1 %vm6749_vm2, %v6748_v28 }
 0x412   : > { %v6621_v59 = vpop.eup %6620  ;;  %6283 = vmatprep.subr.mxu1 %v6748_v28 }
 0x413   : > { %v6623_v60 = vpop.eup %6622  ;;  %v2648_v61 = vmul.f32 %v6621_v59, %v2628_v50 }
 0x414   : > { %v6625_v62 = vpop.eup %6624  ;;  %6276 = vmatmul.mubr.msk.f32.vlgmr.msra.gmra.mrb[40].mxu1 %vm2979_vm4, %v2827_v32  ;;  %v2646_v63 = vmul.f32 %v6623_v60, %v2627_v53 }
 0x415   : > { %v6627_v0 = vpop.eup %6626  ;;  %6284 = vmatpush3.msra.mxu1 %v3662_v58  ;;  %6285 = vmatprep.mubr.msk.f32.mxu1 %vm6749_vm2, %v6748_v28  ;;  %v2666_v1 = vsel %vm1966_vm1, %v2648_v61, 0.0  ;;  %v2644_v2 = vmul.f32 %v6625_v62, %v2636_v55 }
 0x416   : > { %v2665_v3 = vsel %vm1966_vm1, %v2646_v63, 0.0  ;;  %v2642_v4 = vmul.f32 %v6627_v0, %v2635_v56  ;;  %6293 = vmatprep.subr.mxu1 %v6748_v28 }
 0x417   : > { %v2667_v5 = vadd.f32 %v2666_v1, %v2665_v3  ;;  %v2650_v6 = vsel %vm1966_vm1, %v2644_v2, 0.0 }
 0x418   : > { %6286 = vmatmul.mubr.msk.f32.vlgmr.msra.gmra.mrb[42].mxu1 %vm2979_vm4, %v2972_v46  ;;  %v2649_v7 = vsel %vm1966_vm1, %v2642_v4, 0.0 }
 0x419   : > { %2668 = vadd.xlane.f32.xlu1 %v2667_v5  ;;  %v2651_v8 = vadd.f32 %v2650_v6, %v2649_v7  ;;  %6295 = vmatprep.mubr.msk.f32.mxu1 %vm6749_vm2, %v6748_v28 }
 0x41a   : > { %6294 = vmatpush3.msk.msra.mxu1 %vm3952_vm6, %v7270_v41 }
 0x41b   : > { %6303 = vmatprep.subr.mxu1 %v6748_v28 }
 0x41d   : > { %2652 = vadd.xlane.f32.xlu1 %v2651_v8 }
 0x4a6   : > { %v2669_v10 = vpop.xlane.xlu1 %2668 }
 0x4a7   : > { %v2670_v11 = vrot.slane %v2669_v10, 4 }
 0x4a9   : > { %v2671_v12 = vadd.f32 %v2670_v11, %v2669_v10 }
 0x4aa   : > { %v2653_v13 = vpop.xlane.xlu1 %2652 }
 0x4ab   : > { %v2672_v14 = vrot.slane %v2671_v12, 2  ;;  %v2654_v15 = vrot.slane %v2653_v13, 4 }
 0x4ad   : > { %v2655_v17 = vadd.f32 %v2654_v15, %v2653_v13  ;;  %v2673_v16 = vadd.f32 %v2672_v14, %v2671_v12 }
 0x4af   : > { %v2656_v18 = vrot.slane %v2655_v17, 2  ;;  %v2674_v20 = vrot.slane %v2673_v16, 1 }
 0x4b1   : > { %v2657_v19 = vadd.f32 %v2656_v18, %v2655_v17  ;;  %v2675_v23 = vadd.f32 %v2674_v20, %v2673_v16 }
 0x4b3   : > { %v2658_v21 = vrot.slane %v2657_v19, 1 }
 0x4b5   : > { %v2659_v22 = vadd.f32 %v2658_v21, %v2657_v19 }
 0x4b7   : > { %6539 = vpush %v2659_v22 }
 0x4b8   : > { %6541 = vpush %v2675_v23 }
 0x4d7   : > { %v3049_v24 = vpop.f32.mrb[32].mxu1 }
 0x4d8   : > { %v6237_v26 = vpop.f32.mrb[33].mxu1  ;;  %6238 = vmatprep.subr.mxu0 %v3049_v24 }
 0x4d9   : > { %6239 = vmatpush3.msra.mxu0 %v3049_v24 }
 0x4da   : > { %6241 = vmatmul.mubr.msk.f32.vlgmr.msra.gmra.mrb[36].mxu0 %vm2979_vm4, %v2977_v25 }
 0x4db   : > { %v3203_v27 = vpop.f32.mrb[34].mxu1  ;;  %6250 = vmatprep.mubr.msk.f32.mxu0 %vm2979_vm4, %v2976_v9 }
 0x4dc   : > { %v6247_v29 = vpop.f32.mrb[35].mxu1  ;;  %6248 = vmatprep.subr.mxu0 %v3203_v27 }
 0x4dd   : > { %6249 = vmatpush3.msra.mxu0 %v3203_v27 }
 0x4de   : > { %6251 = vmatmul.mubr.msk.f32.vlgmr.msra.gmra.mrb[38].mxu0 %vm2979_vm4, %v2977_v25 }
 0x4df   : > { %v3352_v30 = vpop.f32.mrb[36].mxu1  ;;  %6260 = vmatprep.mubr.msk.f32.mxu0 %vm2979_vm4, %v2976_v9 }
 0x4e0   : > { %v6257_v31 = vpop.f32.mrb[37].mxu1  ;;  %6258 = vmatprep.subr.mxu0 %v3352_v30 }
 0x4e1   : > { %6259 = vmatpush3.msra.mxu0 %v3352_v30 }
 0x4e2   : > { %6261 = vmatmul.mubr.msk.f32.vlgmr.msra.gmra.mrb[40].mxu0 %vm2979_vm4, %v2977_v25 }
 0x4e3   : > { %v3501_v32 = vpop.f32.mrb[38].mxu1  ;;  %6270 = vmatprep.mubr.msk.f32.mxu0 %vm2979_vm4, %v2976_v9 }
 0x4e4   : > { %v6267_v33 = vpop.f32.mrb[39].mxu1  ;;  %6268 = vmatprep.subr.mxu0 %v3501_v32 }
 0x4e5   : > { %6269 = vmatpush3.msra.mxu0 %v3501_v32  ;;  %v4595_v33 = vld [vmem:[%s7470_s4] sm:$0xf]  ;;  %s7473_s4 = sld [smem:[#allocation19_spill]] }
 0x4e6   : > { %6271 = vmatmul.mubr.msk.f32.vlgmr.msra.gmra.mrb[42].mxu0 %vm2979_vm4, %v2977_v25  ;;  %6278 = vmatprep.subr.mxu0 %v6748_v28 }
 0x4e7   : > { %v3729_v34 = vpop.f32.mrb[40].mxu1  ;;  %6280 = vmatprep.mubr.msk.f32.mxu0 %vm6749_vm2, %v6748_v28 }
 0x4e8   : > { %s6540_s23 = spop %6539  ;;  %v6277_v36 = vpop.f32.mrb[41].mxu1  ;;  %6279 = vmatpush3.msra.mxu0 %v3729_v34 }
 0x4e9   : > { %s2661_s3 = smul.f32 0.00390625, %s6540_s23  ;;  %s6542_s1 = spop %6541  ;;  %6288 = vmatprep.subr.mxu0 %v6748_v28 }
 0x4ea   : > { %s2677_s28 = smul.f32 0.00390625, %s6542_s1  ;;  %6281 = vmatmul.mubr.msk.f32.vlgmr.msra.gmra.mrb[44].mxu0 %vm2979_vm4, %v3661_v35 }
 0x4eb   : > { %v2662_v37 = vstv %s2661_s3  ;;  %v3872_v38 = vpop.f32.mrb[42].mxu1  ;;  %6290 = vmatprep.mubr.msk.f32.mxu0 %vm6749_vm2, %v6748_v28 }
 0x4ec   : > { %2664 = vst.msk [vmem:[%s7176_s0] sm:$0x1] %vm2663_vm5, %v2662_v37  ;;  %v2678_v39 = vstv %s2677_s28  ;;  %v6287_v40 = vpop.f32.mrb[43].mxu1  ;;  %6289 = vmatpush3.msra.mxu0 %v3872_v38  ;;  %s7472_s28 = sld [smem:[#allocation20_spill]] }
 0x4ed   : > { %2679 = vst.msk [vmem:[%s7183_s10] sm:$0x1] %vm2663_vm5, %v2678_v39  ;;  %6298 = vmatprep.subr.mxu0 %v6748_v28 }
 0x4ee   : > { %6291 = vmatmul.mubr.msk.f32.vlgmr.msra.gmra.mrb[46].mxu0 %vm2979_vm4, %v3661_v35 }
 0x4ef   : > { %6300 = vmatprep.mubr.msk.f32.mxu0 %vm6749_vm2, %v6748_v28 }
 0x5ad   : > { %v6242_v42 = vpop.f32.mrb[36].mxu0 }
 0x5ae   : > { %v3125_v43 = vpop.f32.mrb[37].mxu0  ;;  %v3581_v45 = vmul.f32 %v6242_v42, %v6242_v42 }
 0x5af   : > { %v3580_v48 = vmul.f32 %v3125_v43, %v3125_v43 }
 0x5b1   : > { %v6252_v44 = vpop.f32.mrb[38].mxu0 }
 0x5b2   : > { %v3583_v46 = vmul.f32 %v6252_v44, %v6252_v44  ;;  %v3273_v47 = vpop.f32.mrb[39].mxu0 }
 0x5b3   : > { %v3582_v49 = vmul.f32 %v3273_v47, %v3273_v47 }
 0x5b4   : > { %v3585_v50 = vsub.f32 %v3581_v45, %v3583_v46  ;;  %v3589_v51 = vadd.f32 %v3583_v46, %v3581_v45 }
 0x5b5   : > { %v3584_v52 = vsub.f32 %v3580_v48, %v3582_v49  ;;  %v3588_v53 = vadd.f32 %v3582_v49, %v3580_v48  ;;  %v6262_v54 = vpop.f32.mrb[40].mxu0 }
 0x5b6   : > { %v3422_v55 = vpop.f32.mrb[41].mxu0  ;;  %v3587_v57 = vmul.f32 0.25, %v3585_v50  ;;  %v3591_v0 = vmul.f32 0.5, %v3589_v51 }
 0x5b7   : > { %v3586_v61 = vmul.f32 0.25, %v3584_v52  ;;  %v3590_v3 = vmul.f32 0.5, %v3588_v53 }
 0x5b8   : > { %v3611_v7 = vmul.f32 2.0, %v3587_v57  ;;  %v3617_v14 = vadd.f32 6.5025, %v3591_v0 }
 0x5b9   : > { %v6272_v56 = vpop.f32.mrb[42].mxu0  ;;  %v3610_v11 = vmul.f32 2.0, %v3586_v61  ;;  %v3616_v16 = vadd.f32 6.5025, %v3590_v3 }
 0x5ba   : > { %v3593_v58 = vsub.f32 %v6262_v54, %v6272_v56  ;;  %v3599_v59 = vadd.f32 %v6272_v56, %v6262_v54  ;;  %v3571_v60 = vpop.f32.mrb[43].mxu0  ;;  %v3613_v21 = vadd.f32 6.5025, %v3611_v7  ;;  %v4594_v7 = vld [vmem:[%s7472_s28] sm:$0x3] }
 0x5bb   : > { %v3592_v62 = vsub.f32 %v3422_v55, %v3571_v60  ;;  %v3598_v63 = vadd.f32 %v3571_v60, %v3422_v55  ;;  %v3612_v25 = vadd.f32 6.5025, %v3610_v11 }
 0x5bc   : > { %v3595_v1 = vmul.f32 0.25, %v3593_v58  ;;  %v3601_v2 = vmul.f32 0.5, %v3599_v59 }
 0x5bd   : > { %v3594_v4 = vmul.f32 0.25, %v3592_v62  ;;  %v3600_v5 = vmul.f32 0.5, %v3598_v63  ;;  %v3802_v6 = vpop.f32.mrb[44].mxu0  ;;  %v3946_v62 = vld [vmem:[%s7471_s29] sm:$0x1f]  ;;  %s7474_s29 = sld [smem:[#allocation17_spill]] }
 0x5be   : > { %v3597_v8 = vsub.f32 %v3595_v1, %v3587_v57  ;;  %v3603_v9 = vsub.f32 %v3601_v2, %v3591_v0  ;;  %v6282_v10 = vpop.f32.mrb[45].mxu0  ;;  %6296 = vmatmul.mubr.msk.f32.vlgmr.msra.gmra.mrb[44].mxu1 %vm3948_vm7, %v3802_v6  ;;  %v4248_v29 = vmul.f32 %v3802_v6, %v3802_v6 }
 0x5bf   : > { %v3596_v12 = vsub.f32 %v3594_v4, %v3586_v61  ;;  %v3602_v13 = vsub.f32 %v3600_v5, %v3590_v3  ;;  %6304 = vmatpush3.msk.msra.mxu1 %vm3952_vm6, %v7270_v41  ;;  %6305 = vmatprep.mubr.msk.f32.mxu1 %vm6749_vm2, %v6748_v28 }
 0x5c0   : > { %v3605_v15 = vmul.f32 2.0, %v3597_v8  ;;  %v3609_v17 = vadd.f32 58.5225, %v3603_v9  ;;  %6313 = vmatprep.subr.mxu1 %v6748_v28 }
 0x5c1   : > { %v3604_v18 = vmul.f32 2.0, %v3596_v12  ;;  %v3608_v19 = vadd.f32 58.5225, %v3602_v13  ;;  %v3942_v20 = vpop.f32.mrb[46].mxu0 }
 0x5c2   : > { %v3607_v22 = vadd.f32 58.5225, %v3605_v15  ;;  %v3619_v23 = vmul.f32 %v3617_v14, %v3609_v17  ;;  %6628 = vrcp.f32 %v3609_v17  ;;  %v6292_v24 = vpop.f32.mrb[47].mxu0  ;;  %6306 = vmatmul.mubr.msk.f32.vlgmr.msra.gmra.mrb[46].mxu1 %vm3948_vm7, %v3942_v20  ;;  %v4395_v32 = vmul.f32 %v3942_v20, %v3942_v20  ;;  %v4889_v14 = vld [vmem:[%s7473_s4] sm:$0x3] }
 0x5c3   : > { %v3606_v26 = vadd.f32 58.5225, %v3604_v18  ;;  %v3618_v27 = vmul.f32 %v3616_v16, %v3608_v19  ;;  %6630 = vrcp.f32 %v3608_v19  ;;  %6314 = vmatpush3.msk.msra.mxu1 %vm3952_vm6, %v7270_v41  ;;  %6315 = vmatprep.mubr.msk.f32.mxu1 %vm6749_vm2, %v6748_v28 }
 0x5c4   : > { %6632 = vrcp.f32 %v3619_v23  ;;  %6323 = vmatprep.subr.mxu1 %v6748_v28  ;;  %v3615_v30 = vmul.f32 %v3613_v21, %v3607_v22 }
 0x5c5   : > { %6634 = vrcp.f32 %v3618_v27  ;;  %v3614_v31 = vmul.f32 %v3612_v25, %v3606_v26 }
 0x5c6   : > { %6316 = vmatmul.mubr.msk.f32.vlgmr.msra.gmra.mrb[48].mxu1 %vm3948_vm7, %v4248_v29 }
 0x5c7   : > { %6324 = vmatpush3.msk.msra.mxu1 %vm3952_vm6, %v7270_v41  ;;  %6325 = vmatprep.mubr.msk.f32.mxu1 %vm6749_vm2, %v6748_v28 }
 0x5c8   : > { %6333 = vmatprep.subr.mxu1 %v6748_v28 }
 0x5ca   : > { %6326 = vmatmul.mubr.msk.f32.vlgmr.msra.gmra.mrb[50].mxu1 %vm3948_vm7, %v4395_v32 }
 0x5cb   : > { %6334 = vmatpush3.msk.msra.mxu1 %vm3952_vm6, %v4595_v33  ;;  %6335 = vmatprep.mubr.msk.f32.mxu1 %vm6749_vm2, %v6748_v28 }
 0x5cc   : > { %v6629_v34 = vpop.eup %6628  ;;  %6343 = vmatprep.subr.mxu1 %v6748_v28 }
 0x5cd   : > { %v6631_v35 = vpop.eup %6630  ;;  %v3627_v36 = vmul.f32 %v6629_v34, %v3607_v22 }
 0x5ce   : > { %v6633_v37 = vpop.eup %6632  ;;  %6336 = vmatmul.mubr.msk.f32.vlgmr.msra.gmra.mrb[52].mxu1 %vm3948_vm7, %v3802_v6  ;;  %v3625_v38 = vmul.f32 %v6631_v35, %v3606_v26 }
 0x5cf   : > { %v6635_v39 = vpop.eup %6634  ;;  %6344 = vmatpush3.msk.msra.mxu1 %vm3952_vm6, %v4595_v33  ;;  %6345 = vmatprep.mubr.msk.f32.mxu1 %vm6749_vm2, %v6748_v28  ;;  %v3647_v40 = vsel %vm3630_vm8, %v3627_v36, 0.0  ;;  %v3623_v41 = vmul.f32 %v6633_v37, %v3615_v30 }
 0x5d0   : > { %v3646_v42 = vsel %vm3628_vm9, %v3625_v38, 0.0  ;;  %v3621_v43 = vmul.f32 %v6635_v39, %v3614_v31  ;;  %6353 = vmatprep.subr.mxu1 %v6748_v28 }
 0x5d1   : > { %v3648_v44 = vadd.f32 %v3647_v40, %v3646_v42  ;;  %v3631_v45 = vsel %vm3630_vm8, %v3623_v41, 0.0 }
 0x5d2   : > { %6346 = vmatmul.mubr.msk.f32.vlgmr.msra.gmra.mrb[54].mxu1 %vm3948_vm7, %v3942_v20  ;;  %v3629_v46 = vsel %vm3628_vm9, %v3621_v43, 0.0 }
 0x5d3   : > { %3649 = vadd.xlane.f32.xlu1 %v3648_v44  ;;  %v3632_v47 = vadd.f32 %v3631_v45, %v3629_v46  ;;  %6355 = vmatprep.mubr.msk.f32.mxu1 %vm6749_vm2, %v6748_v28 }
 0x5d4   : > { %6354 = vmatpush3.msk.msra.mxu1 %vm4894_vm11, %v4889_v14 }
 0x5d5   : > { %3633 = vadd.xlane.f32.xlu0 %v3632_v47  ;;  %6363 = vmatprep.subr.mxu1 %v6748_v28 }
 0x660   : > { %v3650_v48 = vpop.xlane.xlu1 %3649 }
 0x661   : > { %v3651_v49 = vrot.slane %v3650_v48, 4 }
 0x662   : > { %v3634_v50 = vpop.xlane.xlu0 %3633 }
 0x663   : > { %v3652_v51 = vadd.f32 %v3651_v49, %v3650_v48  ;;  %v3635_v52 = vrot.slane %v3634_v50, 4 }
 0x665   : > { %v3653_v53 = vrot.slane %v3652_v51, 2  ;;  %v3636_v54 = vadd.f32 %v3635_v52, %v3634_v50 }
 0x667   : > { %v3637_v55 = vrot.slane %v3636_v54, 2  ;;  %v3654_v56 = vadd.f32 %v3653_v53, %v3652_v51 }
 0x669   : > { %v3638_v57 = vadd.f32 %v3637_v55, %v3636_v54  ;;  %v3655_v58 = vrot.slane %v3654_v56, 1 }
 0x66b   : > { %v3639_v59 = vrot.slane %v3638_v57, 1  ;;  %v3656_v61 = vadd.f32 %v3655_v58, %v3654_v56 }
 0x66d   : > { %v3640_v60 = vadd.f32 %v3639_v59, %v3638_v57 }
 0x66f   : > { %6543 = vpush %v3640_v60 }
 0x670   : > { %6545 = vpush %v3656_v61 }
 0x691   : > { %v4022_v63 = vpop.f32.mrb[44].mxu1 }
 0x692   : > { %v6297_v0 = vpop.f32.mrb[45].mxu1  ;;  %6299 = vmatpush3.msk.msra.mxu0 %vm3952_vm6, %v4022_v63 }
 0x693   : > { %6301 = vmatmul.mubr.msk.f32.vlgmr.msra.gmra.mrb[48].mxu0 %vm3948_vm7, %v3946_v62  ;;  %6308 = vmatprep.subr.mxu0 %v6748_v28 }
 0x694   : > { %6310 = vmatprep.mubr.msk.f32.mxu0 %vm6749_vm2, %v6748_v28 }
 0x695   : > { %v4171_v1 = vpop.f32.mrb[46].mxu1 }
 0x696   : > { %v6307_v2 = vpop.f32.mrb[47].mxu1  ;;  %6309 = vmatpush3.msk.msra.mxu0 %vm3952_vm6, %v4171_v1 }
 0x697   : > { %6311 = vmatmul.mubr.msk.f32.vlgmr.msra.gmra.mrb[50].mxu0 %vm3948_vm7, %v3946_v62  ;;  %6318 = vmatprep.subr.mxu0 %v6748_v28 }
 0x698   : > { %6320 = vmatprep.mubr.msk.f32.mxu0 %vm6749_vm2, %v6748_v28 }
 0x699   : > { %v4318_v3 = vpop.f32.mrb[48].mxu1 }
 0x69a   : > { %v6317_v4 = vpop.f32.mrb[49].mxu1  ;;  %6319 = vmatpush3.msk.msra.mxu0 %vm3952_vm6, %v4318_v3 }
 0x69b   : > { %6321 = vmatmul.mubr.msk.f32.vlgmr.msra.gmra.mrb[52].mxu0 %vm3948_vm7, %v3946_v62  ;;  %6328 = vmatprep.subr.mxu0 %v6748_v28 }
 0x69c   : > { %6330 = vmatprep.mubr.msk.f32.mxu0 %vm6749_vm2, %v6748_v28 }
 0x69d   : > { %v4465_v5 = vpop.f32.mrb[50].mxu1 }
 0x69e   : > { %v6327_v6 = vpop.f32.mrb[51].mxu1  ;;  %6329 = vmatpush3.msk.msra.mxu0 %vm3952_vm6, %v4465_v5 }
 0x69f   : > { %6331 = vmatmul.mubr.msk.f32.vlgmr.msra.gmra.mrb[54].mxu0 %vm3948_vm7, %v3946_v62  ;;  %6338 = vmatprep.subr.mxu0 %v6748_v28  ;;  %v4888_v6 = vld [vmem:[%s7474_s29] sm:$0x7] }
 0x6a0   : > { %s6544_s23 = spop %6543  ;;  %6340 = vmatprep.mubr.msk.f32.mxu0 %vm6749_vm2, %v6748_v28 }
 0x6a1   : > { %s3642_s19 = smul.f32 0.012345679, %s6544_s23  ;;  %s6546_s30 = spop %6545  ;;  %v4665_v8 = vpop.f32.mrb[52].mxu1 }
 0x6a2   : > { %s3658_s27 = smul.f32 0.012345679, %s6546_s30  ;;  %v6337_v9 = vpop.f32.mrb[53].mxu1  ;;  %6339 = vmatpush3.msk.msra.mxu0 %vm3952_vm6, %v4665_v8 }
 0x6a3   : > { %v3643_v10 = vstv %s3642_s19  ;;  %6341 = vmatmul.mubr.msk.f32.vlgmr.msra.gmra.mrb[56].mxu0 %vm3948_vm7, %v4594_v7  ;;  %6348 = vmatprep.subr.mxu0 %v6748_v28 }
 0x6a4   : > { %3645 = vst.msk [vmem:[%s7176_s0] sm:$0x1] %vm3644_vm10, %v3643_v10  ;;  %v3659_v11 = vstv %s3658_s27  ;;  %6350 = vmatprep.mubr.msk.f32.mxu0 %vm6749_vm2, %v6748_v28 }
 0x6a5   : > { %3660 = vst.msk [vmem:[%s7183_s10] sm:$0x1] %vm3644_vm10, %v3659_v11  ;;  %v4811_v12 = vpop.f32.mrb[54].mxu1 }
 0x6a6   : > { %v6347_v13 = vpop.f32.mrb[55].mxu1  ;;  %6349 = vmatpush3.msk.msra.mxu0 %vm3952_vm6, %v4811_v12 }
 0x6a7   : > { %6351 = vmatmul.mubr.msk.f32.vlgmr.msra.gmra.mrb[58].mxu0 %vm3948_vm7, %v4594_v7  ;;  %6358 = vmatprep.subr.mxu0 %v6748_v28 }
 0x6a8   : > { %6360 = vmatprep.mubr.msk.f32.mxu0 %vm6749_vm2, %v6748_v28 }
 0x766   : > { %v4098_v15 = vpop.f32.mrb[48].mxu0 }
 0x767   : > { %v6302_v17 = vpop.f32.mrb[49].mxu0  ;;  %v4542_v18 = vmul.f32 %v4098_v15, %v4098_v15 }
 0x76a   : > { %v4244_v16 = vpop.f32.mrb[50].mxu0 }
 0x76b   : > { %v4543_v19 = vmul.f32 %v4244_v16, %v4244_v16  ;;  %v6312_v20 = vpop.f32.mrb[51].mxu0 }
 0x76d   : > { %v4544_v21 = vsub.f32 %v4542_v18, %v4543_v19  ;;  %v4546_v22 = vadd.f32 %v4543_v19, %v4542_v18 }
 0x76e   : > { %v4391_v23 = vpop.f32.mrb[52].mxu0 }
 0x76f   : > { %v6322_v24 = vpop.f32.mrb[53].mxu0  ;;  %v4545_v26 = vmul.f32 0.25, %v4544_v21  ;;  %v4547_v31 = vmul.f32 0.5, %v4546_v22 }
 0x771   : > { %v4557_v35 = vmul.f32 2.0, %v4545_v26  ;;  %v4560_v39 = vadd.f32 6.5025, %v4547_v31 }
 0x772   : > { %v4538_v25 = vpop.f32.mrb[54].mxu0 }
 0x773   : > { %v4548_v27 = vsub.f32 %v4391_v23, %v4538_v25  ;;  %v4551_v29 = vadd.f32 %v4538_v25, %v4391_v23  ;;  %v6332_v30 = vpop.f32.mrb[55].mxu0  ;;  %v4558_v43 = vadd.f32 6.5025, %v4557_v35 }
 0x775   : > { %v4549_v32 = vmul.f32 0.25, %v4548_v27  ;;  %v4552_v33 = vmul.f32 0.5, %v4551_v29 }
 0x776   : > { %v4741_v34 = vpop.f32.mrb[56].mxu0 }
 0x777   : > { %v4550_v36 = vsub.f32 %v4549_v32, %v4545_v26  ;;  %v4553_v37 = vsub.f32 %v4552_v33, %v4547_v31  ;;  %v6342_v38 = vpop.f32.mrb[57].mxu0  ;;  %6356 = vmatmul.mubr.msk.f32.vlgmr.msra.gmra.mrb[56].mxu1 %vm4890_vm12, %v4741_v34  ;;  %v5190_v47 = vmul.f32 %v4741_v34, %v4741_v34 }
 0x778   : > { %6364 = vmatpush3.msk.msra.mxu1 %vm4894_vm11, %v4889_v14  ;;  %6365 = vmatprep.mubr.msk.f32.mxu1 %vm6749_vm2, %v6748_v28 }
 0x779   : > { %v4554_v40 = vmul.f32 2.0, %v4550_v36  ;;  %v4556_v41 = vadd.f32 58.5225, %v4553_v37  ;;  %6373 = vmatprep.subr.mxu1 %v6748_v28 }
 0x77a   : > { %v4884_v42 = vpop.f32.mrb[58].mxu0 }
 0x77b   : > { %v4561_v44 = vmul.f32 %v4560_v39, %v4556_v41  ;;  %6636 = vrcp.f32 %v4556_v41  ;;  %v6352_v45 = vpop.f32.mrb[59].mxu0  ;;  %6366 = vmatmul.mubr.msk.f32.vlgmr.msra.gmra.mrb[58].mxu1 %vm4890_vm12, %v4884_v42  ;;  %v4555_v46 = vadd.f32 58.5225, %v4554_v40  ;;  %v5337_v49 = vmul.f32 %v4884_v42, %v4884_v42 }
 0x77c   : > { %6374 = vmatpush3.msk.msra.mxu1 %vm4894_vm11, %v4889_v14  ;;  %6375 = vmatprep.mubr.msk.f32.mxu1 %vm6749_vm2, %v6748_v28 }
 0x77d   : > { %6638 = vrcp.f32 %v4561_v44  ;;  %6383 = vmatprep.subr.mxu1 %v6748_v28  ;;  %v4559_v48 = vmul.f32 %v4558_v43, %v4555_v46 }
 0x77f   : > { %6376 = vmatmul.mubr.msk.f32.vlgmr.msra.gmra.mrb[60].mxu1 %vm4890_vm12, %v5190_v47 }
 0x780   : > { %6384 = vmatpush3.msk.msra.mxu1 %vm4894_vm11, %v4889_v14  ;;  %6385 = vmatprep.mubr.msk.f32.mxu1 %vm6749_vm2, %v6748_v28 }
 0x783   : > { %6386 = vmatmul.mubr.msk.f32.vlgmr.msra.gmra.mrb[62].mxu1 %vm4890_vm12, %v5337_v49 }
 0x785   : > { %v6637_v50 = vpop.eup %6636 }
 0x786   : > { %v4565_v51 = vmul.f32 %v6637_v50, %v4555_v46 }
 0x787   : > { %v6639_v52 = vpop.eup %6638 }
 0x788   : > { %v4581_v53 = vsel %vm4566_vm13, %v4565_v51, 0.0  ;;  %v4563_v54 = vmul.f32 %v6639_v52, %v4559_v48 }
 0x789   : > { %4582 = vadd.xlane.f32.xlu1 %v4581_v53 }
 0x78a   : > { %v4567_v55 = vsel %vm4566_vm13, %v4563_v54, 0.0 }
 0x78b   : > { %4568 = vadd.xlane.f32.xlu0 %v4567_v55 }
 0x816   : > { %v4583_v56 = vpop.xlane.xlu1 %4582 }
 0x817   : > { %v4584_v57 = vrot.slane %v4583_v56, 4 }
 0x818   : > { %v4569_v58 = vpop.xlane.xlu0 %4568 }
 0x819   : > { %v4585_v59 = vadd.f32 %v4584_v57, %v4583_v56  ;;  %v4570_v60 = vrot.slane %v4569_v58, 4 }
 0x81b   : > { %v4586_v61 = vrot.slane %v4585_v59, 2  ;;  %v4571_v62 = vadd.f32 %v4570_v60, %v4569_v58 }
 0x81d   : > { %v4572_v63 = vrot.slane %v4571_v62, 2  ;;  %v4587_v0 = vadd.f32 %v4586_v61, %v4585_v59 }
 0x81f   : > { %v4573_v1 = vadd.f32 %v4572_v63, %v4571_v62  ;;  %v4588_v2 = vrot.slane %v4587_v0, 1 }
 0x821   : > { %v4574_v3 = vrot.slane %v4573_v1, 1  ;;  %v4589_v5 = vadd.f32 %v4588_v2, %v4587_v0 }
 0x823   : > { %v4575_v4 = vadd.f32 %v4574_v3, %v4573_v1 }
 0x825   : > { %6547 = vpush %v4575_v4 }
 0x826   : > { %6549 = vpush %v4589_v5 }
 0x84a   : > { %v4964_v7 = vpop.f32.mrb[56].mxu1 }
 0x84b   : > { %v6357_v8 = vpop.f32.mrb[57].mxu1  ;;  %6359 = vmatpush3.msk.msra.mxu0 %vm4894_vm11, %v4964_v7 }
 0x84c   : > { %6361 = vmatmul.mubr.msk.f32.vlgmr.msra.gmra.mrb[60].mxu0 %vm4890_vm12, %v4888_v6  ;;  %6368 = vmatprep.subr.mxu0 %v6748_v28 }
 0x84d   : > { %6370 = vmatprep.mubr.msk.f32.mxu0 %vm6749_vm2, %v6748_v28 }
 0x84e   : > { %v5113_v9 = vpop.f32.mrb[58].mxu1 }
 0x84f   : > { %v6367_v10 = vpop.f32.mrb[59].mxu1  ;;  %6369 = vmatpush3.msk.msra.mxu0 %vm4894_vm11, %v5113_v9 }
 0x850   : > { %6371 = vmatmul.mubr.msk.f32.vlgmr.msra.gmra.mrb[62].mxu0 %vm4890_vm12, %v4888_v6  ;;  %6378 = vmatprep.subr.mxu0 %v6748_v28 }
 0x851   : > { %6380 = vmatprep.mubr.msk.f32.mxu0 %vm6749_vm2, %v6748_v28 }
 0x852   : > { %v5260_v11 = vpop.f32.mrb[60].mxu1 }
 0x853   : > { %v6377_v12 = vpop.f32.mrb[61].mxu1  ;;  %6379 = vmatpush3.msk.msra.mxu0 %vm4894_vm11, %v5260_v11 }
 0x854   : > { %6381 = vmatmul.mubr.msk.f32.vlgmr.msra.gmra.mrb[64].mxu0 %vm4890_vm12, %v4888_v6  ;;  %6388 = vmatprep.subr.mxu0 %v6748_v28 }
 0x855   : > { %6390 = vmatprep.mubr.msk.f32.mxu0 %vm6749_vm2, %v6748_v28 }
 0x856   : > { %s6548_s23 = spop %6547  ;;  %v5407_v13 = vpop.f32.mrb[62].mxu1 }
 0x857   : > { %s4577_s3 = smul.f32 0.04, %s6548_s23  ;;  %s6550_s1 = spop %6549  ;;  %v6387_v14 = vpop.f32.mrb[63].mxu1  ;;  %6389 = vmatpush3.msk.msra.mxu0 %vm4894_vm11, %v5407_v13 }
 0x858   : > { %s4591_s28 = smul.f32 0.04, %s6550_s1  ;;  %6391 = vmatmul.mubr.msk.f32.vlgmr.msra.gmra.mrb[66].mxu0 %vm4890_vm12, %v4888_v6 }
 0x859   : > { %v4578_v15 = vstv %s4577_s3 }
 0x85a   : > { %4580 = vst.msk [vmem:[%s7176_s0] sm:$0x1] %vm4579_vm14, %v4578_v15  ;;  %v4592_v17 = vstv %s4591_s28 }
 0x85b   : > { %4593 = vst.msk [vmem:[%s7183_s10] sm:$0x1] %vm4579_vm14, %v4592_v17 }
 0x91f   : > { %v5040_v16 = vpop.f32.mrb[60].mxu0 }
 0x920   : > { %v6362_v18 = vpop.f32.mrb[61].mxu0  ;;  %v5484_v20 = vmul.f32 %v5040_v16, %v5040_v16 }
 0x923   : > { %v5186_v19 = vpop.f32.mrb[62].mxu0 }
 0x924   : > { %v5485_v28 = vmul.f32 %v5186_v19, %v5186_v19  ;;  %v6372_v21 = vpop.f32.mrb[63].mxu0 }
 0x926   : > { %v5486_v22 = vsub.f32 %v5484_v20, %v5485_v28  ;;  %v5488_v23 = vadd.f32 %v5485_v28, %v5484_v20 }
 0x927   : > { %v5333_v24 = vpop.f32.mrb[64].mxu0 }
 0x928   : > { %v6382_v25 = vpop.f32.mrb[65].mxu0  ;;  %v5487_v27 = vmul.f32 0.25, %v5486_v22  ;;  %v5489_v32 = vmul.f32 0.5, %v5488_v23 }
 0x92a   : > { %v5499_v35 = vmul.f32 2.0, %v5487_v27  ;;  %v5502_v38 = vadd.f32 6.5025, %v5489_v32 }
 0x92b   : > { %v5480_v26 = vpop.f32.mrb[66].mxu0 }
 0x92c   : > { %v5490_v29 = vsub.f32 %v5333_v24, %v5480_v26  ;;  %v5493_v30 = vadd.f32 %v5480_v26, %v5333_v24  ;;  %v6392_v31 = vpop.f32.mrb[67].mxu0  ;;  %v5500_v41 = vadd.f32 6.5025, %v5499_v35 }
 0x92e   : > { %v5491_v33 = vmul.f32 0.25, %v5490_v29  ;;  %v5494_v34 = vmul.f32 0.5, %v5493_v30 }
 0x930   : > { %v5492_v36 = vsub.f32 %v5491_v33, %v5487_v27  ;;  %v5495_v37 = vsub.f32 %v5494_v34, %v5489_v32 }
 0x932   : > { %v5496_v39 = vmul.f32 2.0, %v5492_v36  ;;  %v5498_v40 = vadd.f32 58.5225, %v5495_v37 }
 0x934   : > { %v5503_v42 = vmul.f32 %v5502_v38, %v5498_v40  ;;  %6640 = vrcp.f32 %v5498_v40  ;;  %v5497_v43 = vadd.f32 58.5225, %v5496_v39 }
 0x936   : > { %6642 = vrcp.f32 %v5503_v42  ;;  %v5501_v44 = vmul.f32 %v5500_v41, %v5497_v43 }
 0x93e   : > { %v6641_v45 = vpop.eup %6640 }
 0x93f   : > { %v5507_v46 = vmul.f32 %v6641_v45, %v5497_v43 }
 0x940   : > { %v6643_v47 = vpop.eup %6642 }
 0x941   : > { %v5523_v48 = vsel %vm5508_vm15, %v5507_v46, 0.0  ;;  %v5505_v49 = vmul.f32 %v6643_v47, %v5501_v44 }
 0x942   : > { %5524 = vadd.xlane.f32.xlu1 %v5523_v48 }
 0x943   : > { %v5509_v50 = vsel %vm5508_vm15, %v5505_v49, 0.0 }
 0x944   : > { %5510 = vadd.xlane.f32.xlu0 %v5509_v50 }
 0x9cf   : > { %v5525_v51 = vpop.xlane.xlu1 %5524 }
 0x9d0   : > { %v5526_v52 = vrot.slane %v5525_v51, 4 }
 0x9d1   : > { %v5511_v53 = vpop.xlane.xlu0 %5510 }
 0x9d2   : > { %v5527_v54 = vadd.f32 %v5526_v52, %v5525_v51  ;;  %v5512_v55 = vrot.slane %v5511_v53, 4 }
 0x9d4   : > { %v5528_v56 = vrot.slane %v5527_v54, 2  ;;  %v5513_v57 = vadd.f32 %v5512_v55, %v5511_v53 }
 0x9d6   : > { %v5529_v58 = vadd.f32 %v5528_v56, %v5527_v54  ;;  %v5514_v59 = vrot.slane %v5513_v57, 2 }
 0x9d8   : > { %v5515_v60 = vadd.f32 %v5514_v59, %v5513_v57  ;;  %v5530_v61 = vrot.slane %v5529_v58, 1 }
 0x9da   : > { %v5516_v62 = vrot.slane %v5515_v60, 1  ;;  %v5531_v0 = vadd.f32 %v5530_v61, %v5529_v58 }
 0x9dc   : > { %v5517_v63 = vadd.f32 %v5516_v62, %v5515_v60 }
 0x9de   : > { %6551 = vpush %v5517_v63 }
 0x9df   : > { %6553 = vpush %v5531_v0 }
 0xa0f   : > { %s6552_s19 = spop %6551 }
 0xa10   : > { %s5519_s30 = smul.f32 0.11111111, %s6552_s19  ;;  %s6554_s27 = spop %6553 }
 0xa11   : > { %s5533_s6 = smul.f32 0.11111111, %s6554_s27 }
 0xa12   : > { %v5520_v1 = vstv %s5519_s30 }
 0xa13   : > { %5522 = vst.msk [vmem:[%s7176_s0] sm:$0x1] %vm5521_vm0, %v5520_v1  ;;  %v5534_v2 = vstv %s5533_s6 }
 0xa14   : > { %5535 = vst.msk [vmem:[%s7183_s10] sm:$0x1] %vm5521_vm0, %v5534_v2 }
 0xa15 PF: > { %s7475_s27 = sld [smem:[#allocation9_spill]]  ;;  %s7476_s4 = sld [smem:[#allocation8_spill]] }
 0xa16   : > { %s7477_s26 = sld [smem:[#allocation10_spill]]  ;;  %s7478_s2 = smov %s6734_s25 }
 0xa1b   : > { %p35_p11 = scmp.ge.s32.totalorder %s7475_s27, 8   ;;  %s7479_s25 = smov %s7476_s4 }
 0xa1d   :  { %37 = sbr.rel (!%p35_p11) target bundleno = 17 (0x11), region = 165 }
 0xa24   :  { %5565 = vsyncpa [#allocation3], 1 }
 0xa25   :  { %5567 = vsyncpa [#allocation3 + $0x1], 1 }
 0xa26   :  { %5568 = vsyncpa [#allocation5], 1 }
 0xa27   :  { %5570 = vsyncpa [#allocation5 + $0x1], 1 }

</bundles_post_ra>
